<compile_context>
chip_gen: v5e
topology: v5e:2x2
jax: 0.10.0
libtpu: 0.0.40
codegen_flags: <defaults>
</compile_context>

<pallas_src>
import math
import numpy as np
import jax
import jax.numpy as jnp
from jax.experimental import pallas as pl
from jax.experimental.pallas import tpu as pltpu

jax.config.update("jax_default_matmul_precision", "highest")

# ----------------------------- configuration --------------------------------
BATCH      = 2
SEQ_LEN    = 8
D_MODEL    = 32
N_HEADS    = 4
D_HEAD     = D_MODEL // N_HEADS
D_FF       = 64
MOVING_AVG = 5      # series_decomp kernel_size (odd, like the default 25)
N_LAYERS   = 2
EPS        = 1e-5   # nn.LayerNorm default eps

SLAB_W         = 3 * D_MODEL                     # widest packed matrix (Wqkv)
ROWS_PER_LAYER = 3 * D_MODEL + D_FF + 2          # Wqkv | Wo | W1 | b1 | W2 | b2
SLAB_ROWS      = N_LAYERS * ROWS_PER_LAYER + 2   # + gamma, beta


# --------------------- constant operators (host-side, exact) -----------------
def _residual_matrix(L, k):
    """R = I - A with A the replicate-padded moving-average operator, so that
    series_decomp(x).residual == R @ x exactly."""
    pad = (k - 1) // 2
    A = np.zeros((L, L), np.float32)
    for i in range(L):
        for j in range(-pad, pad + 1):
            A[i, min(max(i + j, 0), L - 1)] += 1.0 / k
    return np.eye(L, dtype=np.float32) - A


def _seq_demean_matrix(L):
    """S = I - ones/L : subtract-the-seq-mean operator (my_Layernorm 'bias' term)."""
    return np.eye(L, dtype=np.float32) - np.full((L, L), 1.0 / L, np.float32)


# ------------------------------ fused kernel ---------------------------------
def encoder_kernel(x_ref, mats_ref, slab_ref, out_ref, attn_ref):
    B, L, D, H, DH = BATCH, SEQ_LEN, D_MODEL, N_HEADS, D_HEAD

    x = x_ref[...]                       # (B*L, D), resident on-chip for all layers
    decomp = mats_ref[0]                 # (B*L, B*L) block-diag series_decomp residual
    demean = mats_ref[1]                 # (B*L, B*L) block-diag seq-mean subtraction

    def dot(a, b):
        return jnp.dot(a, b, preferred_element_type=jnp.float32)

    def dot_nt(a, b):                    # a @ b.T without an explicit transpose op
        return jax.lax.dot_general(a, b, (((1,), (1,)), ((), ())),
                                   preferred_element_type=jnp.float32)

    for li in range(N_LAYERS):           # static unroll (tiny model)
        r0 = li * ROWS_PER_LAYER
        wqkv = slab_ref[r0:r0 + D, :]                                    # (D, 3D)
        wo   = slab_ref[r0 + D:r0 + 2 * D, 0:D]                          # (D, D)
        w1   = slab_ref[r0 + 2 * D:r0 + 3 * D, 0:D_FF]                   # (D, D_FF)
        b1   = slab_ref[r0 + 3 * D:r0 + 3 * D + 1, 0:D_FF]               # (1, D_FF)
        w2   = slab_ref[r0 + 3 * D + 1:r0 + 3 * D + 1 + D_FF, 0:D]       # (D_FF, D)
        b2   = slab_ref[r0 + 3 * D + 1 + D_FF:r0 + ROWS_PER_LAYER, 0:D]  # (1, D)

        # ---- stand-in multi-head attention: one full-width QKV matmul ----
        qkv = dot(x, wqkv)                                               # (B*L, 3D)

        attn_blocks, ctx_rows = [], []
        for b in range(B):               # B*H = 8 tiny score matmuls (intrinsic to attn)
            rows = slice(b * L, (b + 1) * L)
            head_ctx = []
            for h in range(H):
                q = qkv[rows, h * DH:(h + 1) * DH]                       # (L, DH)
                k = qkv[rows, D + h * DH:D + (h + 1) * DH]
                v = qkv[rows, 2 * D + h * DH:2 * D + (h + 1) * DH]
                s = dot_nt(q, k)                  # (L, L); 1/sqrt(dh) folded into Wq
                s = s - jnp.max(s, axis=-1, keepdims=True)
                e = jnp.exp(s)
                a = e / jnp.sum(e, axis=-1, keepdims=True)   # exact softmax
                attn_blocks.append(a)
                head_ctx.append(dot(a, v))                   # (L, DH)
            ctx_rows.append(jnp.concatenate(head_ctx, axis=-1))          # (L, D)

        # one lane-denser store per layer for all batches/heads: (L, B*H*L)
        attn_ref[li] = jnp.concatenate(attn_blocks, axis=-1)
        ctx = jnp.concatenate(ctx_rows, axis=0)                          # (B*L, D)
        new_x = dot(ctx, wo)                                             # full-width Wo

        # ---- EncoderLayer body (dropout == identity) ----
        res1 = dot(decomp, x + new_x)                 # decomp1 residual (MXU)
        y = jnp.maximum(dot(res1, w1) + b1, 0.0)      # conv1 (1x1) + ReLU
        y = dot(y, w2) + b2                           # conv2 (1x1)
        x = dot(decomp, res1 + y)                     # decomp2 residual (MXU)

    # ---- my_Layernorm: LayerNorm over D, then subtract the per-sequence mean ----
    g0 = N_LAYERS * ROWS_PER_LAYER
    gamma = slab_ref[g0:g0 + 1, 0:D]
    beta  = slab_ref[g0 + 1:g0 + 2, 0:D]
    mu  = jnp.mean(x, axis=-1, keepdims=True)
    var = jnp.mean((x - mu) ** 2, axis=-1, keepdims=True)    # biased, like torch
    xh  = (x - mu) * jax.lax.rsqrt(var + EPS) * gamma + beta
    out_ref[...] = dot(demean, xh)


# --------------------------- host-side weight packing -------------------------
def _pack_slab(params):
    """Pack all layer weights + norm params into one (SLAB_ROWS, 3*D) f32 slab."""
    def pad(m):
        m = jnp.asarray(m, jnp.float32)
        if m.ndim == 1:
            m = m[None, :]
        return jnp.pad(m, ((0, 0), (0, SLAB_W - m.shape[1])))

    scale = 1.0 / math.sqrt(D_HEAD)
    rows = []
    for layer in params["attn_layers"]:
        wqkv = jnp.concatenate([layer["wq"] * scale, layer["wk"], layer["wv"]], axis=1)
        rows += [pad(wqkv), pad(layer["wo"]), pad(layer["w1"]), pad(layer["b1"]),
                 pad(layer["w2"]), pad(layer["b2"])]
    rows += [pad(params["norm_gamma"]), pad(params["norm_beta"])]
    return jnp.concatenate(rows, axis=0)


# ------------------------------ Encoder.forward ------------------------------
def encoder_forward(x, params, attn_mask=None):
    """Mirrors Encoder.forward with conv_layers=None and norm=my_Layernorm."""
    if attn_mask is not None:
        # TODO(synk): attn_mask unsupported in the stand-in attention kernel.
        raise NotImplementedError("attn_mask is not supported")

    B, L, D = x.shape
    H = N_HEADS

    R = _residual_matrix(L, MOVING_AVG)
    S = _seq_demean_matrix(L)
    eye_b = np.eye(B, dtype=np.float32)
    mats = jnp.asarray(np.stack([np.kron(eye_b, R), np.kron(eye_b, S)]))  # (2, BL, BL)

    slab = _pack_slab(params)
    x2 = x.reshape(B * L, D).astype(jnp.float32)

    out2, attn_flat = pl.pallas_call(
        encoder_kernel,
        out_shape=(jax.ShapeDtypeStruct((B * L, D), jnp.float32),
                   jax.ShapeDtypeStruct((N_LAYERS, L, B * H * L), jnp.float32)),
        grid=(1,),                                  # collapsed batch grid: one step
        in_specs=[pl.BlockSpec((B * L, D), lambda i: (0, 0)),
                  pl.BlockSpec((2, B * L, B * L), lambda i: (0, 0, 0)),
                  pl.BlockSpec((SLAB_ROWS, SLAB_W), lambda i: (0, 0))],
        out_specs=(pl.BlockSpec((B * L, D), lambda i: (0, 0)),
                   pl.BlockSpec((N_LAYERS, L, B * H * L), lambda i: (0, 0, 0))),
        compiler_params=pltpu.CompilerParams(dimension_semantics=("arbitrary",)),
        # TODO(synk): at real d_model/seq_len set vmem_limit_bytes explicitly and use bf16
        # MXU operands / single-buffered weights (v7x VMEM budget).
    )(x2, mats, slab)

    x_out = out2.reshape(B, L, D)
    attns = [attn_flat[li].reshape(L, B, H, L).transpose(1, 2, 0, 3)
             for li in range(N_LAYERS)]
    return x_out, attns


# --------------------------- pure-JAX reference ------------------------------
def encoder_reference(x, params):
    B, L, D = x.shape
    H, DH = N_HEADS, D_HEAD
    R = jnp.asarray(_residual_matrix(L, MOVING_AVG))
    scale = 1.0 / math.sqrt(DH)
    attns = []
    for layer in params["attn_layers"]:
        q = (x @ layer["wq"]) * scale
        k = x @ layer["wk"]
        v = x @ layer["wv"]
        qh = q.reshape(B, L, H, DH).transpose(0, 2, 1, 3)
        kh = k.reshape(B, L, H, DH).transpose(0, 2, 1, 3)
        vh = v.reshape(B, L, H, DH).transpose(0, 2, 1, 3)
        s = jnp.einsum('bhld,bhmd->bhlm', qh, kh)
        a = jax.nn.softmax(s, axis=-1)
        attns.append(a)
        ctx = jnp.einsum('bhlm,bhmd->bhld', a, vh).transpose(0, 2, 1, 3).reshape(B, L, D)
        new_x = ctx @ layer["wo"]
        xr = jnp.einsum('lm,bmd->bld', R, x + new_x)
        y = jax.nn.relu(xr @ layer["w1"] + layer["b1"])
        y = y @ layer["w2"] + layer["b2"]
        x = jnp.einsum('lm,bmd->bld', R, xr + y)
    mu = jnp.mean(x, axis=-1, keepdims=True)
    var = jnp.mean((x - mu) ** 2, axis=-1, keepdims=True)
    xh = (x - mu) * jax.lax.rsqrt(var + EPS) * params["norm_gamma"] + params["norm_beta"]
    return xh - jnp.mean(xh, axis=1, keepdims=True), attns


# ----------------------------- parameter init --------------------------------
def init_params(key):
    layers = []
    for _ in range(N_LAYERS):
        key, *ks = jax.random.split(key, 7)
        s_d  = 1.0 / math.sqrt(D_MODEL)
        s_ff = 1.0 / math.sqrt(D_FF)
        layers.append({
            "wq": jax.random.normal(ks[0], (D_MODEL, D_MODEL), jnp.float32) * s_d,
            "wk": jax.random.normal(ks[1], (D_MODEL, D_MODEL), jnp.float32) * s_d,
            "wv": jax.random.normal(ks[2], (D_MODEL, D_MODEL), jnp.float32) * s_d,
            "wo": jax.random.normal(ks[3], (D_MODEL, D_MODEL), jnp.float32) * s_d,
            "w1": jax.random.normal(ks[4], (D_MODEL, D_FF),    jnp.float32) * s_d,
            "w2": jax.random.normal(ks[5], (D_FF, D_MODEL),    jnp.float32) * s_ff,
            # official Autoformer uses Conv1d(..., bias=False); zero-init biases
            # reproduce that exactly while supporting the bias=True case.
            "b1": jnp.zeros((D_FF,),    jnp.float32),
            "b2": jnp.zeros((D_MODEL,), jnp.float32),
        })
    return {
        "attn_layers": layers,
        "norm_gamma": jnp.ones((1, D_MODEL), jnp.float32),   # LayerNorm weight
        "norm_beta":  jnp.zeros((1, D_MODEL), jnp.float32),  # LayerNorm bias
    }


# ---------------------------------- main --------------------------------------
if __name__ == "__main__":
    key = jax.random.PRNGKey(0)
    k_x, k_p = jax.random.split(key)
    x = jax.random.normal(k_x, (BATCH, SEQ_LEN, D_MODEL), jnp.float32)
    params = init_params(k_p)

    fwd = jax.jit(encoder_forward)
    out, attns = fwd(x, params)
    jax.block_until_ready(out)
    for a in attns:
        jax.block_until_ready(a)

    assert out.shape == (BATCH, SEQ_LEN, D_MODEL)
    assert len(attns) == N_LAYERS
    assert all(a.shape == (BATCH, N_HEADS, SEQ_LEN, SEQ_LEN) for a in attns)
    assert bool(jnp.all(jnp.isfinite(out)))

    ref_out, ref_attns = encoder_reference(x, params)
    np.testing.assert_allclose(np.asarray(out), np.asarray(ref_out),
                               rtol=1e-3, atol=1e-4)
    for a, ra in zip(attns, ref_attns):
        np.testing.assert_allclose(np.asarray(a), np.asarray(ra),
                                   rtol=1e-3, atol=1e-4)
    print("KERNEL_OK")
</pallas_src>

<mosaic_0001>
module attributes {stable_mosaic.version = 11 : i64} {
  func.func @encoder_kernel(%arg0: i32, %arg1: memref<16x32xf32, #tpu.memory_space<vmem>>, %arg2: memref<2x16x16xf32, #tpu.memory_space<vmem>>, %arg3: memref<326x96xf32, #tpu.memory_space<vmem>>, %arg4: memref<16x32xf32, #tpu.memory_space<vmem>>, %arg5: memref<2x8x64xf32, #tpu.memory_space<vmem>>) attributes {dimension_semantics = [#tpu.dimension_semantics<arbitrary>], iteration_bounds = array<i64: 1>, scalar_prefetch = 0 : i64, scratch_operands = 0 : i64, tpu.core_type = #tpu.core_type<tc>, window_params = [{pipeline_mode = #tpu.pipeline_mode<synchronous>, transform_indices = @transform_0, window_bounds = array<i64: 16, 32>}, {pipeline_mode = #tpu.pipeline_mode<synchronous>, transform_indices = @transform_1, window_bounds = array<i64: 2, 16, 16>}, {pipeline_mode = #tpu.pipeline_mode<synchronous>, transform_indices = @transform_2, window_bounds = array<i64: 326, 96>}, {pipeline_mode = #tpu.pipeline_mode<synchronous>, transform_indices = @transform_3, window_bounds = array<i64: 16, 32>}, {pipeline_mode = #tpu.pipeline_mode<synchronous>, transform_indices = @transform_4, window_bounds = array<i64: 2, 8, 64>}]} {
    %c0 = arith.constant 0 : index
    %c0_0 = arith.constant 0 : index
    %0 = vector.load %arg1[%c0, %c0_0] : memref<16x32xf32, #tpu.memory_space<vmem>>, vector<16x32xf32>
    %c0_1 = arith.constant 0 : index
    %c0_2 = arith.constant 0 : index
    %c0_3 = arith.constant 0 : index
    %1 = vector.load %arg2[%c0_1, %c0_2, %c0_3] : memref<2x16x16xf32, #tpu.memory_space<vmem>>, vector<1x16x16xf32>
    %2 = vector.shape_cast %1 : vector<1x16x16xf32> to vector<16x16xf32>
    %c1 = arith.constant 1 : index
    %c0_4 = arith.constant 0 : index
    %c0_5 = arith.constant 0 : index
    %3 = vector.load %arg2[%c1, %c0_4, %c0_5] : memref<2x16x16xf32, #tpu.memory_space<vmem>>, vector<1x16x16xf32>
    %4 = vector.shape_cast %3 : vector<1x16x16xf32> to vector<16x16xf32>
    %c0_6 = arith.constant 0 : index
    %c0_7 = arith.constant 0 : index
    %5 = vector.load %arg3[%c0_6, %c0_7] : memref<326x96xf32, #tpu.memory_space<vmem>>, vector<32x96xf32>
    %c32 = arith.constant 32 : index
    %c0_8 = arith.constant 0 : index
    %6 = vector.load %arg3[%c32, %c0_8] : memref<326x96xf32, #tpu.memory_space<vmem>>, vector<32x32xf32>
    %c64 = arith.constant 64 : index
    %c0_9 = arith.constant 0 : index
    %7 = vector.load %arg3[%c64, %c0_9] : memref<326x96xf32, #tpu.memory_space<vmem>>, vector<32x64xf32>
    %c96 = arith.constant 96 : index
    %c0_10 = arith.constant 0 : index
    %8 = vector.load %arg3[%c96, %c0_10] : memref<326x96xf32, #tpu.memory_space<vmem>>, vector<1x64xf32>
    %c97 = arith.constant 97 : index
    %c0_11 = arith.constant 0 : index
    %9 = vector.load %arg3[%c97, %c0_11] : memref<326x96xf32, #tpu.memory_space<vmem>>, vector<64x32xf32>
    %c161 = arith.constant 161 : index
    %c0_12 = arith.constant 0 : index
    %10 = vector.load %arg3[%c161, %c0_12] : memref<326x96xf32, #tpu.memory_space<vmem>>, vector<1x32xf32>
    %cst = arith.constant dense<0.000000e+00> : vector<16x96xf32>
    %11 = tpu.matmul %0, %5, %cst {dimension_numbers = #tpu.dot_dimension_numbers<[1], [0], [0], [1], [0, 0, 1, 1], [], []>, precision = #tpu.contract_precision<fp32>} : vector<16x32xf32>, vector<32x96xf32>, vector<16x96xf32> -> vector<16x96xf32>
    %12 = vector.extract_strided_slice %11 {offsets = [0, 0], sizes = [8, 8], strides = [1, 1]} : vector<16x96xf32> to vector<8x8xf32>
    %13 = vector.extract_strided_slice %11 {offsets = [0, 32], sizes = [8, 8], strides = [1, 1]} : vector<16x96xf32> to vector<8x8xf32>
    %14 = vector.extract_strided_slice %11 {offsets = [0, 64], sizes = [8, 8], strides = [1, 1]} : vector<16x96xf32> to vector<8x8xf32>
    %cst_13 = arith.constant dense<0.000000e+00> : vector<8x8xf32>
    %15 = tpu.matmul %12, %13, %cst_13 {dimension_numbers = #tpu.dot_dimension_numbers<[1], [1], [0], [0], [0, 0, 1, 0], [], []>, precision = #tpu.contract_precision<fp32>} : vector<8x8xf32>, vector<8x8xf32>, vector<8x8xf32> -> vector<8x8xf32>
    %cst_14 = arith.constant dense<0xFF800000> : vector<8xf32>
    %16 = vector.multi_reduction <maximumf>, %15, %cst_14 [1] : vector<8x8xf32> to vector<8xf32>
    %17 = vector.shape_cast %16 : vector<8xf32> to vector<8x1xf32>
    %18 = vector.broadcast %17 : vector<8x1xf32> to vector<8x8xf32>
    %19 = arith.subf %15, %18 : vector<8x8xf32>
    %20 = math.exp %19 : vector<8x8xf32>
    %cst_15 = arith.constant dense<0.000000e+00> : vector<8xf32>
    %21 = vector.multi_reduction <add>, %20, %cst_15 [1] : vector<8x8xf32> to vector<8xf32>
    %22 = vector.shape_cast %21 : vector<8xf32> to vector<8x1xf32>
    %23 = vector.broadcast %22 : vector<8x1xf32> to vector<8x8xf32>
    %24 = arith.divf %20, %23 : vector<8x8xf32>
    %cst_16 = arith.constant dense<0.000000e+00> : vector<8x8xf32>
    %25 = tpu.matmul %24, %14, %cst_16 {dimension_numbers = #tpu.dot_dimension_numbers<[1], [0], [0], [1], [0, 0, 1, 1], [], []>, precision = #tpu.contract_precision<fp32>} : vector<8x8xf32>, vector<8x8xf32>, vector<8x8xf32> -> vector<8x8xf32>
    %26 = vector.extract_strided_slice %11 {offsets = [0, 8], sizes = [8, 8], strides = [1, 1]} : vector<16x96xf32> to vector<8x8xf32>
    %27 = vector.extract_strided_slice %11 {offsets = [0, 40], sizes = [8, 8], strides = [1, 1]} : vector<16x96xf32> to vector<8x8xf32>
    %28 = vector.extract_strided_slice %11 {offsets = [0, 72], sizes = [8, 8], strides = [1, 1]} : vector<16x96xf32> to vector<8x8xf32>
    %cst_17 = arith.constant dense<0.000000e+00> : vector<8x8xf32>
    %29 = tpu.matmul %26, %27, %cst_17 {dimension_numbers = #tpu.dot_dimension_numbers<[1], [1], [0], [0], [0, 0, 1, 0], [], []>, precision = #tpu.contract_precision<fp32>} : vector<8x8xf32>, vector<8x8xf32>, vector<8x8xf32> -> vector<8x8xf32>
    %cst_18 = arith.constant dense<0xFF800000> : vector<8xf32>
    %30 = vector.multi_reduction <maximumf>, %29, %cst_18 [1] : vector<8x8xf32> to vector<8xf32>
    %31 = vector.shape_cast %30 : vector<8xf32> to vector<8x1xf32>
    %32 = vector.broadcast %31 : vector<8x1xf32> to vector<8x8xf32>
    %33 = arith.subf %29, %32 : vector<8x8xf32>
    %34 = math.exp %33 : vector<8x8xf32>
    %cst_19 = arith.constant dense<0.000000e+00> : vector<8xf32>
    %35 = vector.multi_reduction <add>, %34, %cst_19 [1] : vector<8x8xf32> to vector<8xf32>
    %36 = vector.shape_cast %35 : vector<8xf32> to vector<8x1xf32>
    %37 = vector.broadcast %36 : vector<8x1xf32> to vector<8x8xf32>
    %38 = arith.divf %34, %37 : vector<8x8xf32>
    %cst_20 = arith.constant dense<0.000000e+00> : vector<8x8xf32>
    %39 = tpu.matmul %38, %28, %cst_20 {dimension_numbers = #tpu.dot_dimension_numbers<[1], [0], [0], [1], [0, 0, 1, 1], [], []>, precision = #tpu.contract_precision<fp32>} : vector<8x8xf32>, vector<8x8xf32>, vector<8x8xf32> -> vector<8x8xf32>
    %40 = vector.extract_strided_slice %11 {offsets = [0, 16], sizes = [8, 8], strides = [1, 1]} : vector<16x96xf32> to vector<8x8xf32>
    %41 = vector.extract_strided_slice %11 {offsets = [0, 48], sizes = [8, 8], strides = [1, 1]} : vector<16x96xf32> to vector<8x8xf32>
    %42 = vector.extract_strided_slice %11 {offsets = [0, 80], sizes = [8, 8], strides = [1, 1]} : vector<16x96xf32> to vector<8x8xf32>
    %cst_21 = arith.constant dense<0.000000e+00> : vector<8x8xf32>
    %43 = tpu.matmul %40, %41, %cst_21 {dimension_numbers = #tpu.dot_dimension_numbers<[1], [1], [0], [0], [0, 0, 1, 0], [], []>, precision = #tpu.contract_precision<fp32>} : vector<8x8xf32>, vector<8x8xf32>, vector<8x8xf32> -> vector<8x8xf32>
    %cst_22 = arith.constant dense<0xFF800000> : vector<8xf32>
    %44 = vector.multi_reduction <maximumf>, %43, %cst_22 [1] : vector<8x8xf32> to vector<8xf32>
    %45 = vector.shape_cast %44 : vector<8xf32> to vector<8x1xf32>
    %46 = vector.broadcast %45 : vector<8x1xf32> to vector<8x8xf32>
    %47 = arith.subf %43, %46 : vector<8x8xf32>
    %48 = math.exp %47 : vector<8x8xf32>
    %cst_23 = arith.constant dense<0.000000e+00> : vector<8xf32>
    %49 = vector.multi_reduction <add>, %48, %cst_23 [1] : vector<8x8xf32> to vector<8xf32>
    %50 = vector.shape_cast %49 : vector<8xf32> to vector<8x1xf32>
    %51 = vector.broadcast %50 : vector<8x1xf32> to vector<8x8xf32>
    %52 = arith.divf %48, %51 : vector<8x8xf32>
    %cst_24 = arith.constant dense<0.000000e+00> : vector<8x8xf32>
    %53 = tpu.matmul %52, %42, %cst_24 {dimension_numbers = #tpu.dot_dimension_numbers<[1], [0], [0], [1], [0, 0, 1, 1], [], []>, precision = #tpu.contract_precision<fp32>} : vector<8x8xf32>, vector<8x8xf32>, vector<8x8xf32> -> vector<8x8xf32>
    %54 = vector.extract_strided_slice %11 {offsets = [0, 24], sizes = [8, 8], strides = [1, 1]} : vector<16x96xf32> to vector<8x8xf32>
    %55 = vector.extract_strided_slice %11 {offsets = [0, 56], sizes = [8, 8], strides = [1, 1]} : vector<16x96xf32> to vector<8x8xf32>
    %56 = vector.extract_strided_slice %11 {offsets = [0, 88], sizes = [8, 8], strides = [1, 1]} : vector<16x96xf32> to vector<8x8xf32>
    %cst_25 = arith.constant dense<0.000000e+00> : vector<8x8xf32>
    %57 = tpu.matmul %54, %55, %cst_25 {dimension_numbers = #tpu.dot_dimension_numbers<[1], [1], [0], [0], [0, 0, 1, 0], [], []>, precision = #tpu.contract_precision<fp32>} : vector<8x8xf32>, vector<8x8xf32>, vector<8x8xf32> -> vector<8x8xf32>
    %cst_26 = arith.constant dense<0xFF800000> : vector<8xf32>
    %58 = vector.multi_reduction <maximumf>, %57, %cst_26 [1] : vector<8x8xf32> to vector<8xf32>
    %59 = vector.shape_cast %58 : vector<8xf32> to vector<8x1xf32>
    %60 = vector.broadcast %59 : vector<8x1xf32> to vector<8x8xf32>
    %61 = arith.subf %57, %60 : vector<8x8xf32>
    %62 = math.exp %61 : vector<8x8xf32>
    %cst_27 = arith.constant dense<0.000000e+00> : vector<8xf32>
    %63 = vector.multi_reduction <add>, %62, %cst_27 [1] : vector<8x8xf32> to vector<8xf32>
    %64 = vector.shape_cast %63 : vector<8xf32> to vector<8x1xf32>
    %65 = vector.broadcast %64 : vector<8x1xf32> to vector<8x8xf32>
    %66 = arith.divf %62, %65 : vector<8x8xf32>
    %cst_28 = arith.constant dense<0.000000e+00> : vector<8x8xf32>
    %67 = tpu.matmul %66, %56, %cst_28 {dimension_numbers = #tpu.dot_dimension_numbers<[1], [0], [0], [1], [0, 0, 1, 1], [], []>, precision = #tpu.contract_precision<fp32>} : vector<8x8xf32>, vector<8x8xf32>, vector<8x8xf32> -> vector<8x8xf32>
    %68 = tpu.concatenate %25, %39, %53, %67 in 1 : vector<8x8xf32>, vector<8x8xf32>, vector<8x8xf32>, vector<8x8xf32> -> vector<8x32xf32>
    %69 = vector.extract_strided_slice %11 {offsets = [8, 0], sizes = [8, 8], strides = [1, 1]} : vector<16x96xf32> to vector<8x8xf32>
    %70 = vector.extract_strided_slice %11 {offsets = [8, 32], sizes = [8, 8], strides = [1, 1]} : vector<16x96xf32> to vector<8x8xf32>
    %71 = vector.extract_strided_slice %11 {offsets = [8, 64], sizes = [8, 8], strides = [1, 1]} : vector<16x96xf32> to vector<8x8xf32>
    %cst_29 = arith.constant dense<0.000000e+00> : vector<8x8xf32>
    %72 = tpu.matmul %69, %70, %cst_29 {dimension_numbers = #tpu.dot_dimension_numbers<[1], [1], [0], [0], [0, 0, 1, 0], [], []>, precision = #tpu.contract_precision<fp32>} : vector<8x8xf32>, vector<8x8xf32>, vector<8x8xf32> -> vector<8x8xf32>
    %cst_30 = arith.constant dense<0xFF800000> : vector<8xf32>
    %73 = vector.multi_reduction <maximumf>, %72, %cst_30 [1] : vector<8x8xf32> to vector<8xf32>
    %74 = vector.shape_cast %73 : vector<8xf32> to vector<8x1xf32>
    %75 = vector.broadcast %74 : vector<8x1xf32> to vector<8x8xf32>
    %76 = arith.subf %72, %75 : vector<8x8xf32>
    %77 = math.exp %76 : vector<8x8xf32>
    %cst_31 = arith.constant dense<0.000000e+00> : vector<8xf32>
    %78 = vector.multi_reduction <add>, %77, %cst_31 [1] : vector<8x8xf32> to vector<8xf32>
    %79 = vector.shape_cast %78 : vector<8xf32> to vector<8x1xf32>
    %80 = vector.broadcast %79 : vector<8x1xf32> to vector<8x8xf32>
    %81 = arith.divf %77, %80 : vector<8x8xf32>
    %cst_32 = arith.constant dense<0.000000e+00> : vector<8x8xf32>
    %82 = tpu.matmul %81, %71, %cst_32 {dimension_numbers = #tpu.dot_dimension_numbers<[1], [0], [0], [1], [0, 0, 1, 1], [], []>, precision = #tpu.contract_precision<fp32>} : vector<8x8xf32>, vector<8x8xf32>, vector<8x8xf32> -> vector<8x8xf32>
    %83 = vector.extract_strided_slice %11 {offsets = [8, 8], sizes = [8, 8], strides = [1, 1]} : vector<16x96xf32> to vector<8x8xf32>
    %84 = vector.extract_strided_slice %11 {offsets = [8, 40], sizes = [8, 8], strides = [1, 1]} : vector<16x96xf32> to vector<8x8xf32>
    %85 = vector.extract_strided_slice %11 {offsets = [8, 72], sizes = [8, 8], strides = [1, 1]} : vector<16x96xf32> to vector<8x8xf32>
    %cst_33 = arith.constant dense<0.000000e+00> : vector<8x8xf32>
    %86 = tpu.matmul %83, %84, %cst_33 {dimension_numbers = #tpu.dot_dimension_numbers<[1], [1], [0], [0], [0, 0, 1, 0], [], []>, precision = #tpu.contract_precision<fp32>} : vector<8x8xf32>, vector<8x8xf32>, vector<8x8xf32> -> vector<8x8xf32>
    %cst_34 = arith.constant dense<0xFF800000> : vector<8xf32>
    %87 = vector.multi_reduction <maximumf>, %86, %cst_34 [1] : vector<8x8xf32> to vector<8xf32>
    %88 = vector.shape_cast %87 : vector<8xf32> to vector<8x1xf32>
    %89 = vector.broadcast %88 : vector<8x1xf32> to vector<8x8xf32>
    %90 = arith.subf %86, %89 : vector<8x8xf32>
    %91 = math.exp %90 : vector<8x8xf32>
    %cst_35 = arith.constant dense<0.000000e+00> : vector<8xf32>
    %92 = vector.multi_reduction <add>, %91, %cst_35 [1] : vector<8x8xf32> to vector<8xf32>
    %93 = vector.shape_cast %92 : vector<8xf32> to vector<8x1xf32>
    %94 = vector.broadcast %93 : vector<8x1xf32> to vector<8x8xf32>
    %95 = arith.divf %91, %94 : vector<8x8xf32>
    %cst_36 = arith.constant dense<0.000000e+00> : vector<8x8xf32>
    %96 = tpu.matmul %95, %85, %cst_36 {dimension_numbers = #tpu.dot_dimension_numbers<[1], [0], [0], [1], [0, 0, 1, 1], [], []>, precision = #tpu.contract_precision<fp32>} : vector<8x8xf32>, vector<8x8xf32>, vector<8x8xf32> -> vector<8x8xf32>
    %97 = vector.extract_strided_slice %11 {offsets = [8, 16], sizes = [8, 8], strides = [1, 1]} : vector<16x96xf32> to vector<8x8xf32>
    %98 = vector.extract_strided_slice %11 {offsets = [8, 48], sizes = [8, 8], strides = [1, 1]} : vector<16x96xf32> to vector<8x8xf32>
    %99 = vector.extract_strided_slice %11 {offsets = [8, 80], sizes = [8, 8], strides = [1, 1]} : vector<16x96xf32> to vector<8x8xf32>
    %cst_37 = arith.constant dense<0.000000e+00> : vector<8x8xf32>
    %100 = tpu.matmul %97, %98, %cst_37 {dimension_numbers = #tpu.dot_dimension_numbers<[1], [1], [0], [0], [0, 0, 1, 0], [], []>, precision = #tpu.contract_precision<fp32>} : vector<8x8xf32>, vector<8x8xf32>, vector<8x8xf32> -> vector<8x8xf32>
    %cst_38 = arith.constant dense<0xFF800000> : vector<8xf32>
    %101 = vector.multi_reduction <maximumf>, %100, %cst_38 [1] : vector<8x8xf32> to vector<8xf32>
    %102 = vector.shape_cast %101 : vector<8xf32> to vector<8x1xf32>
    %103 = vector.broadcast %102 : vector<8x1xf32> to vector<8x8xf32>
    %104 = arith.subf %100, %103 : vector<8x8xf32>
    %105 = math.exp %104 : vector<8x8xf32>
    %cst_39 = arith.constant dense<0.000000e+00> : vector<8xf32>
    %106 = vector.multi_reduction <add>, %105, %cst_39 [1] : vector<8x8xf32> to vector<8xf32>
    %107 = vector.shape_cast %106 : vector<8xf32> to vector<8x1xf32>
    %108 = vector.broadcast %107 : vector<8x1xf32> to vector<8x8xf32>
    %109 = arith.divf %105, %108 : vector<8x8xf32>
    %cst_40 = arith.constant dense<0.000000e+00> : vector<8x8xf32>
    %110 = tpu.matmul %109, %99, %cst_40 {dimension_numbers = #tpu.dot_dimension_numbers<[1], [0], [0], [1], [0, 0, 1, 1], [], []>, precision = #tpu.contract_precision<fp32>} : vector<8x8xf32>, vector<8x8xf32>, vector<8x8xf32> -> vector<8x8xf32>
    %111 = vector.extract_strided_slice %11 {offsets = [8, 24], sizes = [8, 8], strides = [1, 1]} : vector<16x96xf32> to vector<8x8xf32>
    %112 = vector.extract_strided_slice %11 {offsets = [8, 56], sizes = [8, 8], strides = [1, 1]} : vector<16x96xf32> to vector<8x8xf32>
    %113 = vector.extract_strided_slice %11 {offsets = [8, 88], sizes = [8, 8], strides = [1, 1]} : vector<16x96xf32> to vector<8x8xf32>
    %cst_41 = arith.constant dense<0.000000e+00> : vector<8x8xf32>
    %114 = tpu.matmul %111, %112, %cst_41 {dimension_numbers = #tpu.dot_dimension_numbers<[1], [1], [0], [0], [0, 0, 1, 0], [], []>, precision = #tpu.contract_precision<fp32>} : vector<8x8xf32>, vector<8x8xf32>, vector<8x8xf32> -> vector<8x8xf32>
    %cst_42 = arith.constant dense<0xFF800000> : vector<8xf32>
    %115 = vector.multi_reduction <maximumf>, %114, %cst_42 [1] : vector<8x8xf32> to vector<8xf32>
    %116 = vector.shape_cast %115 : vector<8xf32> to vector<8x1xf32>
    %117 = vector.broadcast %116 : vector<8x1xf32> to vector<8x8xf32>
    %118 = arith.subf %114, %117 : vector<8x8xf32>
    %119 = math.exp %118 : vector<8x8xf32>
    %cst_43 = arith.constant dense<0.000000e+00> : vector<8xf32>
    %120 = vector.multi_reduction <add>, %119, %cst_43 [1] : vector<8x8xf32> to vector<8xf32>
    %121 = vector.shape_cast %120 : vector<8xf32> to vector<8x1xf32>
    %122 = vector.broadcast %121 : vector<8x1xf32> to vector<8x8xf32>
    %123 = arith.divf %119, %122 : vector<8x8xf32>
    %cst_44 = arith.constant dense<0.000000e+00> : vector<8x8xf32>
    %124 = tpu.matmul %123, %113, %cst_44 {dimension_numbers = #tpu.dot_dimension_numbers<[1], [0], [0], [1], [0, 0, 1, 1], [], []>, precision = #tpu.contract_precision<fp32>} : vector<8x8xf32>, vector<8x8xf32>, vector<8x8xf32> -> vector<8x8xf32>
    %125 = tpu.concatenate %82, %96, %110, %124 in 1 : vector<8x8xf32>, vector<8x8xf32>, vector<8x8xf32>, vector<8x8xf32> -> vector<8x32xf32>
    %126 = tpu.concatenate %24, %38, %52, %66, %81, %95, %109, %123 in 1 : vector<8x8xf32>, vector<8x8xf32>, vector<8x8xf32>, vector<8x8xf32>, vector<8x8xf32>, vector<8x8xf32>, vector<8x8xf32>, vector<8x8xf32> -> vector<8x64xf32>
    %c0_45 = arith.constant 0 : index
    %c0_46 = arith.constant 0 : index
    %c0_47 = arith.constant 0 : index
    %127 = vector.load %arg5[%c0_45, %c0_46, %c0_47] : memref<2x8x64xf32, #tpu.memory_space<vmem>>, vector<1x8x64xf32>
    %128 = vector.shape_cast %127 : vector<1x8x64xf32> to vector<8x64xf32>
    %129 = vector.shape_cast %126 : vector<8x64xf32> to vector<1x8x64xf32>
    tpu.vector_store %arg5[%c0_45, %c0_46, %c0_47], %129 {strides = array<i32>} : memref<2x8x64xf32, #tpu.memory_space<vmem>>, vector<1x8x64xf32>,
    %130 = tpu.concatenate %68, %125 in 0 : vector<8x32xf32>, vector<8x32xf32> -> vector<16x32xf32>
    %cst_48 = arith.constant dense<0.000000e+00> : vector<16x32xf32>
    %131 = tpu.matmul %130, %6, %cst_48 {dimension_numbers = #tpu.dot_dimension_numbers<[1], [0], [0], [1], [0, 0, 1, 1], [], []>, precision = #tpu.contract_precision<fp32>} : vector<16x32xf32>, vector<32x32xf32>, vector<16x32xf32> -> vector<16x32xf32>
    %132 = arith.addf %0, %131 : vector<16x32xf32>
    %cst_49 = arith.constant dense<0.000000e+00> : vector<16x32xf32>
    %133 = tpu.matmul %2, %132, %cst_49 {dimension_numbers = #tpu.dot_dimension_numbers<[1], [0], [0], [1], [0, 0, 1, 1], [], []>, precision = #tpu.contract_precision<fp32>} : vector<16x16xf32>, vector<16x32xf32>, vector<16x32xf32> -> vector<16x32xf32>
    %cst_50 = arith.constant dense<0.000000e+00> : vector<16x64xf32>
    %134 = tpu.matmul %133, %7, %cst_50 {dimension_numbers = #tpu.dot_dimension_numbers<[1], [0], [0], [1], [0, 0, 1, 1], [], []>, precision = #tpu.contract_precision<fp32>} : vector<16x32xf32>, vector<32x64xf32>, vector<16x64xf32> -> vector<16x64xf32>
    %135 = vector.broadcast %8 : vector<1x64xf32> to vector<16x64xf32>
    %136 = arith.addf %134, %135 : vector<16x64xf32>
    %cst_51 = arith.constant 0.000000e+00 : f32
    %137 = vector.broadcast %cst_51 : f32 to vector<16x64xf32>
    %138 = arith.maximumf %136, %137 : vector<16x64xf32>
    %cst_52 = arith.constant dense<0.000000e+00> : vector<16x32xf32>
    %139 = tpu.matmul %138, %9, %cst_52 {dimension_numbers = #tpu.dot_dimension_numbers<[1], [0], [0], [1], [0, 0, 1, 1], [], []>, precision = #tpu.contract_precision<fp32>} : vector<16x64xf32>, vector<64x32xf32>, vector<16x32xf32> -> vector<16x32xf32>
    %140 = vector.broadcast %10 : vector<1x32xf32> to vector<16x32xf32>
    %141 = arith.addf %139, %140 : vector<16x32xf32>
    %142 = arith.addf %133, %141 : vector<16x32xf32>
    %cst_53 = arith.constant dense<0.000000e+00> : vector<16x32xf32>
    %143 = tpu.matmul %2, %142, %cst_53 {dimension_numbers = #tpu.dot_dimension_numbers<[1], [0], [0], [1], [0, 0, 1, 1], [], []>, precision = #tpu.contract_precision<fp32>} : vector<16x16xf32>, vector<16x32xf32>, vector<16x32xf32> -> vector<16x32xf32>
    %c162 = arith.constant 162 : index
    %c0_54 = arith.constant 0 : index
    %144 = vector.load %arg3[%c162, %c0_54] : memref<326x96xf32, #tpu.memory_space<vmem>>, vector<32x96xf32>
    %c194 = arith.constant 194 : index
    %c0_55 = arith.constant 0 : index
    %145 = vector.load %arg3[%c194, %c0_55] : memref<326x96xf32, #tpu.memory_space<vmem>>, vector<32x32xf32>
    %c226 = arith.constant 226 : index
    %c0_56 = arith.constant 0 : index
    %146 = vector.load %arg3[%c226, %c0_56] : memref<326x96xf32, #tpu.memory_space<vmem>>, vector<32x64xf32>
    %c258 = arith.constant 258 : index
    %c0_57 = arith.constant 0 : index
    %147 = vector.load %arg3[%c258, %c0_57] : memref<326x96xf32, #tpu.memory_space<vmem>>, vector<1x64xf32>
    %c259 = arith.constant 259 : index
    %c0_58 = arith.constant 0 : index
    %148 = vector.load %arg3[%c259, %c0_58] : memref<326x96xf32, #tpu.memory_space<vmem>>, vector<64x32xf32>
    %c323 = arith.constant 323 : index
    %c0_59 = arith.constant 0 : index
    %149 = vector.load %arg3[%c323, %c0_59] : memref<326x96xf32, #tpu.memory_space<vmem>>, vector<1x32xf32>
    %cst_60 = arith.constant dense<0.000000e+00> : vector<16x96xf32>
    %150 = tpu.matmul %143, %144, %cst_60 {dimension_numbers = #tpu.dot_dimension_numbers<[1], [0], [0], [1], [0, 0, 1, 1], [], []>, precision = #tpu.contract_precision<fp32>} : vector<16x32xf32>, vector<32x96xf32>, vector<16x96xf32> -> vector<16x96xf32>
    %151 = vector.extract_strided_slice %150 {offsets = [0, 0], sizes = [8, 8], strides = [1, 1]} : vector<16x96xf32> to vector<8x8xf32>
    %152 = vector.extract_strided_slice %150 {offsets = [0, 32], sizes = [8, 8], strides = [1, 1]} : vector<16x96xf32> to vector<8x8xf32>
    %153 = vector.extract_strided_slice %150 {offsets = [0, 64], sizes = [8, 8], strides = [1, 1]} : vector<16x96xf32> to vector<8x8xf32>
    %cst_61 = arith.constant dense<0.000000e+00> : vector<8x8xf32>
    %154 = tpu.matmul %151, %152, %cst_61 {dimension_numbers = #tpu.dot_dimension_numbers<[1], [1], [0], [0], [0, 0, 1, 0], [], []>, precision = #tpu.contract_precision<fp32>} : vector<8x8xf32>, vector<8x8xf32>, vector<8x8xf32> -> vector<8x8xf32>
    %cst_62 = arith.constant dense<0xFF800000> : vector<8xf32>
    %155 = vector.multi_reduction <maximumf>, %154, %cst_62 [1] : vector<8x8xf32> to vector<8xf32>
    %156 = vector.shape_cast %155 : vector<8xf32> to vector<8x1xf32>
    %157 = vector.broadcast %156 : vector<8x1xf32> to vector<8x8xf32>
    %158 = arith.subf %154, %157 : vector<8x8xf32>
    %159 = math.exp %158 : vector<8x8xf32>
    %cst_63 = arith.constant dense<0.000000e+00> : vector<8xf32>
    %160 = vector.multi_reduction <add>, %159, %cst_63 [1] : vector<8x8xf32> to vector<8xf32>
    %161 = vector.shape_cast %160 : vector<8xf32> to vector<8x1xf32>
    %162 = vector.broadcast %161 : vector<8x1xf32> to vector<8x8xf32>
    %163 = arith.divf %159, %162 : vector<8x8xf32>
    %cst_64 = arith.constant dense<0.000000e+00> : vector<8x8xf32>
    %164 = tpu.matmul %163, %153, %cst_64 {dimension_numbers = #tpu.dot_dimension_numbers<[1], [0], [0], [1], [0, 0, 1, 1], [], []>, precision = #tpu.contract_precision<fp32>} : vector<8x8xf32>, vector<8x8xf32>, vector<8x8xf32> -> vector<8x8xf32>
    %165 = vector.extract_strided_slice %150 {offsets = [0, 8], sizes = [8, 8], strides = [1, 1]} : vector<16x96xf32> to vector<8x8xf32>
    %166 = vector.extract_strided_slice %150 {offsets = [0, 40], sizes = [8, 8], strides = [1, 1]} : vector<16x96xf32> to vector<8x8xf32>
    %167 = vector.extract_strided_slice %150 {offsets = [0, 72], sizes = [8, 8], strides = [1, 1]} : vector<16x96xf32> to vector<8x8xf32>
    %cst_65 = arith.constant dense<0.000000e+00> : vector<8x8xf32>
    %168 = tpu.matmul %165, %166, %cst_65 {dimension_numbers = #tpu.dot_dimension_numbers<[1], [1], [0], [0], [0, 0, 1, 0], [], []>, precision = #tpu.contract_precision<fp32>} : vector<8x8xf32>, vector<8x8xf32>, vector<8x8xf32> -> vector<8x8xf32>
    %cst_66 = arith.constant dense<0xFF800000> : vector<8xf32>
    %169 = vector.multi_reduction <maximumf>, %168, %cst_66 [1] : vector<8x8xf32> to vector<8xf32>
    %170 = vector.shape_cast %169 : vector<8xf32> to vector<8x1xf32>
    %171 = vector.broadcast %170 : vector<8x1xf32> to vector<8x8xf32>
    %172 = arith.subf %168, %171 : vector<8x8xf32>
    %173 = math.exp %172 : vector<8x8xf32>
    %cst_67 = arith.constant dense<0.000000e+00> : vector<8xf32>
    %174 = vector.multi_reduction <add>, %173, %cst_67 [1] : vector<8x8xf32> to vector<8xf32>
    %175 = vector.shape_cast %174 : vector<8xf32> to vector<8x1xf32>
    %176 = vector.broadcast %175 : vector<8x1xf32> to vector<8x8xf32>
    %177 = arith.divf %173, %176 : vector<8x8xf32>
    %cst_68 = arith.constant dense<0.000000e+00> : vector<8x8xf32>
    %178 = tpu.matmul %177, %167, %cst_68 {dimension_numbers = #tpu.dot_dimension_numbers<[1], [0], [0], [1], [0, 0, 1, 1], [], []>, precision = #tpu.contract_precision<fp32>} : vector<8x8xf32>, vector<8x8xf32>, vector<8x8xf32> -> vector<8x8xf32>
    %179 = vector.extract_strided_slice %150 {offsets = [0, 16], sizes = [8, 8], strides = [1, 1]} : vector<16x96xf32> to vector<8x8xf32>
    %180 = vector.extract_strided_slice %150 {offsets = [0, 48], sizes = [8, 8], strides = [1, 1]} : vector<16x96xf32> to vector<8x8xf32>
    %181 = vector.extract_strided_slice %150 {offsets = [0, 80], sizes = [8, 8], strides = [1, 1]} : vector<16x96xf32> to vector<8x8xf32>
    %cst_69 = arith.constant dense<0.000000e+00> : vector<8x8xf32>
    %182 = tpu.matmul %179, %180, %cst_69 {dimension_numbers = #tpu.dot_dimension_numbers<[1], [1], [0], [0], [0, 0, 1, 0], [], []>, precision = #tpu.contract_precision<fp32>} : vector<8x8xf32>, vector<8x8xf32>, vector<8x8xf32> -> vector<8x8xf32>
    %cst_70 = arith.constant dense<0xFF800000> : vector<8xf32>
    %183 = vector.multi_reduction <maximumf>, %182, %cst_70 [1] : vector<8x8xf32> to vector<8xf32>
    %184 = vector.shape_cast %183 : vector<8xf32> to vector<8x1xf32>
    %185 = vector.broadcast %184 : vector<8x1xf32> to vector<8x8xf32>
    %186 = arith.subf %182, %185 : vector<8x8xf32>
    %187 = math.exp %186 : vector<8x8xf32>
    %cst_71 = arith.constant dense<0.000000e+00> : vector<8xf32>
    %188 = vector.multi_reduction <add>, %187, %cst_71 [1] : vector<8x8xf32> to vector<8xf32>
    %189 = vector.shape_cast %188 : vector<8xf32> to vector<8x1xf32>
    %190 = vector.broadcast %189 : vector<8x1xf32> to vector<8x8xf32>
    %191 = arith.divf %187, %190 : vector<8x8xf32>
    %cst_72 = arith.constant dense<0.000000e+00> : vector<8x8xf32>
    %192 = tpu.matmul %191, %181, %cst_72 {dimension_numbers = #tpu.dot_dimension_numbers<[1], [0], [0], [1], [0, 0, 1, 1], [], []>, precision = #tpu.contract_precision<fp32>} : vector<8x8xf32>, vector<8x8xf32>, vector<8x8xf32> -> vector<8x8xf32>
    %193 = vector.extract_strided_slice %150 {offsets = [0, 24], sizes = [8, 8], strides = [1, 1]} : vector<16x96xf32> to vector<8x8xf32>
    %194 = vector.extract_strided_slice %150 {offsets = [0, 56], sizes = [8, 8], strides = [1, 1]} : vector<16x96xf32> to vector<8x8xf32>
    %195 = vector.extract_strided_slice %150 {offsets = [0, 88], sizes = [8, 8], strides = [1, 1]} : vector<16x96xf32> to vector<8x8xf32>
    %cst_73 = arith.constant dense<0.000000e+00> : vector<8x8xf32>
    %196 = tpu.matmul %193, %194, %cst_73 {dimension_numbers = #tpu.dot_dimension_numbers<[1], [1], [0], [0], [0, 0, 1, 0], [], []>, precision = #tpu.contract_precision<fp32>} : vector<8x8xf32>, vector<8x8xf32>, vector<8x8xf32> -> vector<8x8xf32>
    %cst_74 = arith.constant dense<0xFF800000> : vector<8xf32>
    %197 = vector.multi_reduction <maximumf>, %196, %cst_74 [1] : vector<8x8xf32> to vector<8xf32>
    %198 = vector.shape_cast %197 : vector<8xf32> to vector<8x1xf32>
    %199 = vector.broadcast %198 : vector<8x1xf32> to vector<8x8xf32>
    %200 = arith.subf %196, %199 : vector<8x8xf32>
    %201 = math.exp %200 : vector<8x8xf32>
    %cst_75 = arith.constant dense<0.000000e+00> : vector<8xf32>
    %202 = vector.multi_reduction <add>, %201, %cst_75 [1] : vector<8x8xf32> to vector<8xf32>
    %203 = vector.shape_cast %202 : vector<8xf32> to vector<8x1xf32>
    %204 = vector.broadcast %203 : vector<8x1xf32> to vector<8x8xf32>
    %205 = arith.divf %201, %204 : vector<8x8xf32>
    %cst_76 = arith.constant dense<0.000000e+00> : vector<8x8xf32>
    %206 = tpu.matmul %205, %195, %cst_76 {dimension_numbers = #tpu.dot_dimension_numbers<[1], [0], [0], [1], [0, 0, 1, 1], [], []>, precision = #tpu.contract_precision<fp32>} : vector<8x8xf32>, vector<8x8xf32>, vector<8x8xf32> -> vector<8x8xf32>
    %207 = tpu.concatenate %164, %178, %192, %206 in 1 : vector<8x8xf32>, vector<8x8xf32>, vector<8x8xf32>, vector<8x8xf32> -> vector<8x32xf32>
    %208 = vector.extract_strided_slice %150 {offsets = [8, 0], sizes = [8, 8], strides = [1, 1]} : vector<16x96xf32> to vector<8x8xf32>
    %209 = vector.extract_strided_slice %150 {offsets = [8, 32], sizes = [8, 8], strides = [1, 1]} : vector<16x96xf32> to vector<8x8xf32>
    %210 = vector.extract_strided_slice %150 {offsets = [8, 64], sizes = [8, 8], strides = [1, 1]} : vector<16x96xf32> to vector<8x8xf32>
    %cst_77 = arith.constant dense<0.000000e+00> : vector<8x8xf32>
    %211 = tpu.matmul %208, %209, %cst_77 {dimension_numbers = #tpu.dot_dimension_numbers<[1], [1], [0], [0], [0, 0, 1, 0], [], []>, precision = #tpu.contract_precision<fp32>} : vector<8x8xf32>, vector<8x8xf32>, vector<8x8xf32> -> vector<8x8xf32>
    %cst_78 = arith.constant dense<0xFF800000> : vector<8xf32>
    %212 = vector.multi_reduction <maximumf>, %211, %cst_78 [1] : vector<8x8xf32> to vector<8xf32>
    %213 = vector.shape_cast %212 : vector<8xf32> to vector<8x1xf32>
    %214 = vector.broadcast %213 : vector<8x1xf32> to vector<8x8xf32>
    %215 = arith.subf %211, %214 : vector<8x8xf32>
    %216 = math.exp %215 : vector<8x8xf32>
    %cst_79 = arith.constant dense<0.000000e+00> : vector<8xf32>
    %217 = vector.multi_reduction <add>, %216, %cst_79 [1] : vector<8x8xf32> to vector<8xf32>
    %218 = vector.shape_cast %217 : vector<8xf32> to vector<8x1xf32>
    %219 = vector.broadcast %218 : vector<8x1xf32> to vector<8x8xf32>
    %220 = arith.divf %216, %219 : vector<8x8xf32>
    %cst_80 = arith.constant dense<0.000000e+00> : vector<8x8xf32>
    %221 = tpu.matmul %220, %210, %cst_80 {dimension_numbers = #tpu.dot_dimension_numbers<[1], [0], [0], [1], [0, 0, 1, 1], [], []>, precision = #tpu.contract_precision<fp32>} : vector<8x8xf32>, vector<8x8xf32>, vector<8x8xf32> -> vector<8x8xf32>
    %222 = vector.extract_strided_slice %150 {offsets = [8, 8], sizes = [8, 8], strides = [1, 1]} : vector<16x96xf32> to vector<8x8xf32>
    %223 = vector.extract_strided_slice %150 {offsets = [8, 40], sizes = [8, 8], strides = [1, 1]} : vector<16x96xf32> to vector<8x8xf32>
    %224 = vector.extract_strided_slice %150 {offsets = [8, 72], sizes = [8, 8], strides = [1, 1]} : vector<16x96xf32> to vector<8x8xf32>
    %cst_81 = arith.constant dense<0.000000e+00> : vector<8x8xf32>
    %225 = tpu.matmul %222, %223, %cst_81 {dimension_numbers = #tpu.dot_dimension_numbers<[1], [1], [0], [0], [0, 0, 1, 0], [], []>, precision = #tpu.contract_precision<fp32>} : vector<8x8xf32>, vector<8x8xf32>, vector<8x8xf32> -> vector<8x8xf32>
    %cst_82 = arith.constant dense<0xFF800000> : vector<8xf32>
    %226 = vector.multi_reduction <maximumf>, %225, %cst_82 [1] : vector<8x8xf32> to vector<8xf32>
    %227 = vector.shape_cast %226 : vector<8xf32> to vector<8x1xf32>
    %228 = vector.broadcast %227 : vector<8x1xf32> to vector<8x8xf32>
    %229 = arith.subf %225, %228 : vector<8x8xf32>
    %230 = math.exp %229 : vector<8x8xf32>
    %cst_83 = arith.constant dense<0.000000e+00> : vector<8xf32>
    %231 = vector.multi_reduction <add>, %230, %cst_83 [1] : vector<8x8xf32> to vector<8xf32>
    %232 = vector.shape_cast %231 : vector<8xf32> to vector<8x1xf32>
    %233 = vector.broadcast %232 : vector<8x1xf32> to vector<8x8xf32>
    %234 = arith.divf %230, %233 : vector<8x8xf32>
    %cst_84 = arith.constant dense<0.000000e+00> : vector<8x8xf32>
    %235 = tpu.matmul %234, %224, %cst_84 {dimension_numbers = #tpu.dot_dimension_numbers<[1], [0], [0], [1], [0, 0, 1, 1], [], []>, precision = #tpu.contract_precision<fp32>} : vector<8x8xf32>, vector<8x8xf32>, vector<8x8xf32> -> vector<8x8xf32>
    %236 = vector.extract_strided_slice %150 {offsets = [8, 16], sizes = [8, 8], strides = [1, 1]} : vector<16x96xf32> to vector<8x8xf32>
    %237 = vector.extract_strided_slice %150 {offsets = [8, 48], sizes = [8, 8], strides = [1, 1]} : vector<16x96xf32> to vector<8x8xf32>
    %238 = vector.extract_strided_slice %150 {offsets = [8, 80], sizes = [8, 8], strides = [1, 1]} : vector<16x96xf32> to vector<8x8xf32>
    %cst_85 = arith.constant dense<0.000000e+00> : vector<8x8xf32>
    %239 = tpu.matmul %236, %237, %cst_85 {dimension_numbers = #tpu.dot_dimension_numbers<[1], [1], [0], [0], [0, 0, 1, 0], [], []>, precision = #tpu.contract_precision<fp32>} : vector<8x8xf32>, vector<8x8xf32>, vector<8x8xf32> -> vector<8x8xf32>
    %cst_86 = arith.constant dense<0xFF800000> : vector<8xf32>
    %240 = vector.multi_reduction <maximumf>, %239, %cst_86 [1] : vector<8x8xf32> to vector<8xf32>
    %241 = vector.shape_cast %240 : vector<8xf32> to vector<8x1xf32>
    %242 = vector.broadcast %241 : vector<8x1xf32> to vector<8x8xf32>
    %243 = arith.subf %239, %242 : vector<8x8xf32>
    %244 = math.exp %243 : vector<8x8xf32>
    %cst_87 = arith.constant dense<0.000000e+00> : vector<8xf32>
    %245 = vector.multi_reduction <add>, %244, %cst_87 [1] : vector<8x8xf32> to vector<8xf32>
    %246 = vector.shape_cast %245 : vector<8xf32> to vector<8x1xf32>
    %247 = vector.broadcast %246 : vector<8x1xf32> to vector<8x8xf32>
    %248 = arith.divf %244, %247 : vector<8x8xf32>
    %cst_88 = arith.constant dense<0.000000e+00> : vector<8x8xf32>
    %249 = tpu.matmul %248, %238, %cst_88 {dimension_numbers = #tpu.dot_dimension_numbers<[1], [0], [0], [1], [0, 0, 1, 1], [], []>, precision = #tpu.contract_precision<fp32>} : vector<8x8xf32>, vector<8x8xf32>, vector<8x8xf32> -> vector<8x8xf32>
    %250 = vector.extract_strided_slice %150 {offsets = [8, 24], sizes = [8, 8], strides = [1, 1]} : vector<16x96xf32> to vector<8x8xf32>
    %251 = vector.extract_strided_slice %150 {offsets = [8, 56], sizes = [8, 8], strides = [1, 1]} : vector<16x96xf32> to vector<8x8xf32>
    %252 = vector.extract_strided_slice %150 {offsets = [8, 88], sizes = [8, 8], strides = [1, 1]} : vector<16x96xf32> to vector<8x8xf32>
    %cst_89 = arith.constant dense<0.000000e+00> : vector<8x8xf32>
    %253 = tpu.matmul %250, %251, %cst_89 {dimension_numbers = #tpu.dot_dimension_numbers<[1], [1], [0], [0], [0, 0, 1, 0], [], []>, precision = #tpu.contract_precision<fp32>} : vector<8x8xf32>, vector<8x8xf32>, vector<8x8xf32> -> vector<8x8xf32>
    %cst_90 = arith.constant dense<0xFF800000> : vector<8xf32>
    %254 = vector.multi_reduction <maximumf>, %253, %cst_90 [1] : vector<8x8xf32> to vector<8xf32>
    %255 = vector.shape_cast %254 : vector<8xf32> to vector<8x1xf32>
    %256 = vector.broadcast %255 : vector<8x1xf32> to vector<8x8xf32>
    %257 = arith.subf %253, %256 : vector<8x8xf32>
    %258 = math.exp %257 : vector<8x8xf32>
    %cst_91 = arith.constant dense<0.000000e+00> : vector<8xf32>
    %259 = vector.multi_reduction <add>, %258, %cst_91 [1] : vector<8x8xf32> to vector<8xf32>
    %260 = vector.shape_cast %259 : vector<8xf32> to vector<8x1xf32>
    %261 = vector.broadcast %260 : vector<8x1xf32> to vector<8x8xf32>
    %262 = arith.divf %258, %261 : vector<8x8xf32>
    %cst_92 = arith.constant dense<0.000000e+00> : vector<8x8xf32>
    %263 = tpu.matmul %262, %252, %cst_92 {dimension_numbers = #tpu.dot_dimension_numbers<[1], [0], [0], [1], [0, 0, 1, 1], [], []>, precision = #tpu.contract_precision<fp32>} : vector<8x8xf32>, vector<8x8xf32>, vector<8x8xf32> -> vector<8x8xf32>
    %264 = tpu.concatenate %221, %235, %249, %263 in 1 : vector<8x8xf32>, vector<8x8xf32>, vector<8x8xf32>, vector<8x8xf32> -> vector<8x32xf32>
    %265 = tpu.concatenate %163, %177, %191, %205, %220, %234, %248, %262 in 1 : vector<8x8xf32>, vector<8x8xf32>, vector<8x8xf32>, vector<8x8xf32>, vector<8x8xf32>, vector<8x8xf32>, vector<8x8xf32>, vector<8x8xf32> -> vector<8x64xf32>
    %c1_93 = arith.constant 1 : index
    %c0_94 = arith.constant 0 : index
    %c0_95 = arith.constant 0 : index
    %266 = vector.load %arg5[%c1_93, %c0_94, %c0_95] : memref<2x8x64xf32, #tpu.memory_space<vmem>>, vector<1x8x64xf32>
    %267 = vector.shape_cast %266 : vector<1x8x64xf32> to vector<8x64xf32>
    %268 = vector.shape_cast %265 : vector<8x64xf32> to vector<1x8x64xf32>
    tpu.vector_store %arg5[%c1_93, %c0_94, %c0_95], %268 {strides = array<i32>} : memref<2x8x64xf32, #tpu.memory_space<vmem>>, vector<1x8x64xf32>,
    %269 = tpu.concatenate %207, %264 in 0 : vector<8x32xf32>, vector<8x32xf32> -> vector<16x32xf32>
    %cst_96 = arith.constant dense<0.000000e+00> : vector<16x32xf32>
    %270 = tpu.matmul %269, %145, %cst_96 {dimension_numbers = #tpu.dot_dimension_numbers<[1], [0], [0], [1], [0, 0, 1, 1], [], []>, precision = #tpu.contract_precision<fp32>} : vector<16x32xf32>, vector<32x32xf32>, vector<16x32xf32> -> vector<16x32xf32>
    %271 = arith.addf %143, %270 : vector<16x32xf32>
    %cst_97 = arith.constant dense<0.000000e+00> : vector<16x32xf32>
    %272 = tpu.matmul %2, %271, %cst_97 {dimension_numbers = #tpu.dot_dimension_numbers<[1], [0], [0], [1], [0, 0, 1, 1], [], []>, precision = #tpu.contract_precision<fp32>} : vector<16x16xf32>, vector<16x32xf32>, vector<16x32xf32> -> vector<16x32xf32>
    %cst_98 = arith.constant dense<0.000000e+00> : vector<16x64xf32>
    %273 = tpu.matmul %272, %146, %cst_98 {dimension_numbers = #tpu.dot_dimension_numbers<[1], [0], [0], [1], [0, 0, 1, 1], [], []>, precision = #tpu.contract_precision<fp32>} : vector<16x32xf32>, vector<32x64xf32>, vector<16x64xf32> -> vector<16x64xf32>
    %274 = vector.broadcast %147 : vector<1x64xf32> to vector<16x64xf32>
    %275 = arith.addf %273, %274 : vector<16x64xf32>
    %cst_99 = arith.constant 0.000000e+00 : f32
    %276 = vector.broadcast %cst_99 : f32 to vector<16x64xf32>
    %277 = arith.maximumf %275, %276 : vector<16x64xf32>
    %cst_100 = arith.constant dense<0.000000e+00> : vector<16x32xf32>
    %278 = tpu.matmul %277, %148, %cst_100 {dimension_numbers = #tpu.dot_dimension_numbers<[1], [0], [0], [1], [0, 0, 1, 1], [], []>, precision = #tpu.contract_precision<fp32>} : vector<16x64xf32>, vector<64x32xf32>, vector<16x32xf32> -> vector<16x32xf32>
    %279 = vector.broadcast %149 : vector<1x32xf32> to vector<16x32xf32>
    %280 = arith.addf %278, %279 : vector<16x32xf32>
    %281 = arith.addf %272, %280 : vector<16x32xf32>
    %cst_101 = arith.constant dense<0.000000e+00> : vector<16x32xf32>
    %282 = tpu.matmul %2, %281, %cst_101 {dimension_numbers = #tpu.dot_dimension_numbers<[1], [0], [0], [1], [0, 0, 1, 1], [], []>, precision = #tpu.contract_precision<fp32>} : vector<16x16xf32>, vector<16x32xf32>, vector<16x32xf32> -> vector<16x32xf32>
    %c324 = arith.constant 324 : index
    %c0_102 = arith.constant 0 : index
    %283 = vector.load %arg3[%c324, %c0_102] : memref<326x96xf32, #tpu.memory_space<vmem>>, vector<1x32xf32>
    %c325 = arith.constant 325 : index
    %c0_103 = arith.constant 0 : index
    %284 = vector.load %arg3[%c325, %c0_103] : memref<326x96xf32, #tpu.memory_space<vmem>>, vector<1x32xf32>
    %cst_104 = arith.constant dense<0.000000e+00> : vector<16xf32>
    %285 = vector.multi_reduction <add>, %282, %cst_104 [1] : vector<16x32xf32> to vector<16xf32>
    %286 = vector.shape_cast %285 : vector<16xf32> to vector<16x1xf32>
    %cst_105 = arith.constant 3.200000e+01 : f32
    %287 = vector.broadcast %cst_105 : f32 to vector<16x1xf32>
    %288 = arith.divf %286, %287 : vector<16x1xf32>
    %289 = vector.broadcast %288 : vector<16x1xf32> to vector<16x32xf32>
    %290 = arith.subf %282, %289 : vector<16x32xf32>
    %291 = arith.mulf %290, %290 : vector<16x32xf32>
    %cst_106 = arith.constant dense<0.000000e+00> : vector<16xf32>
    %292 = vector.multi_reduction <add>, %291, %cst_106 [1] : vector<16x32xf32> to vector<16xf32>
    %293 = vector.shape_cast %292 : vector<16xf32> to vector<16x1xf32>
    %cst_107 = arith.constant 3.200000e+01 : f32
    %294 = vector.broadcast %cst_107 : f32 to vector<16x1xf32>
    %295 = arith.divf %293, %294 : vector<16x1xf32>
    %296 = vector.broadcast %288 : vector<16x1xf32> to vector<16x32xf32>
    %297 = arith.subf %282, %296 : vector<16x32xf32>
    %cst_108 = arith.constant 9.99999974E-6 : f32
    %298 = vector.broadcast %cst_108 : f32 to vector<16x1xf32>
    %299 = arith.addf %295, %298 : vector<16x1xf32>
    %300 = math.rsqrt %299 : vector<16x1xf32>
    %301 = vector.broadcast %300 : vector<16x1xf32> to vector<16x32xf32>
    %302 = arith.mulf %297, %301 : vector<16x32xf32>
    %303 = vector.broadcast %283 : vector<1x32xf32> to vector<16x32xf32>
    %304 = arith.mulf %302, %303 : vector<16x32xf32>
    %305 = vector.broadcast %284 : vector<1x32xf32> to vector<16x32xf32>
    %306 = arith.addf %304, %305 : vector<16x32xf32>
    %cst_109 = arith.constant dense<0.000000e+00> : vector<16x32xf32>
    %307 = tpu.matmul %4, %306, %cst_109 {dimension_numbers = #tpu.dot_dimension_numbers<[1], [0], [0], [1], [0, 0, 1, 1], [], []>, precision = #tpu.contract_precision<fp32>} : vector<16x16xf32>, vector<16x32xf32>, vector<16x32xf32> -> vector<16x32xf32>
    %c0_110 = arith.constant 0 : index
    %c0_111 = arith.constant 0 : index
    %308 = vector.load %arg4[%c0_110, %c0_111] : memref<16x32xf32, #tpu.memory_space<vmem>>, vector<16x32xf32>
    tpu.vector_store %arg4[%c0_110, %c0_111], %307 {strides = array<i32>} : memref<16x32xf32, #tpu.memory_space<vmem>>, vector<16x32xf32>,
    return
  }
  func.func @transform_0(%arg0: i32) -> (i32, i32) {
    %c0_i32 = arith.constant 0 : i32
    %c0_i32_0 = arith.constant 0 : i32
    %c0_i32_1 = arith.constant 0 : i32
    return %c0_i32, %c0_i32_0 : i32, i32
  }
  func.func @transform_1(%arg0: i32) -> (i32, i32, i32) {
    %c0_i32 = arith.constant 0 : i32
    %c0_i32_0 = arith.constant 0 : i32
    %c0_i32_1 = arith.constant 0 : i32
    %c0_i32_2 = arith.constant 0 : i32
    return %c0_i32, %c0_i32_0, %c0_i32_1 : i32, i32, i32
  }
  func.func @transform_2(%arg0: i32) -> (i32, i32) {
    %c0_i32 = arith.constant 0 : i32
    %c0_i32_0 = arith.constant 0 : i32
    %c0_i32_1 = arith.constant 0 : i32
    return %c0_i32, %c0_i32_0 : i32, i32
  }
  func.func @transform_3(%arg0: i32) -> (i32, i32) {
    %c0_i32 = arith.constant 0 : i32
    %c0_i32_0 = arith.constant 0 : i32
    %c0_i32_1 = arith.constant 0 : i32
    return %c0_i32, %c0_i32_0 : i32, i32
  }
  func.func @transform_4(%arg0: i32) -> (i32, i32, i32) {
    %c0_i32 = arith.constant 0 : i32
    %c0_i32_0 = arith.constant 0 : i32
    %c0_i32_1 = arith.constant 0 : i32
    %c0_i32_2 = arith.constant 0 : i32
    return %c0_i32, %c0_i32_0, %c0_i32_1 : i32, i32, i32
  }
}

</mosaic_0001>

<bundles_post_ra>
// kernel: squeeze.3
= control target key start
LH: loop header
LB: loop body
LE: loop exit
PB: predicated region body
PF: predicated region fallthrough
CT: control target
= control target key end

     0   :  { %s211_s8 = smov 104   ;;  %s212_s9 = smov 88   ;;  %vm3_vm0 = vcmask 64512   ;;  %s310_s0 = inlined_call_operand.vmem [shape: f32[1,8,64], index: 0, kind: input, shape index: {}]   ;;  %s311_s1 = inlined_call_operand.vmem [shape: f32[8,2,4,8], index: 1, kind: output, shape index: {}]  }
   0x1   :  { %v8_v0 = vld [vmem:[%s310_s0] sm:$0xff]   ;;  %s210_s0 = smov 120   ;;  %s213_s10 = smov 112  }
   0x2   :  { %9 = vrot.lane.b32.xlu0 %v8_v0, %s210_s0  ;;  %33 = vrot.lane.b32.xlu1 %v8_v0, %s211_s8  ;;  %s214_s11 = smov 96   ;;  %s215_s12 = smov 80   ;;  %5 = vst.msk [vmem:[#allocation0] ss:$16 sm:$0xc] %vm3_vm0, %v8_v0  }
   0x3   :  { %57 = vrot.lane.b32.xlu2 %v8_v0, %s212_s9  ;;  %s216_s13 = smov 72   ;;  %6 = vst.msk [vmem:[#allocation0] ss:$16 sm:$0x30] %vm3_vm0, %v8_v0  }
   0x4   :  { %7 = vst.msk [vmem:[#allocation0] ss:$16 sm:$0xc0] %vm3_vm0, %v8_v0  }
   0x5   :  { %4 = vst.msk [vmem:[#allocation0] ss:$16 sm:$0x3] %vm3_vm0, %v8_v0  }
   0xa   :  { %21 = vrot.lane.b32.xlu0 %v8_v0, %s213_s10  ;;  %45 = vrot.lane.b32.xlu1 %v8_v0, %s214_s11 }
   0xb   :  { %69 = vrot.lane.b32.xlu2 %v8_v0, %s215_s12 }
  0x12   :  { %81 = vrot.lane.b32.xlu0 %v8_v0, %s216_s13 }
  0x5d   :  { %v58_v1 = vpop.permute.xlu2 %57  }
  0x5e   :  { %61 = vst.msk [vmem:[#allocation0 + $0x9] ss:$16 sm:$0x3] %vm3_vm0, %v58_v1  }
  0x5f   :  { %63 = vst.msk [vmem:[#allocation0 + $0x9] ss:$16 sm:$0xc] %vm3_vm0, %v58_v1  }
  0x60   :  { %65 = vst.msk [vmem:[#allocation0 + $0x9] ss:$16 sm:$0x30] %vm3_vm0, %v58_v1  }
  0x61   :  { %67 = vst.msk [vmem:[#allocation0 + $0x9] ss:$16 sm:$0xc0] %vm3_vm0, %v58_v1  }
  0x65   :  { %v70_v2 = vpop.permute.xlu2 %69  }
  0x66   :  { %73 = vst.msk [vmem:[#allocation0 + $0xa] ss:$16 sm:$0x3] %vm3_vm0, %v70_v2  }
  0x67   :  { %75 = vst.msk [vmem:[#allocation0 + $0xa] ss:$16 sm:$0xc] %vm3_vm0, %v70_v2  }
  0x68   :  { %77 = vst.msk [vmem:[#allocation0 + $0xa] ss:$16 sm:$0x30] %vm3_vm0, %v70_v2  }
  0x69   :  { %79 = vst.msk [vmem:[#allocation0 + $0xa] ss:$16 sm:$0xc0] %vm3_vm0, %v70_v2  }
  0x74   :  { %v10_v3 = vpop.permute.xlu0 %9   ;;  %v34_v4 = vpop.permute.xlu1 %33  }
  0x75   :  { %13 = vst.msk [vmem:[#allocation0 + $0x1] ss:$16 sm:$0x3] %vm3_vm0, %v10_v3  }
  0x76   :  { %15 = vst.msk [vmem:[#allocation0 + $0x1] ss:$16 sm:$0xc] %vm3_vm0, %v10_v3  }
  0x77   :  { %17 = vst.msk [vmem:[#allocation0 + $0x1] ss:$16 sm:$0x30] %vm3_vm0, %v10_v3  }
  0x78   :  { %19 = vst.msk [vmem:[#allocation0 + $0x1] ss:$16 sm:$0xc0] %vm3_vm0, %v10_v3  }
  0x79   :  { %37 = vst.msk [vmem:[#allocation0 + $0x3] ss:$16 sm:$0x3] %vm3_vm0, %v34_v4  }
  0x7a   :  { %39 = vst.msk [vmem:[#allocation0 + $0x3] ss:$16 sm:$0xc] %vm3_vm0, %v34_v4  }
  0x7b   :  { %41 = vst.msk [vmem:[#allocation0 + $0x3] ss:$16 sm:$0x30] %vm3_vm0, %v34_v4  }
  0x7c   :  { %43 = vst.msk [vmem:[#allocation0 + $0x3] ss:$16 sm:$0xc0] %vm3_vm0, %v34_v4   ;;  %v22_v5 = vpop.permute.xlu0 %21   ;;  %v46_v6 = vpop.permute.xlu1 %45  }
  0x7d   :  { %25 = vst.msk [vmem:[#allocation0 + $0x2] ss:$16 sm:$0x3] %vm3_vm0, %v22_v5  }
  0x7e   :  { %27 = vst.msk [vmem:[#allocation0 + $0x2] ss:$16 sm:$0xc] %vm3_vm0, %v22_v5  }
  0x7f   :  { %29 = vst.msk [vmem:[#allocation0 + $0x2] ss:$16 sm:$0x30] %vm3_vm0, %v22_v5  }
  0x80   :  { %31 = vst.msk [vmem:[#allocation0 + $0x2] ss:$16 sm:$0xc0] %vm3_vm0, %v22_v5  }
  0x81   :  { %49 = vst.msk [vmem:[#allocation0 + $0x8] ss:$16 sm:$0x3] %vm3_vm0, %v46_v6  }
  0x82   :  { %51 = vst.msk [vmem:[#allocation0 + $0x8] ss:$16 sm:$0xc] %vm3_vm0, %v46_v6  }
  0x83   :  { %53 = vst.msk [vmem:[#allocation0 + $0x8] ss:$16 sm:$0x30] %vm3_vm0, %v46_v6  }
  0x84   :  { %v94_v7 = vld [vmem:[#allocation0] sm:$0xf]  ;;  %v105_v8 = vld [vmem:[#allocation0 + $0x10] sm:$0xf]  ;;  %v82_v9 = vpop.permute.xlu0 %81  }
  0x85   :  { %v117_v10 = vld [vmem:[#allocation0 + $0x20] sm:$0xf]  ;;  %v129_v11 = vld [vmem:[#allocation0 + $0x30] sm:$0xf]  ;;  %97 = vst [vmem:[%s311_s1] sm:$0xf] %v94_v7 }
  0x86   :  { %v141_v12 = vld [vmem:[#allocation0 + $0x40] sm:$0xf]  ;;  %189 = vst [vmem:[%s311_s1 + $0x8] sm:$0xf] %v105_v8  ;;  %v153_v13 = vld [vmem:[#allocation0 + $0x50] sm:$0xf] }
  0x87   :  { %191 = vst [vmem:[%s311_s1 + $0x10] sm:$0xf] %v117_v10  ;;  %v165_v14 = vld [vmem:[#allocation0 + $0x60] sm:$0xf]  ;;  %v177_v15 = vld [vmem:[#allocation0 + $0x70] sm:$0xf] }
  0x88   :  { %193 = vst [vmem:[%s311_s1 + $0x18] sm:$0xf] %v129_v11 }
  0x89   :  { %195 = vst [vmem:[%s311_s1 + $0x20] sm:$0xf] %v141_v12 }
  0x8a   :  { %197 = vst [vmem:[%s311_s1 + $0x28] sm:$0xf] %v153_v13 }
  0x8b   :  { %199 = vst [vmem:[%s311_s1 + $0x30] sm:$0xf] %v165_v14 }
  0x8c   :  { %201 = vst [vmem:[%s311_s1 + $0x38] sm:$0xf] %v177_v15 }
  0x8d   :  { %55 = vst.msk [vmem:[#allocation0 + $0x8] ss:$16 sm:$0xc0] %vm3_vm0, %v46_v6  }
  0x8e   :  { %85 = vst.msk [vmem:[#allocation0 + $0xb] ss:$16 sm:$0x3] %vm3_vm0, %v82_v9  }
  0x8f   :  { %87 = vst.msk [vmem:[#allocation0 + $0xb] ss:$16 sm:$0xc] %vm3_vm0, %v82_v9  }
  0x90   :  { %89 = vst.msk [vmem:[#allocation0 + $0xb] ss:$16 sm:$0x30] %vm3_vm0, %v82_v9  }
  0x91   :  { %91 = vst.msk [vmem:[#allocation0 + $0xb] ss:$16 sm:$0xc0] %vm3_vm0, %v82_v9  }
  0x95   :  { %v99_v16 = vld [vmem:[#allocation0 + $0x8] sm:$0xf]  ;;  %v111_v17 = vld [vmem:[#allocation0 + $0x18] sm:$0xf] }
  0x96   :  { %188 = vst [vmem:[%s311_s1 + $0x4] sm:$0xf] %v99_v16  ;;  %v123_v18 = vld [vmem:[#allocation0 + $0x28] sm:$0xf]  ;;  %v135_v19 = vld [vmem:[#allocation0 + $0x38] sm:$0xf] }
  0x97   :  { %190 = vst [vmem:[%s311_s1 + $0xc] sm:$0xf] %v111_v17  ;;  %v147_v20 = vld [vmem:[#allocation0 + $0x48] sm:$0xf]  ;;  %v159_v21 = vld [vmem:[#allocation0 + $0x58] sm:$0xf] }
  0x98   :  { %192 = vst [vmem:[%s311_s1 + $0x14] sm:$0xf] %v123_v18  ;;  %v171_v22 = vld [vmem:[#allocation0 + $0x68] sm:$0xf]  ;;  %v183_v23 = vld [vmem:[#allocation0 + $0x78] sm:$0xf] }
  0x99   :  { %194 = vst [vmem:[%s311_s1 + $0x1c] sm:$0xf] %v135_v19 }
  0x9a   :  { %196 = vst [vmem:[%s311_s1 + $0x24] sm:$0xf] %v147_v20 }
  0x9b   :  { %198 = vst [vmem:[%s311_s1 + $0x2c] sm:$0xf] %v159_v21 }
  0x9c   :  { %200 = vst [vmem:[%s311_s1 + $0x34] sm:$0xf] %v171_v22 }
  0x9d   :  { %202 = vst [vmem:[%s311_s1 + $0x3c] sm:$0xf] %v183_v23 }

// kernel: encoder_forward.1
= control target key start
LH: loop header
LB: loop body
LE: loop exit
PB: predicated region body
PF: predicated region fallthrough
CT: control target
= control target key end

     0   :  { %vm46_vm0 = vcmask 261120   ;;  %s9685_s0 = inlined_call_operand.vmem [shape: f32[16,32], index: 0, kind: input, shape index: {}]   ;;  %s9686_s1 = inlined_call_operand.vmem [shape: f32[2,16,16], index: 1, kind: input, shape index: {}]   ;;  %s9687_s2 = inlined_call_operand.vmem [shape: f32[326,96], index: 2, kind: input, shape index: {}]   ;;  %s9688_s3 = inlined_call_operand.hbm [shape: f32[16,32], index: 3, kind: output, shape index: {0}]   ;;  %s9689_s4 = inlined_call_operand.vmem [shape: f32[2,8,64], index: 4, kind: output, shape index: {1}]  }
   0x1   :  { %v27_v0 = vld [vmem:[%s9687_s2 + $0x18] sm:$0xff]  ;;  %v26_v1 = vld [vmem:[%s9687_s2 + $0x10] sm:$0xff]  ;;  %v25_v2 = vld [vmem:[%s9687_s2 + $0x8] sm:$0xff] }
   0x2   :  { %v65_v3 = vand.u32 4294901760, %v27_v0  ;;  %v67_v4 = vand.u32 4294901760, %v26_v1  ;;  %v69_v5 = vand.u32 4294901760, %v25_v2  ;;  %v24_v6 = vld [vmem:[%s9687_s2] sm:$0xff]  ;;  %v18_v8 = vld [vmem:[%s9685_s0 + $0x8] sm:$0xff] }
   0x3   :  { %v17_v7 = vld [vmem:[%s9685_s0] sm:$0xff]  ;;  %v71_v9 = vand.u32 4294901760, %v24_v6  ;;  %v51_v11 = vsel %vm46_vm0, %v18_v8, 0 }
   0x4   :  { %v48_v10 = vsel %vm46_vm0, %v17_v7, 0  ;;  %66 = vmatpush.msra.mxu0 %v65_v3  ;;  %v103_v12 = vsub.f32 %v27_v0, %v65_v3  ;;  %v109_v13 = vsub.f32 %v26_v1, %v67_v4  ;;  %183 = vmatpush.msra.mxu3 %v65_v3  ;;  %v115_v14 = vsub.f32 %v25_v2, %v69_v5 }
   0x5   :  { %v73_v15 = vand.u32 4294901760, %v48_v10  ;;  %v121_v16 = vsub.f32 %v24_v6, %v71_v9  ;;  %v81_v17 = vand.u32 4294901760, %v51_v11 }
   0x6   :  { %68 = vmatpush.msra.mxu0 %v67_v4  ;;  %149 = vmatpush.msra.mxu2 %v103_v12  ;;  %v104_v18 = vand.u32 4294901760, %v103_v12  ;;  %v110_v20 = vand.u32 4294901760, %v109_v13  ;;  %v116_v21 = vand.u32 4294901760, %v115_v14 }
   0x7   :  { %v74_v19 = vsub.f32 %v48_v10, %v73_v15  ;;  %185 = vmatpush.msra.mxu3 %v67_v4  ;;  %v122_v22 = vand.u32 4294901760, %v121_v16  ;;  %v82_v23 = vsub.f32 %v51_v11, %v81_v17 }
   0x8   :  { %10 = vsyncpa [#allocation3], 0  ;;  %70 = vmatpush.msra.mxu0 %v69_v5  ;;  %152 = vmatpush.msra.mxu2 %v109_v13  ;;  %v105_v24 = vsub.f32 %v103_v12, %v104_v18  ;;  %v111_v26 = vsub.f32 %v109_v13, %v110_v20  ;;  %v117_v27 = vsub.f32 %v115_v14, %v116_v21  ;;  %s8537_s27 = smov 88   ;;  %s8538_s28 = smov 96   ;;  %vm272_vm1 = vcmask 64512  }
   0x9   :  { %v75_v25 = vand.u32 4294901760, %v74_v19  ;;  %187 = vmatpush.msra.mxu3 %v69_v5  ;;  %v123_v28 = vsub.f32 %v121_v16, %v122_v22  ;;  %v83_v32 = vand.u32 4294901760, %v82_v23  ;;  %s8539_s29 = smov 120   ;;  %s8540_s30 = smov 56  }
   0xa   :  { %72 = vmatpush.msra.mxu0 %v71_v9  ;;  %v106_v29 = vand.u32 4294901760, %v105_v24  ;;  %155 = vmatpush.msra.mxu2 %v115_v14  ;;  %v112_v31 = vand.u32 4294901760, %v111_v26  ;;  %v118_v34 = vand.u32 4294901760, %v117_v27  ;;  %s8541_s5 = smov 112   ;;  %s8542_s6 = smov 64  }
   0xb   :  { %v76_v30 = vsub.f32 %v74_v19, %v75_v25  ;;  %189 = vmatpush.msra.mxu3 %v71_v9  ;;  %v124_v35 = vand.u32 4294901760, %v123_v28  ;;  %v84_v36 = vsub.f32 %v82_v23, %v83_v32  ;;  %s8543_s7 = smov 80   ;;  %s8544_s8 = smov 48  }
   0xc   :  { %218 = vmatpush.msrb.mxu0 %v104_v18  ;;  %107 = vmatpush.msra.mxu1 %v106_v29  ;;  %s8545_s9 = smov 104   ;;  %s8546_s10 = smov 72  }
   0xd   :  { %v77_v33 = vand.u32 4294901760, %v76_v30  ;;  %158 = vmatpush.msra.mxu2 %v121_v16  ;;  %193 = vmatmul.f32.vlgmr.msra.gmra.mxu3 %v75_v25  ;;  %v85_v37 = vand.u32 4294901760, %v84_v36  ;;  %s8547_s11 = smov 40   ;;  %s8548_s12 = smov 8  }
   0xe   :  { %161 = vmatmul.f32.vlgmr.msra.gmra.mxu2 %v74_v19  ;;  %113 = vmatpush.msra.mxu1 %v112_v31  ;;  %s8549_s13 = smov 16   ;;  %s8550_s14 = smov 24  }
   0xf   :  { %78 = vmatmul.f32.vlgmr.msra.gmra.mxu0 %v77_v33  ;;  %s8552_s22 = smov 32  }
  0x10   :  { %222 = vmatpush.msrb.mxu0 %v110_v20  ;;  %119 = vmatpush.msra.mxu1 %v118_v34 }
  0x12   :  { %226 = vmatpush.msrb.mxu0 %v116_v21  ;;  %125 = vmatpush.msra.mxu1 %v124_v35 }
  0x13   :  { %127 = vmatmul.f32.vlgmr.msra.gmra.mxu1 %v73_v15 }
  0x14   :  { %230 = vmatpush.msrb.mxu0 %v122_v22  ;;  %253 = vmatpush.msrb.mxu1 %v65_v3 }
  0x15   :  { %199 = vmatmul.f32.gmra.mxu3 %v83_v32 }
  0x16   :  { %166 = vmatmul.f32.gmra.mxu2 %v82_v23  ;;  %255 = vmatpush.msrb.mxu1 %v67_v4 }
  0x17   :  { %86 = vmatmul.f32.gmra.mxu0 %v85_v37 }
  0x18   :  { %257 = vmatpush.msrb.mxu1 %v69_v5 }
  0x1a   :  { %259 = vmatpush.msrb.mxu1 %v71_v9 }
  0x1b   :  { %131 = vmatmul.f32.gmra.mxu1 %v81_v17 }
  0x1f   :  { %232 = vmatmul.f32.vlgmr.msrb.gmra.mxu0 %v73_v15 }
  0x23   :  { %261 = vmatmul.f32.vlgmr.msrb.gmra.mxu1 %v73_v15 }
  0x27   :  { %236 = vmatmul.f32.gmra.mxu0 %v81_v17 }
  0x2b   :  { %265 = vmatmul.f32.gmra.mxu1 %v81_v17 }
  0x8c   :  { %v79_v38 = vpop.f32.mrf.mxu0 }
  0x90   :  { %v128_v39 = vpop.f32.mrf.mxu1  ;;  %v194_v45 = vpop.f32.mrf.mxu3 }
  0x91   :  { %v129_v41 = vadd.f32 %v128_v39, %v79_v38  ;;  %v162_v42 = vpop.f32.mrf.mxu2 }
  0x93   :  { %v163_v44 = vadd.f32 %v162_v42, %v129_v41 }
  0x94   :  { %v8600_v40 = vpop.f32.mrf.mxu0 }
  0x95   :  { %v195_v47 = vadd.f32 %v194_v45, %v163_v44 }
  0x98   :  { %v8602_v43 = vpop.f32.mrf.mxu1  ;;  %v8617_v1 = vpop.f32.mrf.mxu3 }
  0x99   :  { %v8615_v0 = vpop.f32.mrf.mxu2 }
  0x9c   :  { %v233_v46 = vpop.f32.mrf.mxu0 }
  0x9d   :  { %v234_v48 = vadd.f32 %v233_v46, %v195_v47 }
  0xa0   :  { %v262_v49 = vpop.f32.mrf.mxu1 }
  0xa1   :  { %v8604_v50 = vadd.f32 %v262_v49, %v234_v48 }
  0xa3   :  { %601 = vrot.lane.b32.xlu2 %v8604_v50, %s8537_s27  ;;  %270 = vrot.lane.b32.xlu0 %v8604_v50, %s8538_s28  ;;  %v273_v51 = vsel %vm272_vm1, %v8604_v50, 0 }
  0xa4   :  { %v294_v52 = vand.u32 4294901760, %v273_v51  ;;  %v8619_v4 = vpop.f32.mrf.mxu0 }
  0xa6   :  { %v295_v53 = vsub.f32 %v273_v51, %v294_v52 }
  0xa8   :  { %v296_v54 = vand.u32 4294901760, %v295_v53  ;;  %v8621_v6 = vpop.f32.mrf.mxu1 }
  0xaa   :  { %v297_v57 = vsub.f32 %v295_v53, %v296_v54 }
  0xab   :  { %599 = vrot.lane.b32.xlu2 %v8604_v50, %s8539_s29 }
  0xac   :  { %v298_v60 = vand.u32 4294901760, %v297_v57 }
  0xfd   :  { %v602_v22 = vpop.permute.xlu2 %601 }
  0xfe   :  { %v605_v24 = vsel %vm272_vm1, %v602_v22, 0 }
  0xff   :  { %v622_v27 = vand.u32 4294901760, %v605_v24 }
 0x101   :  { %v649_v33 = vsub.f32 %v605_v24, %v622_v27 }
 0x103   :  { %v650_v39 = vand.u32 4294901760, %v649_v33 }
 0x105   :  { %v600_v31 = vpop.permute.xlu2 %599  ;;  %v651_v45 = vsub.f32 %v649_v33, %v650_v39 }
 0x106   :  { %v603_v36 = vsel %vm272_vm1, %v600_v31, 0 }
 0x107   :  { %v624_v41 = vand.u32 4294901760, %v603_v36 }
 0x109   :  { %v625_v47 = vsub.f32 %v603_v36, %v624_v41 }
 0x10b   :  { %v626_v57 = vand.u32 4294901760, %v625_v47 }
 0x115   :  { %v271_v55 = vpop.permute.xlu0 %270 }
 0x116   :  { %v275_v56 = vsel %vm272_vm1, %v271_v55, 0 }
 0x117   :  { %v292_v58 = vand.u32 4294901760, %v275_v56 }
 0x119   :  { %v319_v59 = vsub.f32 %v275_v56, %v292_v58  ;;  %293 = vmatpush.xpose.msrb.mxu2 %v292_v58  ;;  %417 = vmatpush.xpose.msra.mxu1 %v292_v58 }
 0x11b   :  { %v320_v61 = vand.u32 4294901760, %v319_v59 }
 0x11c   :  { %299 = vmatmul.f32.vlgmr.msrb.gmra.mxu2 %v298_v60  ;;  %419 = vmatmul.f32.vlgmr.msra.gmra.mxu1 %v294_v52 }
 0x11d   :  { %346 = vmatpush.xpose.msra.mxu2 %v319_v59  ;;  %395 = vmatpush.xpose.msra.mxu0 %v320_v61  ;;  %v321_v62 = vsub.f32 %v319_v59, %v320_v61 }
 0x11f   :  { %v322_v63 = vand.u32 4294901760, %v321_v62  ;;  %v627_v62 = vsub.f32 %v625_v47, %v626_v57 }
 0x120   :  { %397 = vmatmul.f32.vlgmr.msra.gmra.mxu0 %v294_v52 }
 0x121   :  { %323 = vmatpush.xpose.msrb.mxu3 %v322_v63 }
 0x124   :  { %325 = vmatmul.f32.vlgmr.msrb.gmra.mxu3 %v294_v52  ;;  %349 = vmatmul.f32.vlgmr.msra.gmra.mxu2 %v295_v53  ;;  %v652_v53 = vand.u32 4294901760, %v651_v45 }
 0x125   :  { %369 = vmatpush.xpose.msra.mxu3 %v292_v58 }
 0x12c   :  { %373 = vmatmul.f32.vlgmr.msra.gmra.mxu3 %v296_v54 }
 0x199   :  { %v420_v13 = vpop.f32.mrf.mxu1 }
 0x19d   :  { %v398_v11 = vpop.f32.mrf.mxu0 }
 0x19f   :  { %v300_v2 = vpop.f32.mrf.mxu2 }
 0x1a7   :  { %v326_v3 = vpop.f32.mrf.mxu3  ;;  %v350_v7 = vpop.f32.mrf.mxu2 }
 0x1a8   :  { %v327_v5 = vadd.f32 %v326_v3, %v300_v2  ;;  %v628_v3 = vand.u32 4294901760, %v627_v62 }
 0x1aa   :  { %v351_v8 = vadd.f32 %v350_v7, %v327_v5 }
 0x1af   :  { %v374_v9 = vpop.f32.mrf.mxu3 }
 0x1b0   :  { %v375_v10 = vadd.f32 %v374_v9, %v351_v8 }
 0x1b2   :  { %v399_v12 = vadd.f32 %v398_v11, %v375_v10 }
 0x1b4   :  { %v421_v14 = vadd.f32 %v420_v13, %v399_v12 }
 0x1b6   :  { %v423_v15 = vsel %vm272_vm1, %v421_v14, -inf }
 0x1b7   :  { %424 = vmax.xlane.f32.xlu0 %v423_v15 }
 0x1cb   :  { %777 = vrot.lane.b32.xlu0 %v8604_v50, %s8540_s30 }
 0x1d3   :  { %929 = vrot.lane.b32.xlu0 %v8604_v50, %s8541_s5 }
 0x22a   :  { %v425_v16 = vpop.xlane.xlu0 %424 }
 0x22b   :  { %v426_v17 = vsub.f32 %v421_v14, %v425_v16 }
 0x22d   :  { %v427_v18 = vmul.f32 1.442695, %v426_v17 }
 0x22f   :  { %8439 = vpow2.f32 %v427_v18 }
 0x235   :  { %v8440_v19 = vpop.eup %8439 }
 0x236   :  { %v429_v20 = vsel %vm272_vm1, %v8440_v19, 0.0 }
 0x237   :  { %430 = vadd.xlane.f32.xlu1 %v429_v20 }
 0x23d   :  { %v778_v48 = vpop.permute.xlu0 %777 }
 0x23e   :  { %v798_v54 = vand.u32 4294901760, %v778_v48 }
 0x240   :  { %v825_v60 = vsub.f32 %v778_v48, %v798_v54 }
 0x242   :  { %v826_v2 = vand.u32 4294901760, %v825_v60 }
 0x244   :  { %v827_v5 = vsub.f32 %v825_v60, %v826_v2 }
 0x246   :  { %v828_v7 = vand.u32 4294901760, %v827_v5 }
 0x250   :  { %447 = vrot.lane.b32.xlu1 %v8604_v50, %s8542_s6 }
 0x2aa   :  { %v431_v21 = vpop.xlane.xlu1 %430 }
 0x2ab   :  { %8441 = vrcp.f32 %v431_v21  ;;  %v443_v28 = vand.u32 2147483648, %v431_v21  ;;  %v441_v30 = vand.u32 2147483647, %v431_v21  ;;  %vm437_vm3 = vweird.f32 %v431_v21 }
 0x2ad   :  { %v444_v34 = vor.u32 1.1754944e-38, %v443_v28  ;;  %vm442_vm5 = vcmp.eq.f32.partialorder %v441_v30, 8.507059e+37 }
 0x2b1   :  { %v8442_v23 = vpop.eup %8441 }
 0x2b2   :  { %v433_v25 = vmul.f32 %v8442_v23, %v431_v21  ;;  %vm438_vm2 = vweird.f32 %v8442_v23 }
 0x2b3   :  { %vm439_vm4 = vmor %vm437_vm3, %vm438_vm2 }
 0x2b4   :  { %v434_v26 = vsub.f32 1.0, %v433_v25 }
 0x2b6   :  { %v435_v29 = vmul.f32 %v8442_v23, %v434_v26 }
 0x2b8   :  { %v436_v32 = vadd.f32 %v8442_v23, %v435_v29 }
 0x2ba   :  { %v440_v35 = vsel %vm439_vm4, %v8442_v23, %v436_v32 }
 0x2bb   :  { %v445_v37 = vsel %vm442_vm5, %v444_v34, %v440_v35 }
 0x2bc   :  { %v8633_v38 = vmul.f32 %v8440_v19, %v445_v37 }
 0x2be   :  { %9705 = vst [vmem:[#allocation5_spill] sm:$0xff] %v8633_v38  ;;  %v451_v42 = vsel %vm272_vm1, %v8633_v38, 0 }
 0x2bf   :  { %v470_v44 = vand.u32 4294901760, %v451_v42 }
 0x2c1   :  { %v471_v46 = vsub.f32 %v451_v42, %v470_v44 }
 0x2c2   :  { %v448_v49 = vpop.permute.xlu1 %447 }
 0x2c3   :  { %v468_v51 = vand.u32 4294901760, %v448_v49  ;;  %v472_v52 = vand.u32 4294901760, %v471_v46 }
 0x2c5   :  { %v495_v55 = vsub.f32 %v448_v49, %v468_v51  ;;  %469 = vmatpush.msrb.mxu2 %v468_v51  ;;  %545 = vmatpush.msrb.mxu1 %v468_v51  ;;  %v473_v56 = vsub.f32 %v471_v46, %v472_v52 }
 0x2c6   :  { %549 = vmatmul.f32.vlgmr.msrb.gmra.mxu1 %v472_v52 }
 0x2c7   :  { %v496_v58 = vand.u32 4294901760, %v495_v55  ;;  %653 = vmatpush.xpose.msra.mxu1 %v652_v53  ;;  %522 = vmatpush.msrb.mxu0 %v495_v55  ;;  %v474_v59 = vand.u32 4294901760, %v473_v56 }
 0x2c8   :  { %525 = vmatmul.f32.vlgmr.msrb.gmra.mxu0 %v471_v46 }
 0x2c9   :  { %v497_v61 = vsub.f32 %v495_v55, %v496_v58  ;;  %623 = vmatpush.xpose.msra.mxu0 %v622_v27  ;;  %475 = vmatmul.f32.vlgmr.msrb.gmra.mxu2 %v474_v59 }
 0x2ca   :  { %571 = vmatpush.msra.mxu2 %v496_v58 }
 0x2cb   :  { %747 = vmatpush.xpose.msrb.mxu1 %v622_v27  ;;  %v498_v63 = vand.u32 4294901760, %v497_v61 }
 0x2cc   :  { %676 = vmatpush.xpose.msrb.mxu2 %v649_v33 }
 0x2cd   :  { %725 = vmatpush.xpose.msrb.mxu0 %v650_v39  ;;  %499 = vmatpush.msrb.mxu3 %v498_v63 }
 0x2ce   :  { %501 = vmatmul.f32.vlgmr.msrb.gmra.mxu3 %v470_v44  ;;  %655 = vmatmul.f32.vlgmr.msra.gmra.mxu1 %v624_v41 }
 0x2cf   :  { %593 = vmatpush.msra.mxu3 %v468_v51  ;;  %875 = vmatpush.msra.mxu1 %v798_v54 }
 0x2d0   :  { %629 = vmatmul.f32.vlgmr.msra.gmra.mxu0 %v628_v3 }
 0x2d1   :  { %699 = vmatpush.xpose.msrb.mxu3 %v622_v27  ;;  %852 = vmatpush.msra.mxu0 %v825_v60 }
 0x2d2   :  { %573 = vmatmul.f32.vlgmr.msra.gmra.mxu2 %v470_v44 }
 0x2d3   :  { %799 = vmatpush.msra.mxu2 %v798_v54 }
 0x2d6   :  { %595 = vmatmul.f32.vlgmr.msra.gmra.mxu3 %v470_v44  ;;  %749 = vmatmul.f32.vlgmr.msrb.gmra.mxu1 %v624_v41  ;;  %v930_v44 = vpop.permute.xlu0 %929 }
 0x2d7   :  { %829 = vmatpush.msra.mxu3 %v828_v7  ;;  %v933_v48 = vsel %vm272_vm1, %v930_v44, 0 }
 0x2d8   :  { %727 = vmatmul.f32.vlgmr.msrb.gmra.mxu0 %v624_v41 }
 0x2da   :  { %679 = vmatmul.f32.vlgmr.msrb.gmra.mxu2 %v625_v47 }
 0x2db   :  { %901 = vmatpush.msrb.mxu2 %v826_v2 }
 0x2de   :  { %703 = vmatmul.f32.vlgmr.msrb.gmra.mxu3 %v626_v57 }
 0x2df   :  { %923 = vmatpush.msrb.mxu3 %v798_v54  ;;  %v954_v54 = vand.u32 4294901760, %v933_v48 }
 0x2e1   :  { %v955_v60 = vsub.f32 %v933_v48, %v954_v54 }
 0x2e3   :  { %v956_v2 = vand.u32 4294901760, %v955_v60 }
 0x343   :  { %v8641_v10 = vpop.f32.mrf.mxu1 }
 0x345   :  { %v8639_v9 = vpop.f32.mrf.mxu0 }
 0x34b   :  { %v656_v15 = vpop.f32.mrf.mxu1 }
 0x34c   :  { %v8637_v8 = vpop.f32.mrf.mxu2 }
 0x34d   :  { %v630_v13 = vpop.f32.mrf.mxu0 }
 0x34e   :  { %v657_v17 = vadd.f32 %v656_v15, %v630_v13  ;;  %v957_v13 = vsub.f32 %v955_v60, %v956_v2 }
 0x351   :  { %v8643_v11 = vpop.f32.mrf.mxu3 }
 0x353   :  { %v750_v23 = vpop.f32.mrf.mxu1 }
 0x355   :  { %v8645_v12 = vpop.f32.mrf.mxu2  ;;  %v728_v21 = vpop.f32.mrf.mxu0 }
 0x359   :  { %v8647_v14 = vpop.f32.mrf.mxu3 }
 0x35d   :  { %v680_v16 = vpop.f32.mrf.mxu2 }
 0x35e   :  { %v681_v18 = vadd.f32 %v680_v16, %v657_v17 }
 0x361   :  { %v704_v19 = vpop.f32.mrf.mxu3 }
 0x362   :  { %v705_v20 = vadd.f32 %v704_v19, %v681_v18  ;;  %v958_v18 = vand.u32 4294901760, %v957_v13 }
 0x364   :  { %v729_v22 = vadd.f32 %v728_v21, %v705_v20 }
 0x366   :  { %v751_v24 = vadd.f32 %v750_v23, %v729_v22 }
 0x368   :  { %v753_v25 = vsel %vm272_vm1, %v751_v24, -inf }
 0x369   :  { %754 = vmax.xlane.f32.xlu2 %v753_v25 }
 0x381   :  { %931 = vrot.lane.b32.xlu2 %v8604_v50, %s8543_s7 }
 0x389   :  { %1107 = vrot.lane.b32.xlu2 %v8604_v50, %s8544_s8 }
 0x391   :  { %1259 = vrot.lane.b32.xlu2 %v8604_v50, %s8545_s9 }
 0x3dc   :  { %v755_v26 = vpop.xlane.xlu2 %754 }
 0x3dd   :  { %v756_v27 = vsub.f32 %v751_v24, %v755_v26 }
 0x3df   :  { %v757_v28 = vmul.f32 1.442695, %v756_v27 }
 0x3e1   :  { %8443 = vpow2.f32 %v757_v28 }
 0x3e4   :  { %v932_v29 = vpop.permute.xlu2 %931 }
 0x3e5   :  { %v935_v30 = vsel %vm272_vm1, %v932_v29, 0 }
 0x3e6   :  { %v952_v31 = vand.u32 4294901760, %v935_v30 }
 0x3e7   :  { %v8444_v32 = vpop.eup %8443 }
 0x3e8   :  { %v979_v33 = vsub.f32 %v935_v30, %v952_v31  ;;  %953 = vmatpush.xpose.msrb.mxu0 %v952_v31  ;;  %v759_v34 = vsel %vm272_vm1, %v8444_v32, 0.0 }
 0x3e9   :  { %760 = vadd.xlane.f32.xlu1 %v759_v34 }
 0x3ea   :  { %v980_v35 = vand.u32 4294901760, %v979_v33 }
 0x3ec   :  { %v981_v36 = vsub.f32 %v979_v33, %v980_v35  ;;  %v1108_v46 = vpop.permute.xlu2 %1107 }
 0x3ed   :  { %v1128_v52 = vand.u32 4294901760, %v1108_v46 }
 0x3ee   :  { %v982_v37 = vand.u32 4294901760, %v981_v36 }
 0x3ef   :  { %v1155_v58 = vsub.f32 %v1108_v46, %v1128_v52 }
 0x3f0   :  { %983 = vmatpush.xpose.msrb.mxu1 %v982_v37 }
 0x3f1   :  { %v1156_v63 = vand.u32 4294901760, %v1155_v58 }
 0x3f3   :  { %v1157_v7 = vsub.f32 %v1155_v58, %v1156_v63 }
 0x3f5   :  { %v1158_v17 = vand.u32 4294901760, %v1157_v7 }
 0x45c   :  { %v761_v39 = vpop.xlane.xlu1 %760 }
 0x45d   :  { %8445 = vrcp.f32 %v761_v39  ;;  %v773_v47 = vand.u32 2147483648, %v761_v39  ;;  %v771_v51 = vand.u32 2147483647, %v761_v39  ;;  %vm767_vm7 = vweird.f32 %v761_v39 }
 0x45f   :  { %v774_v55 = vor.u32 1.1754944e-38, %v773_v47  ;;  %vm772_vm9 = vcmp.eq.f32.partialorder %v771_v51, 8.507059e+37 }
 0x463   :  { %v8446_v41 = vpop.eup %8445 }
 0x464   :  { %v763_v42 = vmul.f32 %v8446_v41, %v761_v39  ;;  %vm768_vm6 = vweird.f32 %v8446_v41 }
 0x465   :  { %vm769_vm8 = vmor %vm767_vm7, %vm768_vm6 }
 0x466   :  { %v764_v45 = vsub.f32 1.0, %v763_v42 }
 0x468   :  { %v765_v49 = vmul.f32 %v8446_v41, %v764_v45 }
 0x46a   :  { %v766_v53 = vadd.f32 %v8446_v41, %v765_v49 }
 0x46c   :  { %v770_v56 = vsel %vm769_vm8, %v8446_v41, %v766_v53 }
 0x46d   :  { %v775_v57 = vsel %vm772_vm9, %v774_v55, %v770_v56  ;;  %v1260_v56 = vpop.permute.xlu2 %1259 }
 0x46e   :  { %v8659_v59 = vmul.f32 %v8444_v32, %v775_v57 }
 0x470   :  { %9706 = vst [vmem:[#allocation6_spill] sm:$0xff] %v8659_v59  ;;  %v781_v61 = vsel %vm272_vm1, %v8659_v59, 0 }
 0x471   :  { %v800_v62 = vand.u32 4294901760, %v781_v61 }
 0x473   :  { %831 = vmatmul.f32.vlgmr.msra.gmra.mxu3 %v800_v62  ;;  %v801_v3 = vsub.f32 %v781_v61, %v800_v62 }
 0x474   :  { %1029 = vmatpush.xpose.msra.mxu3 %v952_v31 }
 0x475   :  { %855 = vmatmul.f32.vlgmr.msra.gmra.mxu0 %v801_v3  ;;  %v802_v5 = vand.u32 4294901760, %v801_v3 }
 0x476   :  { %1055 = vmatpush.xpose.msra.mxu0 %v980_v35 }
 0x477   :  { %879 = vmatmul.f32.vlgmr.msra.gmra.mxu1 %v802_v5  ;;  %v803_v15 = vsub.f32 %v801_v3, %v802_v5 }
 0x478   :  { %1077 = vmatpush.xpose.msra.mxu1 %v952_v31 }
 0x479   :  { %v804_v16 = vand.u32 4294901760, %v803_v15 }
 0x47b   :  { %805 = vmatmul.f32.vlgmr.msra.gmra.mxu2 %v804_v16  ;;  %925 = vmatmul.f32.vlgmr.msrb.gmra.mxu3 %v800_v62 }
 0x47c   :  { %1006 = vmatpush.xpose.msra.mxu2 %v979_v33  ;;  %1159 = vmatpush.msrb.mxu3 %v1158_v17 }
 0x47d   :  { %959 = vmatmul.f32.vlgmr.msrb.gmra.mxu0 %v958_v18 }
 0x47e   :  { %1182 = vmatpush.msrb.mxu0 %v1155_v58 }
 0x47f   :  { %985 = vmatmul.f32.vlgmr.msrb.gmra.mxu1 %v954_v54 }
 0x480   :  { %1205 = vmatpush.msrb.mxu1 %v1128_v52 }
 0x483   :  { %903 = vmatmul.f32.vlgmr.msrb.gmra.mxu2 %v800_v62  ;;  %1033 = vmatmul.f32.vlgmr.msra.gmra.mxu3 %v956_v2 }
 0x484   :  { %1129 = vmatpush.msrb.mxu2 %v1128_v52  ;;  %1253 = vmatpush.msra.mxu3 %v1128_v52 }
 0x485   :  { %1057 = vmatmul.f32.vlgmr.msra.gmra.mxu0 %v954_v54 }
 0x487   :  { %1079 = vmatmul.f32.vlgmr.msra.gmra.mxu1 %v954_v54 }
 0x48b   :  { %1009 = vmatmul.f32.vlgmr.msra.gmra.mxu2 %v955_v60  ;;  %v1263_v60 = vsel %vm272_vm1, %v1260_v56, 0 }
 0x48c   :  { %1231 = vmatpush.msra.mxu2 %v1156_v63  ;;  %v1284_v2 = vand.u32 4294901760, %v1263_v60 }
 0x48e   :  { %v1285_v13 = vsub.f32 %v1263_v60, %v1284_v2 }
 0x4f2   :  { %v8665_v20 = vpop.f32.mrf.mxu0 }
 0x4f4   :  { %v8669_v22 = vpop.f32.mrf.mxu1 }
 0x4f6   :  { %v8663_v19 = vpop.f32.mrf.mxu3 }
 0x4fa   :  { %v960_v25 = vpop.f32.mrf.mxu0 }
 0x4fc   :  { %v986_v26 = vpop.f32.mrf.mxu1 }
 0x4fd   :  { %v987_v27 = vadd.f32 %v986_v26, %v960_v25  ;;  %v1286_v26 = vand.u32 4294901760, %v1285_v13 }
 0x4fe   :  { %v8667_v21 = vpop.f32.mrf.mxu2  ;;  %v8671_v23 = vpop.f32.mrf.mxu3 }
 0x502   :  { %v1058_v32 = vpop.f32.mrf.mxu0 }
 0x504   :  { %v1080_v34 = vpop.f32.mrf.mxu1 }
 0x506   :  { %v8673_v24 = vpop.f32.mrf.mxu2  ;;  %v1034_v30 = vpop.f32.mrf.mxu3 }
 0x50e   :  { %v1010_v28 = vpop.f32.mrf.mxu2 }
 0x50f   :  { %v1011_v29 = vadd.f32 %v1010_v28, %v987_v27 }
 0x511   :  { %v1035_v31 = vadd.f32 %v1034_v30, %v1011_v29 }
 0x513   :  { %v1059_v33 = vadd.f32 %v1058_v32, %v1035_v31  ;;  %v1287_v31 = vsub.f32 %v1285_v13, %v1286_v26 }
 0x515   :  { %v1081_v35 = vadd.f32 %v1080_v34, %v1059_v33 }
 0x517   :  { %v1083_v36 = vsel %vm272_vm1, %v1081_v35, -inf }
 0x518   :  { %1084 = vmax.xlane.f32.xlu1 %v1083_v36 }
 0x531   :  { %1261 = vrot.lane.b32.xlu1 %v8604_v50, %s8546_s10 }
 0x58b   :  { %v1085_v37 = vpop.xlane.xlu1 %1084 }
 0x58c   :  { %v1086_v39 = vsub.f32 %v1081_v35, %v1085_v37  ;;  %v1288_v35 = vand.u32 4294901760, %v1287_v31 }
 0x58e   :  { %v1087_v41 = vmul.f32 1.442695, %v1086_v39 }
 0x590   :  { %8447 = vpow2.f32 %v1087_v41 }
 0x596   :  { %v8448_v42 = vpop.eup %8447 }
 0x597   :  { %v1089_v44 = vsel %vm272_vm1, %v8448_v42, 0.0 }
 0x598   :  { %1090 = vadd.xlane.f32.xlu0 %v1089_v44 }
 0x5a3   :  { %v1262_v45 = vpop.permute.xlu1 %1261 }
 0x5a4   :  { %v1265_v46 = vsel %vm272_vm1, %v1262_v45, 0 }
 0x5a5   :  { %v1282_v47 = vand.u32 4294901760, %v1265_v46 }
 0x5a7   :  { %v1309_v48 = vsub.f32 %v1265_v46, %v1282_v47  ;;  %1283 = vmatpush.xpose.msra.mxu0 %v1282_v47 }
 0x5a9   :  { %v1310_v49 = vand.u32 4294901760, %v1309_v48 }
 0x5ab   :  { %v1311_v51 = vsub.f32 %v1309_v48, %v1310_v49 }
 0x5ac   :  { %1437 = vrot.lane.b32.xlu0 %v8604_v50, %s8547_s11 }
 0x5ad   :  { %v1312_v52 = vand.u32 4294901760, %v1311_v51 }
 0x5af   :  { %1313 = vmatpush.xpose.msra.mxu1 %v1312_v52 }
 0x60b   :  { %v1091_v53 = vpop.xlane.xlu0 %1090 }
 0x60c   :  { %8449 = vrcp.f32 %v1091_v53  ;;  %v1103_v58 = vand.u32 2147483648, %v1091_v53  ;;  %v1101_v62 = vand.u32 2147483647, %v1091_v53  ;;  %vm1097_vm11 = vweird.f32 %v1091_v53 }
 0x60e   :  { %v1104_v3 = vor.u32 1.1754944e-38, %v1103_v58  ;;  %vm1102_vm13 = vcmp.eq.f32.partialorder %v1101_v62, 8.507059e+37  ;;  %v133_v58 = vadd.f32 %v8602_v43, %v8600_v40 }
 0x610   :  { %v168_v60 = vadd.f32 %v8615_v0, %v133_v58 }
 0x612   :  { %v8450_v54 = vpop.eup %8449 }
 0x613   :  { %v1093_v55 = vmul.f32 %v8450_v54, %v1091_v53  ;;  %vm1098_vm10 = vweird.f32 %v8450_v54 }
 0x614   :  { %vm1099_vm12 = vmor %vm1097_vm11, %vm1098_vm10 }
 0x615   :  { %v1094_v57 = vsub.f32 1.0, %v1093_v55 }
 0x617   :  { %v1095_v61 = vmul.f32 %v8450_v54, %v1094_v57 }
 0x619   :  { %v1096_v63 = vadd.f32 %v8450_v54, %v1095_v61  ;;  %v201_v61 = vadd.f32 %v8617_v1, %v168_v60 }
 0x61b   :  { %v1100_v50 = vsel %vm1099_vm12, %v8450_v54, %v1096_v63  ;;  %v238_v62 = vadd.f32 %v8619_v4, %v201_v61 }
 0x61c   :  { %v1105_v5 = vsel %vm1102_vm13, %v1104_v3, %v1100_v50 }
 0x61d   :  { %v8683_v7 = vmul.f32 %v8448_v42, %v1105_v5  ;;  %v8706_v63 = vadd.f32 %v8621_v6, %v238_v62 }
 0x61e   :  { %v1438_v15 = vpop.permute.xlu0 %1437 }
 0x61f   :  { %9707 = vst [vmem:[#allocation7_spill] sm:$0xff] %v8683_v7  ;;  %v1458_v16 = vand.u32 4294901760, %v1438_v15  ;;  %v1111_v17 = vsel %vm272_vm1, %v8683_v7, 0 }
 0x620   :  { %v1130_v18 = vand.u32 4294901760, %v1111_v17 }
 0x621   :  { %v1485_v25 = vsub.f32 %v1438_v15, %v1458_v16 }
 0x622   :  { %1161 = vmatmul.f32.vlgmr.msrb.gmra.mxu3 %v1130_v18  ;;  %v1131_v27 = vsub.f32 %v1111_v17, %v1130_v18 }
 0x623   :  { %v1486_v28 = vand.u32 4294901760, %v1485_v25  ;;  %1359 = vmatpush.xpose.msrb.mxu3 %v1282_v47 }
 0x624   :  { %1185 = vmatmul.f32.vlgmr.msrb.gmra.mxu0 %v1131_v27  ;;  %v1132_v29 = vand.u32 4294901760, %v1131_v27 }
 0x625   :  { %v1487_v30 = vsub.f32 %v1485_v25, %v1486_v28  ;;  %1385 = vmatpush.xpose.msrb.mxu0 %v1310_v49 }
 0x626   :  { %1209 = vmatmul.f32.vlgmr.msrb.gmra.mxu1 %v1132_v29  ;;  %v1133_v32 = vsub.f32 %v1131_v27, %v1132_v29  ;;  %v1609_v29 = vsel %vm272_vm1, %v8706_v63, 0 }
 0x627   :  { %v1488_v33 = vand.u32 4294901760, %v1487_v30  ;;  %1407 = vmatpush.xpose.msrb.mxu1 %v1282_v47 }
 0x628   :  { %v1134_v34 = vand.u32 4294901760, %v1133_v32  ;;  %v1630_v32 = vand.u32 4294901760, %v1609_v29 }
 0x62a   :  { %1135 = vmatmul.f32.vlgmr.msrb.gmra.mxu2 %v1134_v34  ;;  %1255 = vmatmul.f32.vlgmr.msra.gmra.mxu3 %v1130_v18 }
 0x62b   :  { %1336 = vmatpush.xpose.msrb.mxu2 %v1309_v48  ;;  %1489 = vmatpush.msra.mxu3 %v1488_v33 }
 0x62c   :  { %1289 = vmatmul.f32.vlgmr.msra.gmra.mxu0 %v1288_v35 }
 0x62d   :  { %1512 = vmatpush.msra.mxu0 %v1485_v25 }
 0x62e   :  { %1315 = vmatmul.f32.vlgmr.msra.gmra.mxu1 %v1284_v2 }
 0x62f   :  { %1535 = vmatpush.msra.mxu1 %v1458_v16 }
 0x632   :  { %1233 = vmatmul.f32.vlgmr.msra.gmra.mxu2 %v1130_v18  ;;  %1363 = vmatmul.f32.vlgmr.msrb.gmra.mxu3 %v1286_v26 }
 0x633   :  { %1459 = vmatpush.msra.mxu2 %v1458_v16  ;;  %1583 = vmatpush.msrb.mxu3 %v1458_v16 }
 0x634   :  { %1387 = vmatmul.f32.vlgmr.msrb.gmra.mxu0 %v1284_v2 }
 0x636   :  { %1409 = vmatmul.f32.vlgmr.msrb.gmra.mxu1 %v1284_v2 }
 0x63a   :  { %1339 = vmatmul.f32.vlgmr.msrb.gmra.mxu2 %v1285_v13 }
 0x63b   :  { %1561 = vmatpush.msrb.mxu2 %v1486_v28 }
 0x6a1   :  { %v8689_v37 = vpop.f32.mrf.mxu0 }
 0x6a3   :  { %v8693_v41 = vpop.f32.mrf.mxu1 }
 0x6a5   :  { %v8687_v36 = vpop.f32.mrf.mxu3 }
 0x6a9   :  { %v1290_v45 = vpop.f32.mrf.mxu0 }
 0x6ab   :  { %v1316_v46 = vpop.f32.mrf.mxu1 }
 0x6ac   :  { %v1317_v47 = vadd.f32 %v1316_v46, %v1290_v45  ;;  %v1631_v45 = vsub.f32 %v1609_v29, %v1630_v32 }
 0x6ad   :  { %v8691_v39 = vpop.f32.mrf.mxu2  ;;  %v8695_v42 = vpop.f32.mrf.mxu3 }
 0x6b1   :  { %v1388_v53 = vpop.f32.mrf.mxu0 }
 0x6b3   :  { %v1410_v55 = vpop.f32.mrf.mxu1 }
 0x6b5   :  { %v8697_v44 = vpop.f32.mrf.mxu2  ;;  %v1364_v51 = vpop.f32.mrf.mxu3 }
 0x6bd   :  { %v1340_v48 = vpop.f32.mrf.mxu2 }
 0x6be   :  { %v1341_v49 = vadd.f32 %v1340_v48, %v1317_v47 }
 0x6c0   :  { %v1365_v52 = vadd.f32 %v1364_v51, %v1341_v49  ;;  %v1632_v49 = vand.u32 4294901760, %v1631_v45 }
 0x6c2   :  { %v1389_v54 = vadd.f32 %v1388_v53, %v1365_v52  ;;  %v1633_v53 = vsub.f32 %v1631_v45, %v1632_v49 }
 0x6c4   :  { %v1411_v56 = vadd.f32 %v1410_v55, %v1389_v54  ;;  %v1634_v55 = vand.u32 4294901760, %v1633_v53 }
 0x6c6   :  { %v1413_v57 = vsel %vm272_vm1, %v1411_v56, -inf }
 0x6c7   :  { %1414 = vmax.xlane.f32.xlu2 %v1413_v57 }
 0x6df   :  { %1607 = vrot.lane.b32.xlu2 %v8706_v63, %s8538_s28 }
 0x6e7   :  { %1937 = vrot.lane.b32.xlu2 %v8706_v63, %s8537_s27 }
 0x6ef   :  { %1935 = vrot.lane.b32.xlu2 %v8706_v63, %s8539_s29 }
 0x73a   :  { %v1415_v2 = vpop.xlane.xlu2 %1414 }
 0x73b   :  { %v1416_v40 = vsub.f32 %v1411_v56, %v1415_v2 }
 0x73d   :  { %v1417_v43 = vmul.f32 1.442695, %v1416_v40 }
 0x73f   :  { %8451 = vpow2.f32 %v1417_v43 }
 0x742   :  { %v1608_v0 = vpop.permute.xlu2 %1607 }
 0x743   :  { %v1611_v1 = vsel %vm272_vm1, %v1608_v0, 0 }
 0x744   :  { %v1628_v4 = vand.u32 4294901760, %v1611_v1 }
 0x745   :  { %v8452_v3 = vpop.eup %8451 }
 0x746   :  { %v1655_v6 = vsub.f32 %v1611_v1, %v1628_v4  ;;  %1629 = vmatpush.xpose.msrb.mxu0 %v1628_v4  ;;  %v1419_v50 = vsel %vm272_vm1, %v8452_v3, 0.0 }
 0x747   :  { %1420 = vadd.xlane.f32.xlu1 %v1419_v50 }
 0x748   :  { %v1656_v5 = vand.u32 4294901760, %v1655_v6 }
 0x74a   :  { %v1657_v13 = vsub.f32 %v1655_v6, %v1656_v5 }
 0x74c   :  { %v1658_v15 = vand.u32 4294901760, %v1657_v13 }
 0x74e   :  { %1659 = vmatpush.xpose.msrb.mxu1 %v1658_v15 }
 0x7ba   :  { %v1421_v16 = vpop.xlane.xlu1 %1420 }
 0x7bb   :  { %8453 = vrcp.f32 %v1421_v16  ;;  %v1433_v26 = vand.u32 2147483648, %v1421_v16  ;;  %v1431_v28 = vand.u32 2147483647, %v1421_v16  ;;  %vm1427_vm15 = vweird.f32 %v1421_v16 }
 0x7bd   :  { %v1434_v31 = vor.u32 1.1754944e-38, %v1433_v26  ;;  %vm1432_vm3 = vcmp.eq.f32.partialorder %v1431_v28, 8.507059e+37  ;;  %v1938_v28 = vpop.permute.xlu2 %1937 }
 0x7c1   :  { %v8454_v17 = vpop.eup %8453 }
 0x7c2   :  { %v1423_v18 = vmul.f32 %v8454_v17, %v1421_v16  ;;  %vm1428_vm14 = vweird.f32 %v8454_v17 }
 0x7c3   :  { %vm1429_vm2 = vmor %vm1427_vm15, %vm1428_vm14 }
 0x7c4   :  { %v1424_v25 = vsub.f32 1.0, %v1423_v18 }
 0x7c6   :  { %v1425_v27 = vmul.f32 %v8454_v17, %v1424_v25 }
 0x7c8   :  { %v1426_v30 = vadd.f32 %v8454_v17, %v1425_v27 }
 0x7ca   :  { %v1430_v33 = vsel %vm1429_vm2, %v8454_v17, %v1426_v30  ;;  %v1941_v30 = vsel %vm272_vm1, %v1938_v28, 0 }
 0x7cb   :  { %v1435_v34 = vsel %vm1432_vm3, %v1434_v31, %v1430_v33  ;;  %v1958_v33 = vand.u32 4294901760, %v1941_v30 }
 0x7cc   :  { %v8718_v35 = vmul.f32 %v8452_v3, %v1435_v34 }
 0x7ce   :  { %9708 = vst [vmem:[#allocation8_spill] sm:$0xff] %v8718_v35  ;;  %v1441_v46 = vsel %vm272_vm1, %v8718_v35, 0 }
 0x7cf   :  { %v1460_v47 = vand.u32 4294901760, %v1441_v46 }
 0x7d1   :  { %1491 = vmatmul.f32.vlgmr.msra.gmra.mxu3 %v1460_v47  ;;  %v1461_v48 = vsub.f32 %v1441_v46, %v1460_v47 }
 0x7d2   :  { %1705 = vmatpush.xpose.msra.mxu3 %v1628_v4 }
 0x7d3   :  { %1515 = vmatmul.f32.vlgmr.msra.gmra.mxu0 %v1461_v48  ;;  %v1462_v51 = vand.u32 4294901760, %v1461_v48 }
 0x7d4   :  { %1731 = vmatpush.xpose.msra.mxu0 %v1656_v5 }
 0x7d5   :  { %1539 = vmatmul.f32.vlgmr.msra.gmra.mxu1 %v1462_v51  ;;  %v1463_v52 = vsub.f32 %v1461_v48, %v1462_v51 }
 0x7d6   :  { %1753 = vmatpush.xpose.msra.mxu1 %v1628_v4 }
 0x7d7   :  { %v1464_v54 = vand.u32 4294901760, %v1463_v52 }
 0x7d9   :  { %1465 = vmatmul.f32.vlgmr.msra.gmra.mxu2 %v1464_v54  ;;  %1585 = vmatmul.f32.vlgmr.msrb.gmra.mxu3 %v1460_v47 }
 0x7da   :  { %1682 = vmatpush.xpose.msra.mxu2 %v1655_v6 }
 0x7db   :  { %1635 = vmatmul.f32.vlgmr.msrb.gmra.mxu0 %v1634_v55 }
 0x7dd   :  { %1661 = vmatmul.f32.vlgmr.msrb.gmra.mxu1 %v1630_v32 }
 0x7e1   :  { %1563 = vmatmul.f32.vlgmr.msrb.gmra.mxu2 %v1460_v47  ;;  %1709 = vmatmul.f32.vlgmr.msra.gmra.mxu3 %v1632_v49  ;;  %v1936_v47 = vpop.permute.xlu2 %1935  ;;  %v1985_v49 = vsub.f32 %v1941_v30, %v1958_v33 }
 0x7e2   :  { %v1939_v53 = vsel %vm272_vm1, %v1936_v47, 0 }
 0x7e3   :  { %1733 = vmatmul.f32.vlgmr.msra.gmra.mxu0 %v1630_v32 }
 0x7e5   :  { %1755 = vmatmul.f32.vlgmr.msra.gmra.mxu1 %v1630_v32 }
 0x7e9   :  { %1685 = vmatmul.f32.vlgmr.msra.gmra.mxu2 %v1631_v45 }
 0x850   :  { %v8724_v57 = vpop.f32.mrf.mxu0 }
 0x852   :  { %v8728_v60 = vpop.f32.mrf.mxu1 }
 0x854   :  { %v8722_v56 = vpop.f32.mrf.mxu3 }
 0x858   :  { %v1636_v2 = vpop.f32.mrf.mxu0 }
 0x85a   :  { %v1662_v40 = vpop.f32.mrf.mxu1 }
 0x85b   :  { %v1663_v43 = vadd.f32 %v1662_v40, %v1636_v2  ;;  %v1986_v2 = vand.u32 4294901760, %v1985_v49  ;;  %v1960_v40 = vand.u32 4294901760, %v1939_v53 }
 0x85c   :  { %v8726_v58 = vpop.f32.mrf.mxu2  ;;  %v8730_v61 = vpop.f32.mrf.mxu3 }
 0x860   :  { %v1734_v6 = vpop.f32.mrf.mxu0 }
 0x862   :  { %v1756_v5 = vpop.f32.mrf.mxu1 }
 0x864   :  { %v8732_v62 = vpop.f32.mrf.mxu2  ;;  %v1710_v4 = vpop.f32.mrf.mxu3 }
 0x86c   :  { %v1686_v0 = vpop.f32.mrf.mxu2 }
 0x86d   :  { %v1687_v1 = vadd.f32 %v1686_v0, %v1663_v43 }
 0x86f   :  { %v1711_v3 = vadd.f32 %v1710_v4, %v1687_v1  ;;  %v1987_v1 = vsub.f32 %v1985_v49, %v1986_v2 }
 0x871   :  { %v1735_v50 = vadd.f32 %v1734_v6, %v1711_v3  ;;  %v1961_v3 = vsub.f32 %v1939_v53, %v1960_v40 }
 0x873   :  { %v1757_v13 = vadd.f32 %v1756_v5, %v1735_v50 }
 0x875   :  { %v1759_v15 = vsel %vm272_vm1, %v1757_v13, -inf }
 0x876   :  { %1760 = vmax.xlane.f32.xlu0 %v1759_v15 }
 0x8e9   :  { %v1761_v16 = vpop.xlane.xlu0 %1760 }
 0x8ea   :  { %v1762_v17 = vsub.f32 %v1757_v13, %v1761_v16  ;;  %v1988_v13 = vand.u32 4294901760, %v1987_v1 }
 0x8ec   :  { %v1763_v18 = vmul.f32 1.442695, %v1762_v17  ;;  %v1962_v17 = vand.u32 4294901760, %v1961_v3 }
 0x8ee   :  { %8455 = vpow2.f32 %v1763_v18 }
 0x8f4   :  { %v8456_v25 = vpop.eup %8455 }
 0x8f5   :  { %v1765_v26 = vsel %vm272_vm1, %v8456_v25, 0.0 }
 0x8f6   :  { %1766 = vadd.xlane.f32.xlu1 %v1765_v26 }
 0x90f   :  { %1783 = vrot.lane.b32.xlu1 %v8706_v63, %s8542_s6 }
 0x917   :  { %2113 = vrot.lane.b32.xlu1 %v8706_v63, %s8540_s30 }
 0x91f   :  { %2265 = vrot.lane.b32.xlu1 %v8706_v63, %s8541_s5 }
 0x969   :  { %v1767_v27 = vpop.xlane.xlu1 %1766 }
 0x96a   :  { %8457 = vrcp.f32 %v1767_v27  ;;  %v1779_v34 = vand.u32 2147483648, %v1767_v27  ;;  %v1777_v46 = vand.u32 2147483647, %v1767_v27  ;;  %vm1773_vm5 = vweird.f32 %v1767_v27 }
 0x96c   :  { %v1780_v51 = vor.u32 1.1754944e-38, %v1779_v34  ;;  %vm1778_vm7 = vcmp.eq.f32.partialorder %v1777_v46, 8.507059e+37 }
 0x970   :  { %v8458_v29 = vpop.eup %8457 }
 0x971   :  { %v1769_v31 = vmul.f32 %v8458_v29, %v1767_v27  ;;  %vm1774_vm4 = vweird.f32 %v8458_v29  ;;  %v1963_v27 = vsub.f32 %v1961_v3, %v1962_v17 }
 0x972   :  { %vm1775_vm6 = vmor %vm1773_vm5, %vm1774_vm4 }
 0x973   :  { %v1770_v32 = vsub.f32 1.0, %v1769_v31 }
 0x975   :  { %v1771_v45 = vmul.f32 %v8458_v29, %v1770_v32  ;;  %v1964_v32 = vand.u32 4294901760, %v1963_v27 }
 0x977   :  { %v1772_v48 = vadd.f32 %v8458_v29, %v1771_v45 }
 0x979   :  { %v1776_v52 = vsel %vm1775_vm6, %v8458_v29, %v1772_v48  ;;  %vm1602_vm6 = vcmask 130048  }
 0x97a   :  { %v1781_v54 = vsel %vm1778_vm7, %v1780_v51, %v1776_v52  ;;  %vm1604_vm7 = vcmask 195584  }
 0x97b   :  { %v8744_v55 = vmul.f32 %v8456_v25, %v1781_v54 }
 0x97d   :  { %9709 = vst [vmem:[#allocation9_spill] sm:$0xff] %v8744_v55  ;;  %v1787_v43 = vsel %vm272_vm1, %v8744_v55, 0 }
 0x97e   :  { %v1806_v0 = vand.u32 4294901760, %v1787_v43 }
 0x980   :  { %v1807_v4 = vsub.f32 %v1787_v43, %v1806_v0 }
 0x981   :  { %v1784_v6 = vpop.permute.xlu1 %1783 }
 0x982   :  { %v1804_v50 = vand.u32 4294901760, %v1784_v6  ;;  %v1808_v5 = vand.u32 4294901760, %v1807_v4 }
 0x984   :  { %v1831_v15 = vsub.f32 %v1784_v6, %v1804_v50  ;;  %1805 = vmatpush.msrb.mxu2 %v1804_v50  ;;  %1881 = vmatpush.msrb.mxu1 %v1804_v50  ;;  %v1809_v16 = vsub.f32 %v1807_v4, %v1808_v5 }
 0x985   :  { %1885 = vmatmul.f32.vlgmr.msrb.gmra.mxu1 %v1808_v5 }
 0x986   :  { %v1832_v18 = vand.u32 4294901760, %v1831_v15  ;;  %1989 = vmatpush.xpose.msra.mxu1 %v1988_v13  ;;  %1858 = vmatpush.msrb.mxu0 %v1831_v15  ;;  %v1810_v25 = vand.u32 4294901760, %v1809_v16 }
 0x987   :  { %1861 = vmatmul.f32.vlgmr.msrb.gmra.mxu0 %v1807_v4 }
 0x988   :  { %v1833_v26 = vsub.f32 %v1831_v15, %v1832_v18  ;;  %1959 = vmatpush.xpose.msra.mxu0 %v1958_v33  ;;  %1811 = vmatmul.f32.vlgmr.msrb.gmra.mxu2 %v1810_v25 }
 0x989   :  { %1907 = vmatpush.msra.mxu2 %v1832_v18  ;;  %v2114_v28 = vpop.permute.xlu1 %2113 }
 0x98a   :  { %2083 = vmatpush.xpose.msrb.mxu1 %v1958_v33  ;;  %v1834_v29 = vand.u32 4294901760, %v1833_v26  ;;  %v2134_v30 = vand.u32 4294901760, %v2114_v28 }
 0x98b   :  { %2012 = vmatpush.xpose.msrb.mxu2 %v1985_v49 }
 0x98c   :  { %2061 = vmatpush.xpose.msrb.mxu0 %v1986_v2  ;;  %v2161_v31 = vsub.f32 %v2114_v28, %v2134_v30  ;;  %1835 = vmatpush.msrb.mxu3 %v1834_v29 }
 0x98d   :  { %1837 = vmatmul.f32.vlgmr.msrb.gmra.mxu3 %v1806_v0  ;;  %1991 = vmatmul.f32.vlgmr.msra.gmra.mxu1 %v1960_v40 }
 0x98e   :  { %v2162_v34 = vand.u32 4294901760, %v2161_v31  ;;  %1929 = vmatpush.msra.mxu3 %v1804_v50  ;;  %2211 = vmatpush.msra.mxu1 %v2134_v30 }
 0x98f   :  { %1965 = vmatmul.f32.vlgmr.msra.gmra.mxu0 %v1964_v32 }
 0x990   :  { %2035 = vmatpush.xpose.msrb.mxu3 %v1958_v33  ;;  %v2163_v45 = vsub.f32 %v2161_v31, %v2162_v34  ;;  %2188 = vmatpush.msra.mxu0 %v2161_v31 }
 0x991   :  { %1909 = vmatmul.f32.vlgmr.msra.gmra.mxu2 %v1806_v0  ;;  %v2266_v28 = vpop.permute.xlu1 %2265 }
 0x992   :  { %2135 = vmatpush.msra.mxu2 %v2134_v30  ;;  %v2164_v46 = vand.u32 4294901760, %v2163_v45  ;;  %v2269_v45 = vsel %vm272_vm1, %v2266_v28, 0 }
 0x995   :  { %1931 = vmatmul.f32.vlgmr.msra.gmra.mxu3 %v1806_v0  ;;  %2085 = vmatmul.f32.vlgmr.msrb.gmra.mxu1 %v1960_v40 }
 0x996   :  { %2165 = vmatpush.msra.mxu3 %v2164_v46 }
 0x997   :  { %2063 = vmatmul.f32.vlgmr.msrb.gmra.mxu0 %v1960_v40 }
 0x999   :  { %2015 = vmatmul.f32.vlgmr.msrb.gmra.mxu2 %v1961_v3 }
 0x99a   :  { %2237 = vmatpush.msrb.mxu2 %v2162_v34 }
 0x99d   :  { %2039 = vmatmul.f32.vlgmr.msrb.gmra.mxu3 %v1962_v17 }
 0x99e   :  { %2259 = vmatpush.msrb.mxu3 %v2134_v30 }
 0xa02   :  { %v8752_v49 = vpop.f32.mrf.mxu1 }
 0xa04   :  { %v8750_v48 = vpop.f32.mrf.mxu0 }
 0xa0a   :  { %v1992_v54 = vpop.f32.mrf.mxu1 }
 0xa0b   :  { %v8748_v47 = vpop.f32.mrf.mxu2 }
 0xa0c   :  { %v1966_v52 = vpop.f32.mrf.mxu0 }
 0xa0d   :  { %v1993_v40 = vadd.f32 %v1992_v54, %v1966_v52 }
 0xa10   :  { %v8754_v33 = vpop.f32.mrf.mxu3 }
 0xa12   :  { %v2086_v6 = vpop.f32.mrf.mxu1 }
 0xa14   :  { %v8756_v51 = vpop.f32.mrf.mxu2  ;;  %v2064_v4 = vpop.f32.mrf.mxu0 }
 0xa18   :  { %v8758_v53 = vpop.f32.mrf.mxu3 }
 0xa1c   :  { %v2016_v2 = vpop.f32.mrf.mxu2 }
 0xa1d   :  { %v2017_v43 = vadd.f32 %v2016_v2, %v1993_v40  ;;  %v2290_v2 = vand.u32 4294901760, %v2269_v45 }
 0xa20   :  { %v2040_v0 = vpop.f32.mrf.mxu3 }
 0xa21   :  { %v2041_v1 = vadd.f32 %v2040_v0, %v2017_v43 }
 0xa23   :  { %v2065_v3 = vadd.f32 %v2064_v4, %v2041_v1 }
 0xa25   :  { %v2087_v50 = vadd.f32 %v2086_v6, %v2065_v3  ;;  %v2291_v3 = vsub.f32 %v2269_v45, %v2290_v2 }
 0xa27   :  { %v2089_v5 = vsel %vm272_vm1, %v2087_v50, -inf }
 0xa28   :  { %2090 = vmax.xlane.f32.xlu2 %v2089_v5 }
 0xa40   :  { %2443 = vrot.lane.b32.xlu2 %v8706_v63, %s8544_s8 }
 0xa48   :  { %2595 = vrot.lane.b32.xlu2 %v8706_v63, %s8545_s9 }
 0xa9b   :  { %v2091_v13 = vpop.xlane.xlu2 %2090 }
 0xa9c   :  { %v2092_v15 = vsub.f32 %v2087_v50, %v2091_v13 }
 0xa9e   :  { %v2093_v16 = vmul.f32 1.442695, %v2092_v15 }
 0xaa0   :  { %8459 = vpow2.f32 %v2093_v16 }
 0xaa3   :  { %v2444_v31 = vpop.permute.xlu2 %2443 }
 0xaa4   :  { %v2464_v52 = vand.u32 4294901760, %v2444_v31 }
 0xaa6   :  { %v8460_v17 = vpop.eup %8459  ;;  %v2491_v1 = vsub.f32 %v2444_v31, %v2464_v52 }
 0xaa7   :  { %v2095_v18 = vsel %vm272_vm1, %v8460_v17, 0.0 }
 0xaa8   :  { %2096 = vadd.xlane.f32.xlu0 %v2095_v18  ;;  %v2492_v15 = vand.u32 4294901760, %v2491_v1 }
 0xabc   :  { %2267 = vrot.lane.b32.xlu0 %v8706_v63, %s8543_s7 }
 0xb1b   :  { %v2097_v25 = vpop.xlane.xlu0 %2096 }
 0xb1c   :  { %8461 = vrcp.f32 %v2097_v25  ;;  %v2109_v30 = vand.u32 2147483648, %v2097_v25  ;;  %v2107_v34 = vand.u32 2147483647, %v2097_v25  ;;  %vm2103_vm9 = vweird.f32 %v2097_v25 }
 0xb1e   :  { %v2110_v54 = vor.u32 1.1754944e-38, %v2109_v30  ;;  %vm2108_vm11 = vcmp.eq.f32.partialorder %v2107_v34, 8.507059e+37 }
 0xb22   :  { %v8462_v26 = vpop.eup %8461 }
 0xb23   :  { %v2099_v27 = vmul.f32 %v8462_v26, %v2097_v25  ;;  %vm2104_vm8 = vweird.f32 %v8462_v26  ;;  %v2292_v25 = vand.u32 4294901760, %v2291_v3 }
 0xb24   :  { %vm2105_vm10 = vmor %vm2103_vm9, %vm2104_vm8  ;;  %vm2971_vm8 = vcmask 523264  }
 0xb25   :  { %v2100_v29 = vsub.f32 1.0, %v2099_v27  ;;  %v2493_v27 = vsub.f32 %v2491_v1, %v2492_v15  ;;  %v2293_v30 = vsub.f32 %v2291_v3, %v2292_v25 }
 0xb27   :  { %v2101_v32 = vmul.f32 %v8462_v26, %v2100_v29  ;;  %v2494_v34 = vand.u32 4294901760, %v2493_v27  ;;  %v2294_v45 = vand.u32 4294901760, %v2293_v30 }
 0xb29   :  { %v2102_v46 = vadd.f32 %v8462_v26, %v2101_v32 }
 0xb2b   :  { %v2106_v40 = vsel %vm2105_vm10, %v8462_v26, %v2102_v46 }
 0xb2c   :  { %v2111_v43 = vsel %vm2108_vm11, %v2110_v54, %v2106_v40 }
 0xb2d   :  { %v8769_v0 = vmul.f32 %v8460_v17, %v2111_v43 }
 0xb2e   :  { %v2268_v4 = vpop.permute.xlu0 %2267 }
 0xb2f   :  { %9710 = vst [vmem:[#allocation10_spill] sm:$0xff] %v8769_v0  ;;  %v2271_v6 = vsel %vm272_vm1, %v2268_v4, 0  ;;  %v2117_v50 = vsel %vm272_vm1, %v8769_v0, 0 }
 0xb30   :  { %v2288_v5 = vand.u32 4294901760, %v2271_v6  ;;  %v2136_v13 = vand.u32 4294901760, %v2117_v50 }
 0xb32   :  { %v2315_v16 = vsub.f32 %v2271_v6, %v2288_v5  ;;  %2167 = vmatmul.f32.vlgmr.msra.gmra.mxu3 %v2136_v13  ;;  %2289 = vmatpush.xpose.msrb.mxu0 %v2288_v5  ;;  %v2137_v18 = vsub.f32 %v2117_v50, %v2136_v13 }
 0xb33   :  { %2365 = vmatpush.xpose.msra.mxu3 %v2288_v5 }
 0xb34   :  { %v2316_v26 = vand.u32 4294901760, %v2315_v16  ;;  %2191 = vmatmul.f32.vlgmr.msra.gmra.mxu0 %v2137_v18  ;;  %v2138_v17 = vand.u32 4294901760, %v2137_v18 }
 0xb36   :  { %v2317_v28 = vsub.f32 %v2315_v16, %v2316_v26  ;;  %2215 = vmatmul.f32.vlgmr.msra.gmra.mxu1 %v2138_v17  ;;  %2391 = vmatpush.xpose.msra.mxu0 %v2316_v26  ;;  %v2139_v29 = vsub.f32 %v2137_v18, %v2138_v17 }
 0xb38   :  { %v2318_v31 = vand.u32 4294901760, %v2317_v28  ;;  %v2140_v32 = vand.u32 4294901760, %v2139_v29  ;;  %v1163_v29 = vadd.f32 %v8687_v36, %v8691_v39 }
 0xb3a   :  { %2141 = vmatmul.f32.vlgmr.msra.gmra.mxu2 %v2140_v32  ;;  %2261 = vmatmul.f32.vlgmr.msrb.gmra.mxu3 %v2136_v13 }
 0xb3b   :  { %2319 = vmatpush.xpose.msrb.mxu1 %v2318_v31  ;;  %2342 = vmatpush.xpose.msra.mxu2 %v2315_v16  ;;  %v1187_v31 = vadd.f32 %v8689_v37, %v1163_v29 }
 0xb3c   :  { %2495 = vmatpush.msrb.mxu3 %v2494_v34  ;;  %2295 = vmatmul.f32.vlgmr.msrb.gmra.mxu0 %v2294_v45 }
 0xb3d   :  { %2518 = vmatpush.msrb.mxu0 %v2491_v1  ;;  %v1211_v34 = vadd.f32 %v8693_v41, %v1187_v31 }
 0xb3e   :  { %2321 = vmatmul.f32.vlgmr.msrb.gmra.mxu1 %v2290_v2 }
 0xb3f   :  { %2413 = vmatpush.xpose.msra.mxu1 %v2288_v5 }
 0xb42   :  { %2239 = vmatmul.f32.vlgmr.msrb.gmra.mxu2 %v2136_v13  ;;  %2369 = vmatmul.f32.vlgmr.msra.gmra.mxu3 %v2292_v25 }
 0xb43   :  { %2541 = vmatpush.msrb.mxu1 %v2464_v52  ;;  %2465 = vmatpush.msrb.mxu2 %v2464_v52 }
 0xb44   :  { %2589 = vmatpush.msra.mxu3 %v2464_v52  ;;  %2393 = vmatmul.f32.vlgmr.msra.gmra.mxu0 %v2290_v2 }
 0xb46   :  { %2415 = vmatmul.f32.vlgmr.msra.gmra.mxu1 %v2290_v2 }
 0xb4a   :  { %2345 = vmatmul.f32.vlgmr.msra.gmra.mxu2 %v2291_v3  ;;  %v833_v3 = vadd.f32 %v8663_v19, %v8667_v21  ;;  %v1235_v19 = vadd.f32 %v8697_v44, %v1211_v34 }
 0xb4b   :  { %2567 = vmatpush.msra.mxu2 %v2492_v15 }
 0xb4c   :  { %v857_v15 = vadd.f32 %v8665_v20, %v833_v3  ;;  %v1257_v21 = vadd.f32 %v8695_v42, %v1235_v19 }
 0xb4e   :  { %v881_v28 = vadd.f32 %v8669_v22, %v857_v15 }
 0xb50   :  { %v905_v30 = vadd.f32 %v8673_v24, %v881_v28 }
 0xb52   :  { %v927_v32 = vadd.f32 %v8671_v23, %v905_v30 }
 0xbb1   :  { %v2192_v54 = vpop.f32.mrf.mxu0 }
 0xbb3   :  { %v2216_v43 = vpop.f32.mrf.mxu1 }
 0xbb5   :  { %v2168_v46 = vpop.f32.mrf.mxu3 }
 0xbb9   :  { %v2296_v50 = vpop.f32.mrf.mxu0 }
 0xbbb   :  { %v2322_v5 = vpop.f32.mrf.mxu1 }
 0xbbc   :  { %v2323_v16 = vadd.f32 %v2322_v5, %v2296_v50 }
 0xbbd   :  { %v2142_v40 = vpop.f32.mrf.mxu2  ;;  %v2262_v4 = vpop.f32.mrf.mxu3 }
 0xbbe   :  { %v2169_v45 = vadd.f32 %v2168_v46, %v2142_v40 }
 0xbc0   :  { %v2193_v20 = vadd.f32 %v2192_v54, %v2169_v45 }
 0xbc1   :  { %v2394_v25 = vpop.f32.mrf.mxu0 }
 0xbc2   :  { %v2217_v22 = vadd.f32 %v2216_v43, %v2193_v20 }
 0xbc3   :  { %v2416_v52 = vpop.f32.mrf.mxu1 }
 0xbc5   :  { %v2240_v6 = vpop.f32.mrf.mxu2  ;;  %v2370_v26 = vpop.f32.mrf.mxu3 }
 0xbc6   :  { %v2241_v24 = vadd.f32 %v2240_v6, %v2217_v22 }
 0xbc8   :  { %v2263_v36 = vadd.f32 %v2262_v4, %v2241_v24 }
 0xbcd   :  { %v2346_v1 = vpop.f32.mrf.mxu2 }
 0xbce   :  { %v2347_v18 = vadd.f32 %v2346_v1, %v2323_v16  ;;  %v2596_v1 = vpop.permute.xlu2 %2595 }
 0xbd0   :  { %v2371_v13 = vadd.f32 %v2370_v26, %v2347_v18 }
 0xbd2   :  { %v2395_v17 = vadd.f32 %v2394_v25, %v2371_v13  ;;  %v2599_v13 = vsel %vm272_vm1, %v2596_v1, 0 }
 0xbd4   :  { %v2417_v27 = vadd.f32 %v2416_v52, %v2395_v17 }
 0xbd6   :  { %v2419_v2 = vsel %vm272_vm1, %v2417_v27, -inf }
 0xbd7   :  { %2420 = vmax.xlane.f32.xlu1 %v2419_v2 }
 0xbf0   :  { %2597 = vrot.lane.b32.xlu1 %v8706_v63, %s8546_s10 }
 0xbf8   :  { %1590 = vrot.lane.b32.xlu1 %v927_v32, %s8548_s12 }
 0xc00   :  { %1594 = vrot.lane.b32.xlu1 %v1257_v21, %s8549_s13 }
 0xc08   :  { %2926 = vrot.lane.b32.xlu1 %v2263_v36, %s8548_s12 }
 0xc4a   :  { %v2421_v23 = vpop.xlane.xlu1 %2420 }
 0xc4b   :  { %v2422_v37 = vsub.f32 %v2417_v27, %v2421_v23  ;;  %v2620_v27 = vand.u32 4294901760, %v2599_v13 }
 0xc4d   :  { %v2423_v39 = vmul.f32 1.442695, %v2422_v37  ;;  %v2621_v29 = vsub.f32 %v2599_v13, %v2620_v27 }
 0xc4f   :  { %8463 = vpow2.f32 %v2423_v39  ;;  %v2622_v32 = vand.u32 4294901760, %v2621_v29 }
 0xc51   :  { %v2623_v19 = vsub.f32 %v2621_v29, %v2622_v32 }
 0xc53   :  { %v2624_v22 = vand.u32 4294901760, %v2623_v19 }
 0xc55   :  { %v8464_v41 = vpop.eup %8463 }
 0xc56   :  { %v2425_v46 = vsel %vm272_vm1, %v8464_v41, 0.0 }
 0xc57   :  { %2426 = vadd.xlane.f32.xlu0 %v2425_v46 }
 0xc62   :  { %v2598_v44 = vpop.permute.xlu1 %2597 }
 0xc63   :  { %v2601_v54 = vsel %vm272_vm1, %v2598_v44, 0 }
 0xc64   :  { %v2618_v42 = vand.u32 4294901760, %v2601_v54 }
 0xc66   :  { %v2645_v40 = vsub.f32 %v2601_v54, %v2618_v42  ;;  %2619 = vmatpush.xpose.msra.mxu0 %v2618_v42 }
 0xc68   :  { %v2646_v43 = vand.u32 4294901760, %v2645_v40 }
 0xc6a   :  { %v2647_v50 = vsub.f32 %v2645_v40, %v2646_v43 }
 0xc6c   :  { %v2648_v6 = vand.u32 4294901760, %v2647_v50 }
 0xc6e   :  { %2649 = vmatpush.xpose.msra.mxu1 %v2648_v6 }
 0xcca   :  { %v2427_v4 = vpop.xlane.xlu0 %2426 }
 0xccb   :  { %8465 = vrcp.f32 %v2427_v4  ;;  %v2439_v26 = vand.u32 2147483648, %v2427_v4  ;;  %v2437_v17 = vand.u32 2147483647, %v2427_v4  ;;  %vm2433_vm13 = vweird.f32 %v2427_v4 }
 0xccd   :  { %v2440_v2 = vor.u32 1.1754944e-38, %v2439_v26  ;;  %vm2438_vm15 = vcmp.eq.f32.partialorder %v2437_v17, 8.507059e+37 }
 0xcd1   :  { %v8466_v5 = vpop.eup %8465 }
 0xcd2   :  { %v2429_v16 = vmul.f32 %v8466_v5, %v2427_v4  ;;  %vm2434_vm12 = vweird.f32 %v8466_v5 }
 0xcd3   :  { %vm2435_vm14 = vmor %vm2433_vm13, %vm2434_vm12 }
 0xcd4   :  { %v2430_v18 = vsub.f32 1.0, %v2429_v16 }
 0xcd6   :  { %v2431_v25 = vmul.f32 %v8466_v5, %v2430_v18 }
 0xcd8   :  { %v2432_v52 = vadd.f32 %v8466_v5, %v2431_v25 }
 0xcda   :  { %v2436_v3 = vsel %vm2435_vm14, %v8466_v5, %v2432_v52  ;;  %v1493_v52 = vadd.f32 %v8722_v56, %v8726_v58 }
 0xcdb   :  { %v2441_v15 = vsel %vm2438_vm15, %v2440_v2, %v2436_v3 }
 0xcdc   :  { %v8795_v28 = vmul.f32 %v8464_v41, %v2441_v15 }
 0xcde   :  { %9711 = vst [vmem:[#allocation11_spill] sm:$0xff] %v8795_v28  ;;  %v2447_v30 = vsel %vm272_vm1, %v8795_v28, 0 }
 0xcdf   :  { %v2466_v31 = vand.u32 4294901760, %v2447_v30 }
 0xce1   :  { %2497 = vmatmul.f32.vlgmr.msrb.gmra.mxu3 %v2466_v31  ;;  %v2467_v34 = vsub.f32 %v2447_v30, %v2466_v31 }
 0xce2   :  { %2695 = vmatpush.xpose.msrb.mxu3 %v2618_v42 }
 0xce3   :  { %2521 = vmatmul.f32.vlgmr.msrb.gmra.mxu0 %v2467_v34  ;;  %v2468_v45 = vand.u32 4294901760, %v2467_v34 }
 0xce4   :  { %2721 = vmatpush.xpose.msrb.mxu0 %v2646_v43 }
 0xce5   :  { %2545 = vmatmul.f32.vlgmr.msrb.gmra.mxu1 %v2468_v45  ;;  %v2469_v20 = vsub.f32 %v2467_v34, %v2468_v45  ;;  %v503_v45 = vadd.f32 %v8643_v11, %v8637_v8 }
 0xce6   :  { %2743 = vmatpush.xpose.msrb.mxu1 %v2618_v42 }
 0xce7   :  { %v2470_v21 = vand.u32 4294901760, %v2469_v20  ;;  %v28_v20 = vld [vmem:[%s9687_s2 + $0x20] sm:$0xff] }
 0xce9   :  { %2471 = vmatmul.f32.vlgmr.msrb.gmra.mxu2 %v2470_v21  ;;  %2591 = vmatmul.f32.vlgmr.msra.gmra.mxu3 %v2466_v31 }
 0xcea   :  { %2672 = vmatpush.xpose.msrb.mxu2 %v2645_v40 }
 0xceb   :  { %2625 = vmatmul.f32.vlgmr.msra.gmra.mxu0 %v2624_v22 }
 0xced   :  { %2651 = vmatmul.f32.vlgmr.msra.gmra.mxu1 %v2620_v27 }
 0xcf1   :  { %2569 = vmatmul.f32.vlgmr.msra.gmra.mxu2 %v2466_v31  ;;  %2699 = vmatmul.f32.vlgmr.msrb.gmra.mxu3 %v2622_v32 }
 0xcf3   :  { %2723 = vmatmul.f32.vlgmr.msrb.gmra.mxu0 %v2620_v27 }
 0xcf5   :  { %2745 = vmatmul.f32.vlgmr.msrb.gmra.mxu1 %v2620_v27  ;;  %v1517_v27 = vadd.f32 %v8724_v57, %v1493_v52  ;;  %v31_v57 = vld [vmem:[%s9687_s2 + $0x38] sm:$0xff] }
 0xcf6   :  { %v8817_v58 = vand.u32 4294901760, %v31_v57 }
 0xcf7   :  { %v1541_v2 = vadd.f32 %v8728_v60, %v1517_v27 }
 0xcf8   :  { %v8827_v19 = vsub.f32 %v31_v57, %v8817_v58 }
 0xcf9   :  { %2675 = vmatmul.f32.vlgmr.msrb.gmra.mxu2 %v2621_v29  ;;  %v1565_v15 = vadd.f32 %v8732_v62, %v1541_v2 }
 0xcfa   :  { %v3030_v8 = vand.u32 4294901760, %v8827_v19 }
 0xcfb   :  { %v1587_v30 = vadd.f32 %v8730_v61, %v1565_v15  ;;  %v29_v61 = vld [vmem:[%s9687_s2 + $0x28] sm:$0xff] }
 0xcfc   :  { %v8832_v22 = vand.u32 4294901760, %v29_v61 }
 0xd60   :  { %v2522_v36 = vpop.f32.mrf.mxu0 }
 0xd62   :  { %v2546_v37 = vpop.f32.mrf.mxu1 }
 0xd64   :  { %v2498_v24 = vpop.f32.mrf.mxu3 }
 0xd68   :  { %v2626_v46 = vpop.f32.mrf.mxu0 }
 0xd6a   :  { %v2652_v44 = vpop.f32.mrf.mxu1 }
 0xd6b   :  { %v2653_v54 = vadd.f32 %v2652_v44, %v2626_v46  ;;  %v8842_v46 = vsub.f32 %v29_v61, %v8832_v22 }
 0xd6c   :  { %v2472_v23 = vpop.f32.mrf.mxu2  ;;  %v2592_v39 = vpop.f32.mrf.mxu3 }
 0xd6d   :  { %v2499_v3 = vadd.f32 %v2498_v24, %v2472_v23  ;;  %v8837_v23 = vand.u32 4294901760, %v28_v20 }
 0xd6f   :  { %v2523_v29 = vadd.f32 %v2522_v36, %v2499_v3 }
 0xd70   :  { %v2724_v6 = vpop.f32.mrf.mxu0 }
 0xd71   :  { %v2547_v31 = vadd.f32 %v2546_v37, %v2523_v29  ;;  %v527_v37 = vadd.f32 %v8639_v9, %v503_v45  ;;  %v3031_v9 = vsub.f32 %v8827_v19, %v3030_v8 }
 0xd72   :  { %v2746_v5 = vpop.f32.mrf.mxu1 }
 0xd74   :  { %v2570_v41 = vpop.f32.mrf.mxu2  ;;  %v2700_v50 = vpop.f32.mrf.mxu3 }
 0xd75   :  { %v2571_v32 = vadd.f32 %v2570_v41, %v2547_v31 }
 0xd77   :  { %v2593_v34 = vadd.f32 %v2592_v39, %v2571_v32 }
 0xd7c   :  { %v2676_v42 = vpop.f32.mrf.mxu2 }
 0xd7d   :  { %v2677_v43 = vadd.f32 %v2676_v42, %v2653_v54  ;;  %v1591_v54 = vpop.permute.xlu1 %1590 }
 0xd7f   :  { %v2701_v40 = vadd.f32 %v2700_v50, %v2677_v43  ;;  %v8846_v43 = vsub.f32 %v28_v20, %v8837_v23 }
 0xd81   :  { %v2725_v4 = vadd.f32 %v2724_v6, %v2701_v40  ;;  %v551_v40 = vadd.f32 %v8641_v10, %v527_v37 }
 0xd83   :  { %v2747_v16 = vadd.f32 %v2746_v5, %v2725_v4  ;;  %v3042_v4 = vand.u32 4294901760, %v8842_v46 }
 0xd85   :  { %v2749_v1 = vsel %vm272_vm1, %v2747_v16, -inf  ;;  %v3043_v27 = vsub.f32 %v8842_v46, %v3042_v4 }
 0xd86   :  { %2750 = vmax.xlane.f32.xlu2 %v2749_v1 }
 0xd87   :  { %v3044_v32 = vand.u32 4294901760, %v3043_v27 }
 0xdf9   :  { %v2751_v18 = vpop.xlane.xlu2 %2750 }
 0xdfa   :  { %v2752_v26 = vsub.f32 %v2747_v16, %v2751_v18  ;;  %v3048_v18 = vand.u32 4294901760, %v8846_v43 }
 0xdfc   :  { %v2753_v13 = vmul.f32 1.442695, %v2752_v26 }
 0xdfe   :  { %8467 = vpow2.f32 %v2753_v13  ;;  %v3032_v13 = vand.u32 4294901760, %v3031_v9 }
 0xe04   :  { %v8468_v25 = vpop.eup %8467 }
 0xe05   :  { %v2755_v17 = vsel %vm272_vm1, %v8468_v25, 0.0 }
 0xe06   :  { %2756 = vadd.xlane.f32.xlu0 %v2755_v17  ;;  %v575_v17 = vadd.f32 %v8645_v12, %v551_v40 }
 0xe08   :  { %v597_v12 = vadd.f32 %v8647_v14, %v575_v17 }
 0xe1a   :  { %2773 = vrot.lane.b32.xlu0 %v8706_v63, %s8547_s11  ;;  %v30_v63 = vld [vmem:[%s9687_s2 + $0x30] sm:$0xff] }
 0xe1b   :  { %v8819_v60 = vand.u32 4294901760, %v30_v63 }
 0xe1d   :  { %v8835_v24 = vsub.f32 %v30_v63, %v8819_v60 }
 0xe1f   :  { %v3036_v44 = vand.u32 4294901760, %v8835_v24 }
 0xe21   :  { %v3037_v16 = vsub.f32 %v8835_v24, %v3036_v44 }
 0xe22   :  { %1598 = vrot.lane.b32.xlu0 %v1587_v30, %s8550_s14  ;;  %v1595_v30 = vpop.permute.xlu1 %1594 }
 0xe23   :  { %v3038_v3 = vand.u32 4294901760, %v3037_v16 }
 0xe2a   :  { %2930 = vrot.lane.b32.xlu0 %v2593_v34, %s8549_s13 }
 0xe79   :  { %v2757_v56 = vpop.xlane.xlu0 %2756 }
 0xe7a   :  { %8469 = vrcp.f32 %v2757_v56  ;;  %v2769_v39 = vand.u32 2147483648, %v2757_v56  ;;  %v2767_v41 = vand.u32 2147483647, %v2757_v56  ;;  %vm2763_vm3 = vweird.f32 %v2757_v56 }
 0xe7c   :  { %v2770_v50 = vor.u32 1.1754944e-38, %v2769_v39  ;;  %vm2768_vm5 = vcmp.eq.f32.partialorder %v2767_v41, 8.507059e+37 }
 0xe80   :  { %v8470_v62 = vpop.eup %8469 }
 0xe81   :  { %v2759_v21 = vmul.f32 %v8470_v62, %v2757_v56  ;;  %vm2764_vm2 = vweird.f32 %v8470_v62  ;;  %v1601_v56 = vsel %vm272_vm1, %v597_v12, %v1591_v54 }
 0xe82   :  { %vm2765_vm4 = vmor %vm2763_vm3, %vm2764_vm2  ;;  %v1603_v61 = vsel %vm1602_vm6, %v1601_v56, %v1595_v30 }
 0xe83   :  { %v2760_v36 = vsub.f32 1.0, %v2759_v21 }
 0xe85   :  { %v2761_v11 = vmul.f32 %v8470_v62, %v2760_v36 }
 0xe87   :  { %v2762_v42 = vadd.f32 %v8470_v62, %v2761_v11 }
 0xe89   :  { %v2766_v6 = vsel %vm2765_vm4, %v8470_v62, %v2762_v42 }
 0xe8a   :  { %v2771_v5 = vsel %vm2768_vm5, %v2770_v50, %v2766_v6  ;;  %v2927_v6 = vpop.permute.xlu1 %2926 }
 0xe8b   :  { %v8856_v1 = vmul.f32 %v8468_v25, %v2771_v5  ;;  %v3049_v25 = vsub.f32 %v8846_v43, %v3048_v18 }
 0xe8c   :  { %v2774_v26 = vpop.permute.xlu0 %2773 }
 0xe8d   :  { %9712 = vst [vmem:[#allocation12_spill] sm:$0xff] %v8856_v1  ;;  %v2794_v52 = vand.u32 4294901760, %v2774_v26  ;;  %v2777_v10 = vsel %vm272_vm1, %v8856_v1, 0  ;;  %v3050_v63 = vand.u32 4294901760, %v3049_v25  ;;  %v19_v25 = vld [vmem:[%s9686_s1] sm:$0xff] }
 0xe8e   :  { %v2796_v2 = vand.u32 4294901760, %v2777_v10  ;;  %v3198_v12 = vsel %vm1602_vm6, %v19_v25, 0 }
 0xe8f   :  { %v2821_v15 = vsub.f32 %v2774_v26, %v2794_v52  ;;  %2795 = vmatpush.msra.mxu2 %v2794_v52  ;;  %2871 = vmatpush.msra.mxu1 %v2794_v52 }
 0xe90   :  { %v2797_v29 = vsub.f32 %v2777_v10, %v2796_v2 }
 0xe91   :  { %3033 = vmatpush.msrb.mxu1 %v3032_v13  ;;  %v2822_v31 = vand.u32 4294901760, %v2821_v15  ;;  %2848 = vmatpush.msra.mxu0 %v2821_v15 }
 0xe92   :  { %2851 = vmatmul.f32.vlgmr.msra.gmra.mxu0 %v2797_v29  ;;  %v2798_v34 = vand.u32 4294901760, %v2797_v29 }
 0xe93   :  { %3039 = vmatpush.msrb.mxu1 %v3038_v3  ;;  %v2823_v57 = vsub.f32 %v2821_v15, %v2822_v31  ;;  %2897 = vmatpush.msrb.mxu2 %v2822_v31 }
 0xe94   :  { %2992 = vmatpush.msrb.mxu0 %v8817_v58  ;;  %2875 = vmatmul.f32.vlgmr.msra.gmra.mxu1 %v2798_v34  ;;  %v1599_v14 = vpop.permute.xlu0 %1598  ;;  %v2799_v62 = vsub.f32 %v2797_v29, %v2798_v34 }
 0xe95   :  { %v2824_v45 = vand.u32 4294901760, %v2823_v57  ;;  %v1605_v20 = vsel %vm1604_vm7, %v1603_v61, %v1599_v14  ;;  %3045 = vmatpush.msrb.mxu1 %v3044_v32  ;;  %v8918_v57 = vand.u32 4294901760, %v3198_v12  ;;  %v20_v14 = vld [vmem:[%s9686_s1 + $0x8] sm:$0xff] }
 0xe96   :  { %2994 = vmatpush.msrb.mxu0 %v8819_v60  ;;  %v2974_v21 = vsel %vm46_vm0, %v1605_v20, 0  ;;  %v2800_v36 = vand.u32 4294901760, %v2799_v62 }
 0xe97   :  { %v8875_v37 = vand.u32 4294901760, %v2974_v21  ;;  %2825 = vmatpush.msra.mxu3 %v2824_v45  ;;  %3051 = vmatpush.msrb.mxu1 %v3050_v63  ;;  %v8924_v20 = vsub.f32 %v3198_v12, %v8918_v57 }
 0xe98   :  { %2801 = vmatmul.f32.vlgmr.msra.gmra.mxu2 %v2800_v36  ;;  %2827 = vmatmul.f32.vlgmr.msra.gmra.mxu3 %v2796_v2 }
 0xe99   :  { %v3000_v39 = vsub.f32 %v2974_v21, %v8875_v37  ;;  %2919 = vmatpush.msrb.mxu3 %v2794_v52  ;;  %2996 = vmatpush.msrb.mxu0 %v8832_v22  ;;  %v8509_v21 = vld [vmem:[%s9685_s0] sm:$0xff] }
 0xe9a   :  { %3075 = vmatpush.msra.mxu2 %v8827_v19  ;;  %3179 = vmatpush.msra.mxu1 %v8817_v58 }
 0xe9b   :  { %3109 = vmatpush.msra.mxu3 %v8817_v58  ;;  %v3001_v11 = vand.u32 4294901760, %v3000_v39  ;;  %2998 = vmatpush.msrb.mxu0 %v8837_v23 }
 0xe9c   :  { %3053 = vmatmul.f32.vlgmr.msrb.gmra.mxu1 %v8875_v37  ;;  %3078 = vmatpush.msra.mxu2 %v8835_v24  ;;  %v2931_v16 = vpop.permute.xlu0 %2930 }
 0xe9d   :  { %v3002_v41 = vsub.f32 %v3000_v39, %v3001_v11  ;;  %3111 = vmatpush.msra.mxu3 %v8819_v60  ;;  %3181 = vmatpush.msra.mxu1 %v8819_v60 }
 0xe9e   :  { %3081 = vmatpush.msra.mxu2 %v8842_v46  ;;  %3144 = vmatpush.msra.mxu0 %v3030_v8  ;;  %v1839_v46 = vadd.f32 %v8754_v33, %v8748_v47 }
 0xe9f   :  { %v3003_v54 = vand.u32 4294901760, %v3002_v41  ;;  %3113 = vmatpush.msra.mxu3 %v8832_v22  ;;  %3183 = vmatpush.msra.mxu1 %v8832_v22 }
 0xea0   :  { %2899 = vmatmul.f32.vlgmr.msrb.gmra.mxu2 %v2796_v2  ;;  %2921 = vmatmul.f32.vlgmr.msrb.gmra.mxu3 %v2796_v2 }
 0xea1   :  { %3004 = vmatmul.f32.vlgmr.msrb.gmra.mxu0 %v3003_v54  ;;  %3084 = vmatpush.msra.mxu2 %v8846_v43  ;;  %v8931_v54 = vand.u32 4294901760, %v8924_v20 }
 0xea2   :  { %3115 = vmatpush.msra.mxu3 %v8837_v23  ;;  %3185 = vmatpush.msra.mxu1 %v8837_v23 }
 0xea3   :  { %3148 = vmatpush.msra.mxu0 %v3036_v44  ;;  %v1863_v44 = vadd.f32 %v8750_v48, %v1839_v46 }
 0xea5   :  { %3152 = vmatpush.msra.mxu0 %v3042_v4  ;;  %v1887_v43 = vadd.f32 %v8752_v49, %v1863_v44 }
 0xea7   :  { %3156 = vmatpush.msra.mxu0 %v3048_v18  ;;  %v1911_v4 = vadd.f32 %v8756_v51, %v1887_v43 }
 0xea8   :  { %3087 = vmatmul.f32.vlgmr.msra.gmra.mxu2 %v3000_v39  ;;  %3119 = vmatmul.f32.vlgmr.msra.gmra.mxu3 %v3001_v11 }
 0xea9   :  { %v1933_v5 = vadd.f32 %v8758_v53, %v1911_v4 }
 0xeab   :  { %v2937_v18 = vsel %vm272_vm1, %v1933_v5, %v2927_v6 }
 0xeac   :  { %v2938_v26 = vsel %vm1602_vm6, %v2937_v18, %v2931_v16 }
 0xf0f   :  { %v2852_v22 = vpop.f32.mrf.mxu0 }
 0xf11   :  { %v2876_v42 = vpop.f32.mrf.mxu1 }
 0xf19   :  { %v3054_v53 = vpop.f32.mrf.mxu1 }
 0xf1b   :  { %v2802_v58 = vpop.f32.mrf.mxu2  ;;  %v2828_v60 = vpop.f32.mrf.mxu3 }
 0xf1c   :  { %v2829_v19 = vadd.f32 %v2828_v60, %v2802_v58 }
 0xf1e   :  { %v2853_v8 = vadd.f32 %v2852_v22, %v2829_v19  ;;  %v3005_v10 = vpop.f32.mrf.mxu0 }
 0xf1f   :  { %v3055_v15 = vadd.f32 %v3054_v53, %v3005_v10 }
 0xf20   :  { %v2877_v50 = vadd.f32 %v2876_v42, %v2853_v8  ;;  %v3224_v42 = vsub.f32 %v8924_v20, %v8931_v54 }
 0xf22   :  { %v8943_v46 = vand.u32 4294901760, %v3224_v42 }
 0xf23   :  { %v2900_v9 = vpop.f32.mrf.mxu2  ;;  %v2922_v40 = vpop.f32.mrf.mxu3 }
 0xf24   :  { %v2901_v23 = vadd.f32 %v2900_v9, %v2877_v50  ;;  %v8510_v9 = vld [vmem:[%s9685_s0 + $0x8] sm:$0xff] }
 0xf26   :  { %v2923_v24 = vadd.f32 %v2922_v40, %v2901_v23 }
 0xf28   :  { %2934 = vrot.lane.b32.xlu1 %v2923_v24, %s8550_s14 }
 0xf2b   :  { %v3088_v2 = vpop.f32.mrf.mxu2  ;;  %v3120_v30 = vpop.f32.mrf.mxu3 }
 0xf2c   :  { %v3089_v29 = vadd.f32 %v3088_v2, %v3055_v15  ;;  %v32_v2 = vld [vmem:[%s9687_s2 + $0x40] sm:$0xff] }
 0xf2e   :  { %v3121_v31 = vadd.f32 %v3120_v30, %v3089_v29  ;;  %v3418_v29 = vand.u32 4294901760, %v32_v2 }
 0xf9a   :  { %v2935_v13 = vpop.permute.xlu1 %2934 }
 0xf9b   :  { %v2939_v17 = vsel %vm1604_vm7, %v2938_v26, %v2935_v13 }
 0xf9c   :  { %v2977_v52 = vsel %vm46_vm0, %v2939_v17, 0 }
 0xf9d   :  { %v3007_v47 = vand.u32 4294901760, %v2977_v52 }
 0xf9f   :  { %v3008_v33 = vsub.f32 %v2977_v52, %v3007_v47  ;;  %3057 = vmatmul.f32.gmra.mxu1 %v3007_v47  ;;  %v35_v52 = vld [vmem:[%s9687_s2 + $0x58] sm:$0xff] }
 0xfa1   :  { %3092 = vmatmul.f32.gmra.mxu2 %v3008_v33  ;;  %v3009_v48 = vand.u32 4294901760, %v3008_v33 }
 0xfa3   :  { %3125 = vmatmul.f32.gmra.mxu3 %v3009_v48  ;;  %v3010_v49 = vsub.f32 %v3008_v33, %v3009_v48  ;;  %v34_v33 = vld [vmem:[%s9687_s2 + $0x50] sm:$0xff] }
 0xfa5   :  { %v3011_v51 = vand.u32 4294901760, %v3010_v49  ;;  %v3414_v49 = vand.u32 4294901760, %v34_v33 }
 0xfa7   :  { %3012 = vmatmul.f32.gmra.mxu0 %v3011_v51  ;;  %3187 = vmatmul.f32.vlgmr.msra.gmra.mxu1 %v8875_v37  ;;  %v33_v51 = vld [vmem:[%s9687_s2 + $0x48] sm:$0xff]  ;;  %v3456_v10 = vsub.f32 %v34_v33, %v3414_v49 }
 0xfa9   :  { %v3457_v15 = vand.u32 4294901760, %v3456_v10 }
 0xfab   :  { %v3458_v30 = vsub.f32 %v3456_v10, %v3457_v15 }
 0xfaf   :  { %3158 = vmatmul.f32.vlgmr.msra.gmra.mxu0 %v8875_v37  ;;  %3191 = vmatmul.f32.gmra.mxu1 %v3007_v47  ;;  %v3201_v37 = vsel %vm1602_vm6, %v20_v14, 0 }
 0xfb0   :  { %v8933_v58 = vand.u32 4294901760, %v3201_v37 }
 0xfb2   :  { %v8938_v50 = vsub.f32 %v3201_v37, %v8933_v58 }
 0xfb4   :  { %v8946_v44 = vand.u32 4294901760, %v8938_v50 }
 0xfb6   :  { %v3232_v5 = vsub.f32 %v8938_v50, %v8946_v44 }
 0xfb7   :  { %3162 = vmatmul.f32.gmra.mxu0 %v3007_v47  ;;  %v3412_v47 = vand.u32 4294901760, %v35_v52 }
 0xfb8   :  { %v8953_v13 = vand.u32 4294901760, %v3232_v5 }
 0xfb9   :  { %v3450_v48 = vsub.f32 %v35_v52, %v3412_v47 }
 0xfbb   :  { %v3451_v53 = vand.u32 4294901760, %v3450_v48 }
0x101c   :  { %v3058_v27 = vpop.f32.mrf.mxu1 }
0x1024   :  { %v3013_v3 = vpop.f32.mrf.mxu0  ;;  %v3188_v34 = vpop.f32.mrf.mxu1 }
0x1025   :  { %v3059_v32 = vadd.f32 %v3058_v27, %v3013_v3  ;;  %v3093_v61 = vpop.f32.mrf.mxu2  ;;  %v3416_v27 = vand.u32 4294901760, %v33_v51  ;;  %v3452_v3 = vsub.f32 %v3450_v48, %v3451_v53 }
0x1026   :  { %v3126_v39 = vpop.f32.mrf.mxu3 }
0x1027   :  { %v3094_v62 = vadd.f32 %v3093_v61, %v3059_v32  ;;  %v3462_v25 = vsub.f32 %v33_v51, %v3416_v27  ;;  %v3453_v12 = vand.u32 4294901760, %v3452_v3  ;;  %v3468_v32 = vsub.f32 %v32_v2, %v3418_v29  ;;  %v44_v3 = vld [vmem:[%s9687_s2 + $0x99] sm:$0xff] }
0x1029   :  { %v3127_v11 = vadd.f32 %v3126_v39, %v3094_v62 }
0x102c   :  { %v3159_v56 = vpop.f32.mrf.mxu0  ;;  %v3192_v22 = vpop.f32.mrf.mxu1 }
0x102d   :  { %v3160_v63 = vadd.f32 %v3159_v56, %v3121_v31  ;;  %v3463_v31 = vand.u32 4294901760, %v3462_v25 }
0x102f   :  { %v3189_v45 = vadd.f32 %v3188_v34, %v3160_v63  ;;  %v3459_v34 = vand.u32 4294901760, %v3458_v30  ;;  %v3464_v56 = vsub.f32 %v3462_v25, %v3463_v31  ;;  %v3469_v63 = vand.u32 4294901760, %v3468_v32  ;;  %v42_v30 = vld [vmem:[%s9687_s2 + $0x89] sm:$0xff] }
0x1031   :  { %v3195_v36 = vadd.f32 %v8509_v21, %v3189_v45  ;;  %v3465_v61 = vand.u32 4294901760, %v3464_v56  ;;  %v3470_v14 = vsub.f32 %v3468_v32, %v3469_v63  ;;  %v41_v56 = vld [vmem:[%s9687_s2 + $0x81] sm:$0xff] }
0x1033   :  { %v3219_v19 = vand.u32 4294901760, %v3195_v36  ;;  %v3471_v62 = vand.u32 4294901760, %v3470_v14 }
0x1034   :  { %v3163_v41 = vpop.f32.mrf.mxu0 }
0x1035   :  { %v3164_v60 = vadd.f32 %v3163_v41, %v3127_v11  ;;  %v3259_v40 = vsub.f32 %v3195_v36, %v3219_v19 }
0x1037   :  { %v3193_v8 = vadd.f32 %v3192_v22, %v3164_v60  ;;  %v3260_v6 = vand.u32 4294901760, %v3259_v40 }
0x1039   :  { %v3196_v23 = vadd.f32 %v8510_v9, %v3193_v8  ;;  %v3261_v18 = vsub.f32 %v3259_v40, %v3260_v6 }
0x103b   :  { %v3217_v24 = vand.u32 4294901760, %v3196_v23  ;;  %v3262_v17 = vand.u32 4294901760, %v3261_v18 }
0x103d   :  { %3218 = vmatpush.msrb.mxu2 %v3217_v24  ;;  %3319 = vmatpush.msrb.mxu1 %v3217_v24  ;;  %v3253_v43 = vsub.f32 %v3196_v23, %v3217_v24 }
0x103f   :  { %3220 = vmatpush.msrb.mxu2 %v3219_v19  ;;  %3289 = vmatpush.msrb.mxu0 %v3253_v43  ;;  %v3254_v4 = vand.u32 4294901760, %v3253_v43 }
0x1040   :  { %3321 = vmatpush.msrb.mxu1 %v3219_v19  ;;  %3226 = vmatmul.f32.vlgmr.msrb.gmra.mxu2 %v8943_v46 }
0x1041   :  { %3292 = vmatpush.msrb.mxu0 %v3259_v40  ;;  %3352 = vmatpush.msra.mxu2 %v3254_v4  ;;  %v3255_v16 = vsub.f32 %v3253_v43, %v3254_v4 }
0x1042   :  { %3295 = vmatmul.f32.vlgmr.msrb.gmra.mxu0 %v8924_v20  ;;  %3325 = vmatmul.f32.vlgmr.msrb.gmra.mxu1 %v8931_v54 }
0x1043   :  { %3356 = vmatpush.msra.mxu2 %v3260_v6  ;;  %v3256_v26 = vand.u32 4294901760, %v3255_v16  ;;  %3413 = vmatpush.msra.mxu0 %v3412_v47 }
0x1044   :  { %3454 = vmatpush.msra.mxu1 %v3453_v12 }
0x1045   :  { %3257 = vmatpush.msrb.mxu3 %v3256_v26  ;;  %3496 = vmatpush.msrb.mxu2 %v3450_v48 }
0x1046   :  { %3415 = vmatpush.msra.mxu0 %v3414_v49  ;;  %3460 = vmatpush.msra.mxu1 %v3459_v34  ;;  %v9007_v34 = vand.u32 4294901760, %v42_v30 }
0x1047   :  { %3263 = vmatpush.msrb.mxu3 %v3262_v17  ;;  %3499 = vmatpush.msrb.mxu2 %v3456_v10 }
0x1048   :  { %3234 = vmatmul.f32.gmra.mxu2 %v8953_v13  ;;  %3265 = vmatmul.f32.vlgmr.msrb.gmra.mxu3 %v8918_v57  ;;  %v9019_v14 = vsub.f32 %v42_v30, %v9007_v34 }
0x1049   :  { %3381 = vmatpush.msra.mxu3 %v3217_v24  ;;  %3417 = vmatpush.msra.mxu0 %v3416_v27 }
0x104a   :  { %3300 = vmatmul.f32.gmra.mxu0 %v8938_v50  ;;  %3331 = vmatmul.f32.gmra.mxu1 %v8946_v44 }
0x104b   :  { %3383 = vmatpush.msra.mxu3 %v3219_v19  ;;  %3502 = vmatpush.msrb.mxu2 %v3462_v25  ;;  %v43_v25 = vld [vmem:[%s9687_s2 + $0x91] sm:$0xff] }
0x104c   :  { %3419 = vmatpush.msra.mxu0 %v3418_v29  ;;  %3466 = vmatpush.msra.mxu1 %v3465_v61  ;;  %v8995_v12 = vand.u32 4294901760, %v43_v25 }
0x104d   :  { %3530 = vmatpush.msrb.mxu3 %v3412_v47  ;;  %3505 = vmatpush.msrb.mxu2 %v3468_v32 }
0x104e   :  { %3565 = vmatpush.msrb.mxu0 %v3451_v53  ;;  %3472 = vmatpush.msra.mxu1 %v3471_v62  ;;  %v9004_v32 = vsub.f32 %v43_v25, %v8995_v12  ;;  %v9022_v62 = vand.u32 4294901760, %v41_v56 }
0x104f   :  { %3532 = vmatpush.msrb.mxu3 %v3414_v49 }
0x1050   :  { %3269 = vmatmul.f32.gmra.mxu3 %v8933_v58  ;;  %3358 = vmatmul.f32.vlgmr.msra.gmra.mxu2 %v8918_v57  ;;  %v3682_v61 = vand.u32 4294901760, %v9004_v32 }
0x1051   :  { %3534 = vmatpush.msrb.mxu3 %v3416_v27  ;;  %3569 = vmatpush.msrb.mxu0 %v3457_v15  ;;  %v8987_v15 = vand.u32 4294901760, %v44_v3 }
0x1052   :  { %3600 = vmatpush.msrb.mxu1 %v3412_v47 }
0x1053   :  { %3536 = vmatpush.msrb.mxu3 %v3418_v29  ;;  %3573 = vmatpush.msrb.mxu0 %v3463_v31 }
0x1054   :  { %3602 = vmatpush.msrb.mxu1 %v3414_v49  ;;  %3634 = vmatpush.msra.mxu2 %v8987_v15 }
0x1055   :  { %3577 = vmatpush.msrb.mxu0 %v3469_v63 }
0x1056   :  { %3604 = vmatpush.msrb.mxu1 %v3416_v27  ;;  %3636 = vmatpush.msra.mxu2 %v8995_v12 }
0x1058   :  { %3362 = vmatmul.f32.gmra.mxu2 %v8933_v58  ;;  %3385 = vmatmul.f32.vlgmr.msra.gmra.mxu3 %v8918_v57 }
0x1059   :  { %3606 = vmatpush.msrb.mxu1 %v3418_v29  ;;  %v8993_v29 = vsub.f32 %v44_v3, %v8987_v15  ;;  %3638 = vmatpush.msra.mxu2 %v9007_v34 }
0x105b   :  { %v3676_v31 = vand.u32 4294901760, %v8993_v29  ;;  %3640 = vmatpush.msra.mxu2 %v9022_v62 }
0x105d   :  { %v3677_v63 = vsub.f32 %v8993_v29, %v3676_v31 }
0x1060   :  { %3389 = vmatmul.f32.gmra.mxu3 %v8933_v58 }
0x10bf   :  { %v3296_v37 = vpop.f32.mrf.mxu0  ;;  %v3326_v11 = vpop.f32.mrf.mxu1 }
0x10c3   :  { %v3227_v45 = vpop.f32.mrf.mxu2 }
0x10c7   :  { %v3301_v42 = vpop.f32.mrf.mxu0  ;;  %v3332_v43 = vpop.f32.mrf.mxu1 }
0x10cb   :  { %v3235_v21 = vpop.f32.mrf.mxu2  ;;  %v3266_v36 = vpop.f32.mrf.mxu3 }
0x10cc   :  { %v3267_v39 = vadd.f32 %v3266_v36, %v3227_v45  ;;  %v40_v45 = vld [vmem:[%s9687_s2 + $0x79] sm:$0xff]  ;;  %v3683_v36 = vsub.f32 %v9004_v32, %v3682_v61 }
0x10ce   :  { %v3297_v60 = vadd.f32 %v3296_v37, %v3267_v39  ;;  %v3688_v37 = vand.u32 4294901760, %v9019_v14  ;;  %v3693_v39 = vsub.f32 %v41_v56, %v9022_v62 }
0x10d0   :  { %v3327_v22 = vadd.f32 %v3326_v11, %v3297_v60  ;;  %v9034_v11 = vand.u32 4294901760, %v40_v45  ;;  %v3684_v60 = vand.u32 4294901760, %v3683_v36 }
0x10d2   :  { %3642 = vmatpush.msra.mxu2 %v9034_v11 }
0x10d3   :  { %v3270_v41 = vpop.f32.mrf.mxu3  ;;  %v3359_v19 = vpop.f32.mrf.mxu2 }
0x10d4   :  { %v3271_v8 = vadd.f32 %v3270_v41, %v3235_v21  ;;  %v3360_v9 = vadd.f32 %v3359_v19, %v3327_v22  ;;  %v3678_v21 = vand.u32 4294901760, %v3677_v63  ;;  %v39_v41 = vld [vmem:[%s9687_s2 + $0x71] sm:$0xff]  ;;  %v3689_v19 = vsub.f32 %v9019_v14, %v3688_v37 }
0x10d5   :  { %v3694_v22 = vand.u32 4294901760, %v3693_v39 }
0x10d6   :  { %v3302_v40 = vadd.f32 %v3301_v42, %v3271_v8  ;;  %3679 = vmatpush.msra.mxu3 %v3678_v21  ;;  %v3643_v8 = vand.u32 4294901760, %v39_v41  ;;  %v3699_v42 = vsub.f32 %v40_v45, %v9034_v11 }
0x10d8   :  { %v3333_v16 = vadd.f32 %v3332_v43, %v3302_v40  ;;  %3685 = vmatpush.msra.mxu3 %v3684_v60  ;;  %v3695_v40 = vsub.f32 %v3693_v39, %v3694_v22  ;;  %v3705_v43 = vsub.f32 %v39_v41, %v3643_v8  ;;  %3644 = vmatpush.msra.mxu2 %v3643_v8 }
0x10db   :  { %v3386_v23 = vpop.f32.mrf.mxu3  ;;  %v3363_v4 = vpop.f32.mrf.mxu2 }
0x10dc   :  { %v8976_v24 = vadd.f32 %v3386_v23, %v3360_v9  ;;  %v3364_v26 = vadd.f32 %v3363_v4, %v3333_v16  ;;  %v38_v9 = vld [vmem:[%s9687_s2 + $0x69] sm:$0xff]  ;;  %v3690_v23 = vand.u32 4294901760, %v3689_v19  ;;  %v3696_v16 = vand.u32 4294901760, %v3695_v40 }
0x10dd   :  { %v3645_v4 = vand.u32 4294901760, %v38_v9 }
0x10de   :  { %v3395_v6 = vsel %vm46_vm0, %v8976_v24, 0  ;;  %3691 = vmatpush.msra.mxu3 %v3690_v23 }
0x10df   :  { %v3420_v5 = vand.u32 4294901760, %v3395_v6  ;;  %3646 = vmatpush.msra.mxu2 %v3645_v4 }
0x10e0   :  { %3697 = vmatpush.msra.mxu3 %v3696_v16 }
0x10e1   :  { %v3421_v18 = vsub.f32 %v3395_v6, %v3420_v5  ;;  %3474 = vmatmul.f32.vlgmr.msra.gmra.mxu1 %v3420_v5  ;;  %v3700_v6 = vand.u32 4294901760, %v3699_v42 }
0x10e2   :  { %3783 = vmatpush.msra.mxu1 %v8987_v15 }
0x10e3   :  { %v3422_v17 = vand.u32 4294901760, %v3421_v18  ;;  %v3390_v52 = vpop.f32.mrf.mxu3  ;;  %3508 = vmatmul.f32.vlgmr.msrb.gmra.mxu2 %v3421_v18 }
0x10e4   :  { %v8980_v47 = vadd.f32 %v3390_v52, %v3364_v26  ;;  %3785 = vmatpush.msra.mxu1 %v8995_v12  ;;  %v3711_v52 = vsub.f32 %v38_v9, %v3645_v4 }
0x10e5   :  { %v3423_v33 = vsub.f32 %v3421_v18, %v3422_v17  ;;  %3540 = vmatmul.f32.vlgmr.msrb.gmra.mxu3 %v3422_v17  ;;  %v3706_v18 = vand.u32 4294901760, %v3705_v43  ;;  %v3701_v17 = vsub.f32 %v3699_v42, %v3700_v6 }
0x10e6   :  { %v3398_v48 = vsel %vm46_vm0, %v8980_v47, 0  ;;  %3787 = vmatpush.msra.mxu1 %v9007_v34 }
0x10e7   :  { %v3424_v49 = vand.u32 4294901760, %v3423_v33  ;;  %v3428_v51 = vand.u32 4294901760, %v3398_v48  ;;  %v3707_v33 = vsub.f32 %v3705_v43, %v3706_v18 }
0x10e8   :  { %3789 = vmatpush.msra.mxu1 %v9022_v62 }
0x10e9   :  { %3425 = vmatmul.f32.vlgmr.msra.gmra.mxu0 %v3424_v49  ;;  %3478 = vmatmul.f32.gmra.mxu1 %v3428_v51  ;;  %v3429_v53 = vsub.f32 %v3398_v48, %v3428_v51  ;;  %v3702_v49 = vand.u32 4294901760, %v3701_v17 }
0x10ea   :  { %3741 = vmatpush.msra.mxu0 %v8993_v29  ;;  %3791 = vmatpush.msra.mxu1 %v9034_v11 }
0x10eb   :  { %3513 = vmatmul.f32.gmra.mxu2 %v3429_v53  ;;  %v3430_v10 = vand.u32 4294901760, %v3429_v53  ;;  %3703 = vmatpush.msra.mxu3 %v3702_v49 }
0x10ec   :  { %3744 = vmatpush.msra.mxu0 %v9004_v32  ;;  %3793 = vmatpush.msra.mxu1 %v3643_v8  ;;  %v8433_v32 = vld [vmem:[%s9687_s2 + $0x60] ss:$0 sm:$0xff] }
0x10ed   :  { %3546 = vmatmul.f32.gmra.mxu3 %v3430_v10  ;;  %v3431_v27 = vsub.f32 %v3429_v53, %v3430_v10  ;;  %v3708_v53 = vand.u32 4294901760, %v3707_v33 }
0x10ee   :  { %3747 = vmatpush.msra.mxu0 %v9019_v14  ;;  %3795 = vmatpush.msra.mxu1 %v3645_v4 }
0x10ef   :  { %v3432_v2 = vand.u32 4294901760, %v3431_v27  ;;  %3709 = vmatpush.msra.mxu3 %v3708_v53  ;;  %v8434_v53 = vld [vmem:[%s9687_s2 + $0xa1] ss:$0 sm:$0xff] }
0x10f0   :  { %3750 = vmatpush.msra.mxu0 %v3693_v39 }
0x10f1   :  { %3433 = vmatmul.f32.gmra.mxu0 %v3432_v2  ;;  %3608 = vmatmul.f32.vlgmr.msrb.gmra.mxu1 %v3420_v5 }
0x10f2   :  { %3753 = vmatpush.msra.mxu0 %v3699_v42 }
0x10f4   :  { %3756 = vmatpush.msra.mxu0 %v3705_v43 }
0x10f6   :  { %3759 = vmatpush.msra.mxu0 %v3711_v52 }
0x10f9   :  { %3579 = vmatmul.f32.vlgmr.msrb.gmra.mxu0 %v3420_v5  ;;  %3612 = vmatmul.f32.gmra.mxu1 %v3428_v51  ;;  %v37_v5 = vld [vmem:[%s9687_s2 + $0x61] sm:$0xff] }
0x10fa   :  { %v3647_v26 = vand.u32 4294901760, %v37_v5 }
0x10fc   :  { %v3717_v48 = vsub.f32 %v37_v5, %v3647_v26  ;;  %3797 = vmatpush.msra.mxu1 %v3647_v26  ;;  %3648 = vmatpush.msra.mxu2 %v3647_v26 }
0x10fe   :  { %v3718_v10 = vand.u32 4294901760, %v3717_v48  ;;  %3762 = vmatpush.msra.mxu0 %v3717_v48  ;;  %3822 = vmatpush.msrb.mxu2 %v3676_v31 }
0x1100   :  { %v3719_v2 = vsub.f32 %v3717_v48, %v3718_v10  ;;  %3826 = vmatpush.msrb.mxu2 %v3682_v61 }
0x1101   :  { %3583 = vmatmul.f32.gmra.mxu0 %v3428_v51  ;;  %v3712_v51 = vand.u32 4294901760, %v3711_v52 }
0x1102   :  { %v3720_v25 = vand.u32 4294901760, %v3719_v2  ;;  %3830 = vmatpush.msrb.mxu2 %v3688_v37 }
0x1103   :  { %v3713_v27 = vsub.f32 %v3711_v52, %v3712_v51 }
0x1104   :  { %3834 = vmatpush.msrb.mxu2 %v3694_v22 }
0x1105   :  { %v3714_v3 = vand.u32 4294901760, %v3713_v27 }
0x1106   :  { %3838 = vmatpush.msrb.mxu2 %v3700_v6 }
0x1107   :  { %3715 = vmatpush.msra.mxu3 %v3714_v3 }
0x1108   :  { %3842 = vmatpush.msrb.mxu2 %v3706_v18 }
0x1109   :  { %3721 = vmatpush.msra.mxu3 %v3720_v25 }
0x110a   :  { %3846 = vmatpush.msrb.mxu2 %v3712_v51 }
0x110b   :  { %3869 = vmatpush.msrb.mxu3 %v8987_v15 }
0x110c   :  { %3850 = vmatpush.msrb.mxu2 %v3718_v10 }
0x110d   :  { %3871 = vmatpush.msrb.mxu3 %v8995_v12 }
0x110f   :  { %3873 = vmatpush.msrb.mxu3 %v9007_v34 }
0x1111   :  { %3875 = vmatpush.msrb.mxu3 %v9022_v62 }
0x1113   :  { %3877 = vmatpush.msrb.mxu3 %v9034_v11 }
0x1115   :  { %3879 = vmatpush.msrb.mxu3 %v3643_v8 }
0x1117   :  { %3881 = vmatpush.msrb.mxu3 %v3645_v4 }
0x1119   :  { %3883 = vmatpush.msrb.mxu3 %v3647_v26 }
0x115e   :  { %v3475_v30 = vpop.f32.mrf.mxu1 }
0x1166   :  { %v3426_v29 = vpop.f32.mrf.mxu0  ;;  %v3479_v15 = vpop.f32.mrf.mxu1 }
0x1167   :  { %v3427_v31 = vadd.f32 %v8433_v32, %v3426_v29  ;;  %v3509_v63 = vpop.f32.mrf.mxu2 }
0x1168   :  { %v3541_v45 = vpop.f32.mrf.mxu3 }
0x1169   :  { %v3476_v56 = vadd.f32 %v3475_v30, %v3427_v31 }
0x116b   :  { %v3510_v14 = vadd.f32 %v3509_v63, %v3476_v56 }
0x116d   :  { %v3542_v21 = vadd.f32 %v3541_v45, %v3510_v14 }
0x116e   :  { %v3434_v61 = vpop.f32.mrf.mxu0  ;;  %v3609_v36 = vpop.f32.mrf.mxu1 }
0x116f   :  { %v3435_v12 = vadd.f32 %v8433_v32, %v3434_v61  ;;  %v3514_v62 = vpop.f32.mrf.mxu2 }
0x1170   :  { %v3547_v19 = vpop.f32.mrf.mxu3 }
0x1171   :  { %v3480_v34 = vadd.f32 %v3479_v15, %v3435_v12 }
0x1173   :  { %v3515_v41 = vadd.f32 %v3514_v62, %v3480_v34 }
0x1175   :  { %v3548_v22 = vadd.f32 %v3547_v19, %v3515_v41 }
0x1176   :  { %v3580_v37 = vpop.f32.mrf.mxu0  ;;  %v3613_v43 = vpop.f32.mrf.mxu1 }
0x1177   :  { %v3581_v39 = vadd.f32 %v3580_v37, %v3542_v21 }
0x1179   :  { %v3610_v60 = vadd.f32 %v3609_v36, %v3581_v39 }
0x117b   :  { %v3616_v11 = vmax.f32 %v3610_v60, 0.0 }
0x117d   :  { %v3620_v8 = vsel %vm2971_vm8, %v3616_v11, 0 }
0x117e   :  { %v3649_v42 = vand.u32 4294901760, %v3620_v8  ;;  %v3584_v9 = vpop.f32.mrf.mxu0 }
0x117f   :  { %v3585_v23 = vadd.f32 %v3584_v9, %v3548_v22 }
0x1180   :  { %v3650_v40 = vsub.f32 %v3620_v8, %v3649_v42  ;;  %3723 = vmatmul.f32.vlgmr.msra.gmra.mxu3 %v3649_v42 }
0x1181   :  { %v3614_v6 = vadd.f32 %v3613_v43, %v3585_v23 }
0x1182   :  { %v3651_v4 = vand.u32 4294901760, %v3650_v40  ;;  %3765 = vmatmul.f32.vlgmr.msra.gmra.mxu0 %v3650_v40 }
0x1183   :  { %v3617_v5 = vmax.f32 %v3614_v6, 0.0  ;;  %v4088_v6 = vld [vmem:[%s9687_s2 + $0xba] sm:$0xff] }
0x1184   :  { %v3652_v16 = vsub.f32 %v3650_v40, %v3651_v4  ;;  %3801 = vmatmul.f32.vlgmr.msra.gmra.mxu1 %v3651_v4  ;;  %v4125_v4 = vand.u32 4294901760, %v4088_v6 }
0x1185   :  { %v3623_v18 = vsel %vm2971_vm8, %v3617_v5, 0  ;;  %v4087_v5 = vld [vmem:[%s9687_s2 + $0xb2] sm:$0xff] }
0x1186   :  { %v3657_v26 = vand.u32 4294901760, %v3623_v18  ;;  %v3653_v17 = vand.u32 4294901760, %v3652_v16  ;;  %v4163_v16 = vsub.f32 %v4088_v6, %v4125_v4 }
0x1188   :  { %3654 = vmatmul.f32.vlgmr.msra.gmra.mxu2 %v3653_v17  ;;  %3727 = vmatmul.f32.gmra.mxu3 %v3657_v26  ;;  %v3658_v52 = vsub.f32 %v3623_v18, %v3657_v26  ;;  %v4127_v18 = vand.u32 4294901760, %v4087_v5  ;;  %v4164_v17 = vand.u32 4294901760, %v4163_v16 }
0x118a   :  { %3770 = vmatmul.f32.gmra.mxu0 %v3658_v52  ;;  %v3659_v33 = vand.u32 4294901760, %v3658_v52 }
0x118c   :  { %3807 = vmatmul.f32.gmra.mxu1 %v3659_v33  ;;  %v3660_v48 = vsub.f32 %v3658_v52, %v3659_v33  ;;  %v4169_v52 = vsub.f32 %v4087_v5, %v4127_v18 }
0x118e   :  { %v3661_v49 = vand.u32 4294901760, %v3660_v48  ;;  %v4085_v48 = vld [vmem:[%s9687_s2 + $0xa2] sm:$0xff] }
0x1190   :  { %3662 = vmatmul.f32.gmra.mxu2 %v3661_v49  ;;  %3885 = vmatmul.f32.vlgmr.msrb.gmra.mxu3 %v3649_v42  ;;  %v4165_v49 = vsub.f32 %v4163_v16, %v4164_v17 }
0x1198   :  { %3852 = vmatmul.f32.vlgmr.msrb.gmra.mxu2 %v3649_v42  ;;  %3889 = vmatmul.f32.gmra.mxu3 %v3657_v26 }
0x11a0   :  { %3856 = vmatmul.f32.gmra.mxu2 %v3657_v26  ;;  %v4086_v26 = vld [vmem:[%s9687_s2 + $0xaa] sm:$0xff] }
0x11a1   :  { %v4129_v33 = vand.u32 4294901760, %v4086_v26 }
0x11ff   :  { %v3766_v25 = vpop.f32.mrf.mxu0 }
0x1201   :  { %v3802_v31 = vpop.f32.mrf.mxu1 }
0x1203   :  { %v3724_v51 = vpop.f32.mrf.mxu3 }
0x1207   :  { %v3771_v12 = vpop.f32.mrf.mxu0 }
0x1209   :  { %v3808_v36 = vpop.f32.mrf.mxu1 }
0x120b   :  { %v3655_v10 = vpop.f32.mrf.mxu2  ;;  %v3728_v2 = vpop.f32.mrf.mxu3 }
0x120c   :  { %v3656_v27 = vadd.f32 %v8434_v53, %v3655_v10  ;;  %v4131_v10 = vand.u32 4294901760, %v4085_v48 }
0x120e   :  { %v3725_v3 = vadd.f32 %v3724_v51, %v3656_v27  ;;  %v4170_v51 = vand.u32 4294901760, %v4169_v52  ;;  %v4166_v27 = vand.u32 4294901760, %v4165_v49 }
0x1210   :  { %v3767_v29 = vadd.f32 %v3766_v25, %v3725_v3  ;;  %v4181_v25 = vsub.f32 %v4085_v48, %v4131_v10 }
0x1212   :  { %v3803_v56 = vadd.f32 %v3802_v31, %v3767_v29  ;;  %v4182_v29 = vand.u32 4294901760, %v4181_v25 }
0x1213   :  { %v3663_v30 = vpop.f32.mrf.mxu2  ;;  %v3886_v63 = vpop.f32.mrf.mxu3 }
0x1214   :  { %v3664_v32 = vadd.f32 %v8434_v53, %v3663_v30  ;;  %v4175_v53 = vsub.f32 %v4086_v26, %v4129_v33 }
0x1216   :  { %v3729_v15 = vadd.f32 %v3728_v2, %v3664_v32  ;;  %v4171_v2 = vsub.f32 %v4169_v52, %v4170_v51  ;;  %v4176_v3 = vand.u32 4294901760, %v4175_v53 }
0x1218   :  { %v3772_v21 = vadd.f32 %v3771_v12, %v3729_v15  ;;  %v4172_v30 = vand.u32 4294901760, %v4171_v2  ;;  %v4177_v32 = vsub.f32 %v4175_v53, %v4176_v3  ;;  %v4183_v15 = vsub.f32 %v4181_v25, %v4182_v29 }
0x121a   :  { %v3809_v37 = vadd.f32 %v3808_v36, %v3772_v21  ;;  %v4178_v31 = vand.u32 4294901760, %v4177_v32 }
0x121b   :  { %v3853_v61 = vpop.f32.mrf.mxu2  ;;  %v3890_v60 = vpop.f32.mrf.mxu3 }
0x121c   :  { %v3854_v14 = vadd.f32 %v3853_v61, %v3803_v56  ;;  %v4184_v56 = vand.u32 4294901760, %v4183_v15 }
0x121e   :  { %v3887_v45 = vadd.f32 %v3886_v63, %v3854_v14 }
0x1220   :  { %v3893_v34 = vadd.f32 %v3887_v45, %v8976_v24 }
0x1222   :  { %v3911_v41 = vand.u32 4294901760, %v3893_v34 }
0x1223   :  { %v3857_v39 = vpop.f32.mrf.mxu2 }
0x1224   :  { %v3858_v62 = vadd.f32 %v3857_v39, %v3809_v37  ;;  %v3951_v22 = vsub.f32 %v3893_v34, %v3911_v41 }
0x1226   :  { %v3891_v11 = vadd.f32 %v3890_v60, %v3858_v62  ;;  %v3952_v9 = vand.u32 4294901760, %v3951_v22 }
0x1228   :  { %v3894_v19 = vadd.f32 %v3891_v11, %v8980_v47  ;;  %v3953_v40 = vsub.f32 %v3951_v22, %v3952_v9 }
0x122a   :  { %v3909_v8 = vand.u32 4294901760, %v3894_v19  ;;  %v3954_v43 = vand.u32 4294901760, %v3953_v40 }
0x122c   :  { %3910 = vmatpush.msrb.mxu0 %v3909_v8  ;;  %4011 = vmatpush.msra.mxu3 %v3909_v8  ;;  %v3945_v42 = vsub.f32 %v3894_v19, %v3909_v8 }
0x122e   :  { %3912 = vmatpush.msrb.mxu0 %v3911_v41  ;;  %3981 = vmatpush.msra.mxu2 %v3945_v42  ;;  %v3946_v23 = vand.u32 4294901760, %v3945_v42 }
0x122f   :  { %4013 = vmatpush.msra.mxu3 %v3911_v41  ;;  %3918 = vmatmul.f32.vlgmr.msrb.gmra.mxu0 %v8943_v46 }
0x1230   :  { %3984 = vmatpush.msra.mxu2 %v3951_v22  ;;  %4044 = vmatpush.msra.mxu0 %v3946_v23  ;;  %v3947_v24 = vsub.f32 %v3945_v42, %v3946_v23 }
0x1231   :  { %3987 = vmatmul.f32.vlgmr.msra.gmra.mxu2 %v8924_v20  ;;  %4017 = vmatmul.f32.vlgmr.msra.gmra.mxu3 %v8931_v54 }
0x1232   :  { %4048 = vmatpush.msra.mxu0 %v3952_v9  ;;  %v3948_v47 = vand.u32 4294901760, %v3947_v24  ;;  %4126 = vmatpush.msrb.mxu2 %v4125_v4 }
0x1233   :  { %4167 = vmatpush.msrb.mxu3 %v4166_v27 }
0x1234   :  { %3949 = vmatpush.msrb.mxu1 %v3948_v47  ;;  %4209 = vmatpush.msrb.mxu0 %v4163_v16 }
0x1235   :  { %4128 = vmatpush.msrb.mxu2 %v4127_v18  ;;  %4173 = vmatpush.msrb.mxu3 %v4172_v30 }
0x1236   :  { %3955 = vmatpush.msrb.mxu1 %v3954_v43  ;;  %4212 = vmatpush.msrb.mxu0 %v4169_v52 }
0x1237   :  { %3926 = vmatmul.f32.gmra.mxu0 %v8953_v13  ;;  %3957 = vmatmul.f32.vlgmr.msrb.gmra.mxu1 %v8918_v57 }
0x1238   :  { %4073 = vmatpush.msra.mxu1 %v3909_v8  ;;  %4130 = vmatpush.msrb.mxu2 %v4129_v33 }
0x1239   :  { %3992 = vmatmul.f32.gmra.mxu2 %v8938_v50  ;;  %4023 = vmatmul.f32.gmra.mxu3 %v8946_v44 }
0x123a   :  { %4075 = vmatpush.msra.mxu1 %v3911_v41  ;;  %4215 = vmatpush.msrb.mxu0 %v4175_v53 }
0x123b   :  { %4132 = vmatpush.msrb.mxu2 %v4131_v10  ;;  %4179 = vmatpush.msrb.mxu3 %v4178_v31 }
0x123c   :  { %4243 = vmatpush.msrb.mxu1 %v4125_v4  ;;  %4218 = vmatpush.msrb.mxu0 %v4181_v25 }
0x123d   :  { %4278 = vmatpush.msra.mxu2 %v4164_v17  ;;  %4185 = vmatpush.msrb.mxu3 %v4184_v56 }
0x123e   :  { %4245 = vmatpush.msrb.mxu1 %v4127_v18 }
0x123f   :  { %3961 = vmatmul.f32.gmra.mxu1 %v8933_v58  ;;  %4050 = vmatmul.f32.vlgmr.msra.gmra.mxu0 %v8918_v57 }
0x1240   :  { %4247 = vmatpush.msrb.mxu1 %v4129_v33  ;;  %4282 = vmatpush.msra.mxu2 %v4170_v51 }
0x1241   :  { %4313 = vmatpush.msra.mxu3 %v4125_v4 }
0x1242   :  { %4249 = vmatpush.msrb.mxu1 %v4131_v10  ;;  %4286 = vmatpush.msra.mxu2 %v4176_v3 }
0x1243   :  { %4315 = vmatpush.msra.mxu3 %v4127_v18 }
0x1244   :  { %4290 = vmatpush.msra.mxu2 %v4182_v29 }
0x1245   :  { %4317 = vmatpush.msra.mxu3 %v4129_v33 }
0x1247   :  { %4054 = vmatmul.f32.gmra.mxu0 %v8933_v58  ;;  %4077 = vmatmul.f32.vlgmr.msra.gmra.mxu1 %v8918_v57 }
0x1248   :  { %4319 = vmatpush.msra.mxu3 %v4131_v10 }
0x124f   :  { %4081 = vmatmul.f32.gmra.mxu1 %v8933_v58 }
0x12ac   :  { %v3919_v63 = vpop.f32.mrf.mxu0 }
0x12b4   :  { %v3927_v61 = vpop.f32.mrf.mxu0  ;;  %v3958_v14 = vpop.f32.mrf.mxu1 }
0x12b5   :  { %v3988_v12 = vpop.f32.mrf.mxu2  ;;  %v3959_v45 = vadd.f32 %v3958_v14, %v3919_v63  ;;  %v4018_v21 = vpop.f32.mrf.mxu3 }
0x12b7   :  { %v3989_v36 = vadd.f32 %v3988_v12, %v3959_v45 }
0x12b9   :  { %v4019_v39 = vadd.f32 %v4018_v21, %v3989_v36 }
0x12bc   :  { %v3962_v34 = vpop.f32.mrf.mxu1  ;;  %v4051_v37 = vpop.f32.mrf.mxu0 }
0x12bd   :  { %v3963_v62 = vadd.f32 %v3962_v34, %v3927_v61  ;;  %v3993_v41 = vpop.f32.mrf.mxu2  ;;  %v4052_v60 = vadd.f32 %v4051_v37, %v4019_v39  ;;  %v4024_v8 = vpop.f32.mrf.mxu3 }
0x12bf   :  { %v3994_v19 = vadd.f32 %v3993_v41, %v3963_v62 }
0x12c1   :  { %v4025_v24 = vadd.f32 %v4024_v8, %v3994_v19 }
0x12c4   :  { %v4078_v11 = vpop.f32.mrf.mxu1  ;;  %v4055_v9 = vpop.f32.mrf.mxu0 }
0x12c5   :  { %v9091_v22 = vadd.f32 %v4078_v11, %v4052_v60  ;;  %v4056_v47 = vadd.f32 %v4055_v9, %v4025_v24 }
0x12c7   :  { %v4108_v42 = vsel %vm46_vm0, %v9091_v22, 0 }
0x12c8   :  { %v4133_v23 = vand.u32 4294901760, %v4108_v42 }
0x12ca   :  { %v4134_v40 = vsub.f32 %v4108_v42, %v4133_v23  ;;  %4187 = vmatmul.f32.vlgmr.msrb.gmra.mxu3 %v4133_v23 }
0x12cc   :  { %v4135_v43 = vand.u32 4294901760, %v4134_v40  ;;  %v4082_v6 = vpop.f32.mrf.mxu1  ;;  %4221 = vmatmul.f32.vlgmr.msrb.gmra.mxu0 %v4134_v40 }
0x12cd   :  { %v9095_v4 = vadd.f32 %v4082_v6, %v4056_v47 }
0x12ce   :  { %v4136_v5 = vsub.f32 %v4134_v40, %v4135_v43  ;;  %4253 = vmatmul.f32.vlgmr.msrb.gmra.mxu1 %v4135_v43 }
0x12cf   :  { %v4111_v16 = vsel %vm46_vm0, %v9095_v4, 0 }
0x12d0   :  { %v4137_v18 = vand.u32 4294901760, %v4136_v5  ;;  %v4141_v26 = vand.u32 4294901760, %v4111_v16 }
0x12d2   :  { %4138 = vmatmul.f32.vlgmr.msrb.gmra.mxu2 %v4137_v18  ;;  %4191 = vmatmul.f32.gmra.mxu3 %v4141_v26  ;;  %v4142_v17 = vsub.f32 %v4111_v16, %v4141_v26 }
0x12d4   :  { %4226 = vmatmul.f32.gmra.mxu0 %v4142_v17  ;;  %v4143_v52 = vand.u32 4294901760, %v4142_v17 }
0x12d6   :  { %4259 = vmatmul.f32.gmra.mxu1 %v4143_v52  ;;  %v4144_v33 = vsub.f32 %v4142_v17, %v4143_v52 }
0x12d8   :  { %v4145_v48 = vand.u32 4294901760, %v4144_v33 }
0x12da   :  { %4146 = vmatmul.f32.gmra.mxu2 %v4145_v48  ;;  %4321 = vmatmul.f32.vlgmr.msra.gmra.mxu3 %v4133_v23 }
0x12e2   :  { %4292 = vmatmul.f32.vlgmr.msra.gmra.mxu2 %v4133_v23  ;;  %4325 = vmatmul.f32.gmra.mxu3 %v4141_v26 }
0x12ea   :  { %4296 = vmatmul.f32.gmra.mxu2 %v4141_v26 }
0x1349   :  { %v4222_v2 = vpop.f32.mrf.mxu0 }
0x134b   :  { %v4254_v25 = vpop.f32.mrf.mxu1 }
0x134d   :  { %v4188_v49 = vpop.f32.mrf.mxu3 }
0x1351   :  { %v9129_v16 = vpop.f32.mrf.mxu0 }
0x1353   :  { %v9131_v18 = vpop.f32.mrf.mxu1 }
0x1355   :  { %v4139_v51 = vpop.f32.mrf.mxu2  ;;  %v9099_v10 = vpop.f32.mrf.mxu3 }
0x1356   :  { %v4189_v53 = vadd.f32 %v4188_v49, %v4139_v51 }
0x1358   :  { %v4223_v3 = vadd.f32 %v4222_v2, %v4189_v53 }
0x135a   :  { %v4255_v30 = vadd.f32 %v4254_v25, %v4223_v3 }
0x135d   :  { %v9101_v27 = vpop.f32.mrf.mxu2  ;;  %v4322_v31 = vpop.f32.mrf.mxu3 }
0x1365   :  { %v4293_v32 = vpop.f32.mrf.mxu2  ;;  %v9135_v17 = vpop.f32.mrf.mxu3 }
0x1366   :  { %v4294_v29 = vadd.f32 %v4293_v32, %v4255_v30 }
0x1368   :  { %v9103_v15 = vadd.f32 %v4322_v31, %v4294_v29 }
0x136a   :  { %4330 = vrot.lane.b32.xlu2 %v9103_v15, %s8538_s28  ;;  %v4332_v56 = vsel %vm272_vm1, %v9103_v15, 0 }
0x136b   :  { %v4353_v63 = vand.u32 4294901760, %v4332_v56 }
0x136d   :  { %v4354_v61 = vsub.f32 %v4332_v56, %v4353_v63  ;;  %v9133_v26 = vpop.f32.mrf.mxu2 }
0x136f   :  { %v4355_v14 = vand.u32 4294901760, %v4354_v61 }
0x1371   :  { %v4356_v21 = vsub.f32 %v4354_v61, %v4355_v14 }
0x1372   :  { %4506 = vrot.lane.b32.xlu2 %v9103_v15, %s8542_s6 }
0x1373   :  { %v4357_v37 = vand.u32 4294901760, %v4356_v21 }
0x137a   :  { %4660 = vrot.lane.b32.xlu2 %v9103_v15, %s8537_s27 }
0x1382   :  { %4658 = vrot.lane.b32.xlu2 %v9103_v15, %s8539_s29 }
0x138a   :  { %4836 = vrot.lane.b32.xlu2 %v9103_v15, %s8540_s30 }
0x13c4   :  { %v4331_v12 = vpop.permute.xlu2 %4330 }
0x13c5   :  { %v4334_v45 = vsel %vm272_vm1, %v4331_v12, 0 }
0x13c6   :  { %v4351_v34 = vand.u32 4294901760, %v4334_v45 }
0x13c8   :  { %v4378_v36 = vsub.f32 %v4334_v45, %v4351_v34  ;;  %4352 = vmatpush.xpose.msra.mxu0 %v4351_v34  ;;  %4428 = vmatpush.xpose.msrb.mxu3 %v4351_v34 }
0x13ca   :  { %v4379_v39 = vand.u32 4294901760, %v4378_v36  ;;  %4405 = vmatpush.xpose.msrb.mxu2 %v4378_v36 }
0x13cb   :  { %4358 = vmatmul.f32.vlgmr.msra.gmra.mxu0 %v4357_v37  ;;  %4432 = vmatmul.f32.vlgmr.msrb.gmra.mxu3 %v4355_v14 }
0x13cc   :  { %v4380_v62 = vsub.f32 %v4378_v36, %v4379_v39  ;;  %4454 = vmatpush.xpose.msrb.mxu0 %v4379_v39  ;;  %v4507_v41 = vpop.permute.xlu2 %4506 }
0x13cd   :  { %v4527_v60 = vand.u32 4294901760, %v4507_v41  ;;  %4408 = vmatmul.f32.vlgmr.msrb.gmra.mxu2 %v4354_v61 }
0x13ce   :  { %v4381_v11 = vand.u32 4294901760, %v4380_v62 }
0x13cf   :  { %v4554_v19 = vsub.f32 %v4507_v41, %v4527_v60  ;;  %4528 = vmatpush.msra.mxu2 %v4527_v60 }
0x13d0   :  { %4382 = vmatpush.xpose.msra.mxu1 %v4381_v11 }
0x13d1   :  { %v4555_v8 = vand.u32 4294901760, %v4554_v19  ;;  %4581 = vmatpush.msra.mxu0 %v4554_v19 }
0x13d3   :  { %v4556_v42 = vsub.f32 %v4554_v19, %v4555_v8  ;;  %4384 = vmatmul.f32.vlgmr.msra.gmra.mxu1 %v4353_v63  ;;  %4456 = vmatmul.f32.vlgmr.msrb.gmra.mxu0 %v4353_v63 }
0x13d4   :  { %4476 = vmatpush.xpose.msrb.mxu1 %v4351_v34  ;;  %4630 = vmatpush.msrb.mxu2 %v4555_v8  ;;  %v4661_v9 = vpop.permute.xlu2 %4660 }
0x13d5   :  { %v4557_v23 = vand.u32 4294901760, %v4556_v42  ;;  %v4664_v24 = vsel %vm272_vm1, %v4661_v9, 0 }
0x13d6   :  { %v9119_v40 = vand.u32 4294901760, %v4664_v24 }
0x13d7   :  { %4558 = vmatpush.msra.mxu3 %v4557_v23 }
0x13d8   :  { %4604 = vmatpush.msra.mxu1 %v4527_v60  ;;  %v9122_v47 = vsub.f32 %v4664_v24, %v9119_v40  ;;  %4682 = vmatpush.xpose.msrb.mxu0 %v9119_v40 }
0x13d9   :  { %4652 = vmatpush.msrb.mxu3 %v4527_v60 }
0x13da   :  { %v4709_v43 = vand.u32 4294901760, %v9122_v47 }
0x13db   :  { %4478 = vmatmul.f32.vlgmr.msrb.gmra.mxu1 %v4353_v63 }
0x13dc   :  { %v4710_v6 = vsub.f32 %v9122_v47, %v4709_v43  ;;  %v4659_v45 = vpop.permute.xlu2 %4658 }
0x13dd   :  { %v4662_v62 = vsel %vm272_vm1, %v4659_v45, 0 }
0x13de   :  { %v4711_v5 = vand.u32 4294901760, %v4710_v6  ;;  %v4683_v8 = vand.u32 4294901760, %v4662_v62 }
0x13e0   :  { %4712 = vmatpush.xpose.msrb.mxu1 %v4711_v5  ;;  %v4684_v5 = vsub.f32 %v4662_v62, %v4683_v8 }
0x13e4   :  { %v4837_v37 = vpop.permute.xlu2 %4836 }
0x13e5   :  { %v4857_v11 = vand.u32 4294901760, %v4837_v37 }
0x13e7   :  { %v4884_v24 = vsub.f32 %v4837_v37, %v4857_v11 }
0x1448   :  { %v4359_v52 = vpop.f32.mrf.mxu0 }
0x144e   :  { %v4433_v53 = vpop.f32.mrf.mxu3 }
0x1450   :  { %v4385_v33 = vpop.f32.mrf.mxu1  ;;  %v4409_v49 = vpop.f32.mrf.mxu2 }
0x1451   :  { %v4386_v48 = vadd.f32 %v4385_v33, %v4359_v52  ;;  %v4457_v3 = vpop.f32.mrf.mxu0 }
0x1453   :  { %v4410_v51 = vadd.f32 %v4409_v49, %v4386_v48  ;;  %v4885_v48 = vand.u32 4294901760, %v4884_v24  ;;  %v4685_v49 = vand.u32 4294901760, %v4684_v5 }
0x1455   :  { %v4434_v2 = vadd.f32 %v4433_v53, %v4410_v51 }
0x1457   :  { %v4458_v25 = vadd.f32 %v4457_v3, %v4434_v2  ;;  %v4886_v2 = vsub.f32 %v4884_v24, %v4885_v48  ;;  %v4686_v3 = vsub.f32 %v4684_v5, %v4685_v49 }
0x1458   :  { %v4479_v30 = vpop.f32.mrf.mxu1 }
0x1459   :  { %v4480_v32 = vadd.f32 %v4479_v30, %v4458_v25 }
0x145b   :  { %v4482_v29 = vsel %vm272_vm1, %v4480_v32, -inf }
0x145c   :  { %4483 = vmax.xlane.f32.xlu0 %v4482_v29  ;;  %v4687_v29 = vand.u32 4294901760, %v4686_v3 }
0x14cf   :  { %v4484_v31 = vpop.xlane.xlu0 %4483 }
0x14d0   :  { %v4485_v56 = vsub.f32 %v4480_v32, %v4484_v31  ;;  %v4887_v32 = vand.u32 4294901760, %v4886_v2 }
0x14d2   :  { %v4486_v63 = vmul.f32 1.442695, %v4485_v56 }
0x14d4   :  { %8471 = vpow2.f32 %v4486_v63 }
0x14da   :  { %v8472_v61 = vpop.eup %8471 }
0x14db   :  { %v4488_v14 = vsel %vm272_vm1, %v8472_v61, 0.0 }
0x14dc   :  { %4489 = vadd.xlane.f32.xlu1 %v4488_v14 }
0x154f   :  { %v4490_v12 = vpop.xlane.xlu1 %4489 }
0x1550   :  { %8473 = vrcp.f32 %v4490_v12  ;;  %v4502_v39 = vand.u32 2147483648, %v4490_v12  ;;  %v4500_v60 = vand.u32 2147483647, %v4490_v12  ;;  %vm4496_vm10 = vweird.f32 %v4490_v12 }
0x1552   :  { %v4503_v42 = vor.u32 1.1754944e-38, %v4502_v39  ;;  %vm4501_vm12 = vcmp.eq.f32.partialorder %v4500_v60, 8.507059e+37 }
0x1556   :  { %v8474_v21 = vpop.eup %8473 }
0x1557   :  { %v4492_v34 = vmul.f32 %v8474_v21, %v4490_v12  ;;  %vm4497_vm9 = vweird.f32 %v8474_v21 }
0x1558   :  { %vm4498_vm11 = vmor %vm4496_vm10, %vm4497_vm9 }
0x1559   :  { %v4493_v36 = vsub.f32 1.0, %v4492_v34 }
0x155b   :  { %v4494_v41 = vmul.f32 %v8474_v21, %v4493_v36 }
0x155d   :  { %v4495_v19 = vadd.f32 %v8474_v21, %v4494_v41 }
0x155f   :  { %v4499_v9 = vsel %vm4498_vm11, %v8474_v21, %v4495_v19 }
0x1560   :  { %v4504_v23 = vsel %vm4501_vm12, %v4503_v42, %v4499_v9 }
0x1561   :  { %v9140_v6 = vmul.f32 %v8472_v61, %v4504_v23 }
0x1563   :  { %9713 = vst [vmem:[#allocation13_spill] sm:$0xff] %v9140_v6  ;;  %v4510_v52 = vsel %vm272_vm1, %v9140_v6, 0 }
0x1564   :  { %v4529_v33 = vand.u32 4294901760, %v4510_v52 }
0x1566   :  { %4560 = vmatmul.f32.vlgmr.msra.gmra.mxu3 %v4529_v33  ;;  %v4530_v51 = vsub.f32 %v4510_v52, %v4529_v33 }
0x1567   :  { %4758 = vmatpush.xpose.msra.mxu3 %v9119_v40 }
0x1568   :  { %4584 = vmatmul.f32.vlgmr.msra.gmra.mxu0 %v4530_v51  ;;  %v4531_v53 = vand.u32 4294901760, %v4530_v51 }
0x1569   :  { %4784 = vmatpush.xpose.msra.mxu0 %v4709_v43 }
0x156a   :  { %4608 = vmatmul.f32.vlgmr.msra.gmra.mxu1 %v4531_v53  ;;  %v4532_v25 = vsub.f32 %v4530_v51, %v4531_v53 }
0x156b   :  { %4806 = vmatpush.xpose.msra.mxu1 %v9119_v40 }
0x156c   :  { %v4533_v30 = vand.u32 4294901760, %v4532_v25 }
0x156e   :  { %4534 = vmatmul.f32.vlgmr.msra.gmra.mxu2 %v4533_v30  ;;  %4654 = vmatmul.f32.vlgmr.msrb.gmra.mxu3 %v4529_v33 }
0x156f   :  { %4735 = vmatpush.xpose.msra.mxu2 %v9122_v47  ;;  %4888 = vmatpush.msrb.mxu3 %v4887_v32 }
0x1570   :  { %4688 = vmatmul.f32.vlgmr.msrb.gmra.mxu0 %v4687_v29 }
0x1571   :  { %4911 = vmatpush.msrb.mxu0 %v4884_v24 }
0x1572   :  { %4714 = vmatmul.f32.vlgmr.msrb.gmra.mxu1 %v4683_v8 }
0x1573   :  { %4934 = vmatpush.msrb.mxu1 %v4857_v11 }
0x1576   :  { %4632 = vmatmul.f32.vlgmr.msrb.gmra.mxu2 %v4529_v33  ;;  %4762 = vmatmul.f32.vlgmr.msra.gmra.mxu3 %v4685_v49 }
0x1577   :  { %4858 = vmatpush.msrb.mxu2 %v4857_v11  ;;  %4982 = vmatpush.msra.mxu3 %v4857_v11 }
0x1578   :  { %4786 = vmatmul.f32.vlgmr.msra.gmra.mxu0 %v4683_v8 }
0x157a   :  { %4808 = vmatmul.f32.vlgmr.msra.gmra.mxu1 %v4683_v8 }
0x157e   :  { %4738 = vmatmul.f32.vlgmr.msra.gmra.mxu2 %v4684_v5 }
0x157f   :  { %4960 = vmatpush.msra.mxu2 %v4885_v48 }
0x15e5   :  { %v9151_v43 = vpop.f32.mrf.mxu0 }
0x15e7   :  { %v9155_v47 = vpop.f32.mrf.mxu1 }
0x15e9   :  { %v9149_v40 = vpop.f32.mrf.mxu3 }
0x15ed   :  { %v4689_v61 = vpop.f32.mrf.mxu0 }
0x15ef   :  { %v4715_v14 = vpop.f32.mrf.mxu1 }
0x15f0   :  { %v4716_v12 = vadd.f32 %v4715_v14, %v4689_v61 }
0x15f1   :  { %v9153_v31 = vpop.f32.mrf.mxu2  ;;  %v9157_v56 = vpop.f32.mrf.mxu3 }
0x15f5   :  { %v4787_v37 = vpop.f32.mrf.mxu0 }
0x15f7   :  { %v4809_v62 = vpop.f32.mrf.mxu1 }
0x15f9   :  { %v9159_v63 = vpop.f32.mrf.mxu2  ;;  %v4763_v34 = vpop.f32.mrf.mxu3 }
0x1601   :  { %v4739_v45 = vpop.f32.mrf.mxu2 }
0x1602   :  { %v4740_v21 = vadd.f32 %v4739_v45, %v4716_v12 }
0x1604   :  { %v4764_v36 = vadd.f32 %v4763_v34, %v4740_v21 }
0x1606   :  { %v4788_v39 = vadd.f32 %v4787_v37, %v4764_v36 }
0x1608   :  { %v4810_v41 = vadd.f32 %v4809_v62, %v4788_v39 }
0x160a   :  { %v4812_v60 = vsel %vm272_vm1, %v4810_v41, -inf }
0x160b   :  { %4813 = vmax.xlane.f32.xlu0 %v4812_v60 }
0x161f   :  { %4990 = vrot.lane.b32.xlu0 %v9103_v15, %s8543_s7 }
0x167e   :  { %v4814_v11 = vpop.xlane.xlu0 %4813 }
0x167f   :  { %v4815_v19 = vsub.f32 %v4810_v41, %v4814_v11 }
0x1681   :  { %v4816_v8 = vmul.f32 1.442695, %v4815_v19 }
0x1683   :  { %8475 = vpow2.f32 %v4816_v8 }
0x1689   :  { %v8476_v42 = vpop.eup %8475 }
0x168a   :  { %v4818_v9 = vsel %vm272_vm1, %v8476_v42, 0.0 }
0x168b   :  { %4819 = vadd.xlane.f32.xlu1 %v4818_v9 }
0x1691   :  { %v4991_v23 = vpop.permute.xlu0 %4990 }
0x1692   :  { %v4994_v24 = vsel %vm272_vm1, %v4991_v23, 0 }
0x1693   :  { %v5011_v5 = vand.u32 4294901760, %v4994_v24 }
0x1695   :  { %v5038_v52 = vsub.f32 %v4994_v24, %v5011_v5  ;;  %5012 = vmatpush.xpose.msra.mxu0 %v5011_v5 }
0x1697   :  { %v5039_v33 = vand.u32 4294901760, %v5038_v52 }
0x1699   :  { %v5040_v48 = vsub.f32 %v5038_v52, %v5039_v33 }
0x169b   :  { %v5041_v49 = vand.u32 4294901760, %v5040_v48 }
0x169d   :  { %5042 = vmatpush.xpose.msra.mxu1 %v5041_v49 }
0x16a4   :  { %4988 = vrot.lane.b32.xlu1 %v9103_v15, %s8541_s5 }
0x16ac   :  { %5166 = vrot.lane.b32.xlu1 %v9103_v15, %s8544_s8 }
0x16b4   :  { %5320 = vrot.lane.b32.xlu1 %v9103_v15, %s8546_s10 }
0x16bc   :  { %5318 = vrot.lane.b32.xlu1 %v9103_v15, %s8545_s9 }
0x16fe   :  { %v4820_v51 = vpop.xlane.xlu1 %4819 }
0x16ff   :  { %8477 = vrcp.f32 %v4820_v51  ;;  %v4832_v25 = vand.u32 2147483648, %v4820_v51  ;;  %v4830_v32 = vand.u32 2147483647, %v4820_v51  ;;  %vm4826_vm14 = vweird.f32 %v4820_v51 }
0x1701   :  { %v4833_v61 = vor.u32 1.1754944e-38, %v4832_v25  ;;  %vm4831_vm2 = vcmp.eq.f32.partialorder %v4830_v32, 8.507059e+37 }
0x1705   :  { %v8478_v53 = vpop.eup %8477 }
0x1706   :  { %v4822_v2 = vmul.f32 %v8478_v53, %v4820_v51  ;;  %vm4827_vm13 = vweird.f32 %v8478_v53 }
0x1707   :  { %vm4828_vm15 = vmor %vm4826_vm14, %vm4827_vm13 }
0x1708   :  { %v4823_v3 = vsub.f32 1.0, %v4822_v2 }
0x170a   :  { %v4824_v30 = vmul.f32 %v8478_v53, %v4823_v3 }
0x170c   :  { %v4825_v29 = vadd.f32 %v8478_v53, %v4824_v30 }
0x170e   :  { %v4829_v14 = vsel %vm4828_vm15, %v8478_v53, %v4825_v29 }
0x170f   :  { %v4834_v12 = vsel %vm4831_vm2, %v4833_v61, %v4829_v14 }
0x1710   :  { %v9174_v45 = vmul.f32 %v8476_v42, %v4834_v12 }
0x1712   :  { %9714 = vst [vmem:[#allocation14_spill] sm:$0xff] %v9174_v45  ;;  %v4840_v21 = vsel %vm272_vm1, %v9174_v45, 0 }
0x1713   :  { %v4859_v34 = vand.u32 4294901760, %v4840_v21 }
0x1715   :  { %4890 = vmatmul.f32.vlgmr.msrb.gmra.mxu3 %v4859_v34  ;;  %v4860_v36 = vsub.f32 %v4840_v21, %v4859_v34 }
0x1716   :  { %5088 = vmatpush.xpose.msrb.mxu3 %v5011_v5  ;;  %v4989_v37 = vpop.permute.xlu1 %4988 }
0x1717   :  { %v4992_v39 = vsel %vm272_vm1, %v4989_v37, 0  ;;  %4914 = vmatmul.f32.vlgmr.msrb.gmra.mxu0 %v4860_v36  ;;  %v4861_v62 = vand.u32 4294901760, %v4860_v36 }
0x1718   :  { %v5013_v41 = vand.u32 4294901760, %v4992_v39  ;;  %5114 = vmatpush.xpose.msrb.mxu0 %v5039_v33 }
0x1719   :  { %4938 = vmatmul.f32.vlgmr.msrb.gmra.mxu1 %v4861_v62  ;;  %v4862_v60 = vsub.f32 %v4860_v36, %v4861_v62 }
0x171a   :  { %v5014_v11 = vsub.f32 %v4992_v39, %v5013_v41  ;;  %5136 = vmatpush.xpose.msrb.mxu1 %v5011_v5 }
0x171b   :  { %v4863_v19 = vand.u32 4294901760, %v4862_v60 }
0x171c   :  { %v5015_v8 = vand.u32 4294901760, %v5014_v11 }
0x171d   :  { %4864 = vmatmul.f32.vlgmr.msrb.gmra.mxu2 %v4863_v19  ;;  %4984 = vmatmul.f32.vlgmr.msra.gmra.mxu3 %v4859_v34 }
0x171e   :  { %v5016_v42 = vsub.f32 %v5014_v11, %v5015_v8  ;;  %5065 = vmatpush.xpose.msrb.mxu2 %v5038_v52  ;;  %v5167_v9 = vpop.permute.xlu1 %5166 }
0x171f   :  { %v5187_v23 = vand.u32 4294901760, %v5167_v9 }
0x1720   :  { %v5017_v24 = vand.u32 4294901760, %v5016_v42 }
0x1721   :  { %v5214_v48 = vsub.f32 %v5167_v9, %v5187_v23  ;;  %5044 = vmatmul.f32.vlgmr.msra.gmra.mxu1 %v5013_v41 }
0x1722   :  { %5264 = vmatpush.msra.mxu1 %v5187_v23  ;;  %5018 = vmatmul.f32.vlgmr.msra.gmra.mxu0 %v5017_v24 }
0x1723   :  { %v5215_v49 = vand.u32 4294901760, %v5214_v48  ;;  %5241 = vmatpush.msra.mxu0 %v5214_v48 }
0x1725   :  { %v5216_v33 = vsub.f32 %v5214_v48, %v5215_v49  ;;  %4962 = vmatmul.f32.vlgmr.msra.gmra.mxu2 %v4859_v34  ;;  %5092 = vmatmul.f32.vlgmr.msrb.gmra.mxu3 %v5015_v8 }
0x1726   :  { %5188 = vmatpush.msra.mxu2 %v5187_v23  ;;  %v5321_v5 = vpop.permute.xlu1 %5320 }
0x1727   :  { %v5217_v51 = vand.u32 4294901760, %v5216_v33  ;;  %v5324_v53 = vsel %vm272_vm1, %v5321_v5, 0  ;;  %v4193_v5 = vadd.f32 %v9099_v10, %v9101_v27 }
0x1728   :  { %v9180_v2 = vand.u32 4294901760, %v5324_v53 }
0x1729   :  { %5138 = vmatmul.f32.vlgmr.msrb.gmra.mxu1 %v5013_v41  ;;  %5218 = vmatpush.msra.mxu3 %v5217_v51  ;;  %v4228_v51 = vadd.f32 %v9129_v16, %v4193_v5 }
0x172a   :  { %v9183_v52 = vsub.f32 %v5324_v53, %v9180_v2  ;;  %5116 = vmatmul.f32.vlgmr.msrb.gmra.mxu0 %v5013_v41 }
0x172b   :  { %5312 = vmatpush.msrb.mxu3 %v5187_v23  ;;  %5342 = vmatpush.xpose.msrb.mxu0 %v9180_v2  ;;  %v4261_v53 = vadd.f32 %v9131_v18, %v4228_v51 }
0x172c   :  { %v5369_v3 = vand.u32 4294901760, %v9183_v52 }
0x172d   :  { %5068 = vmatmul.f32.vlgmr.msrb.gmra.mxu2 %v5014_v11 }
0x172e   :  { %v5370_v25 = vsub.f32 %v9183_v52, %v5369_v3  ;;  %5290 = vmatpush.msrb.mxu2 %v5215_v49 }
0x1730   :  { %v5371_v30 = vand.u32 4294901760, %v5370_v25  ;;  %v4298_v25 = vadd.f32 %v9133_v26, %v4261_v53 }
0x1732   :  { %5372 = vmatpush.xpose.msrb.mxu1 %v5371_v30  ;;  %v9210_v30 = vadd.f32 %v9135_v17, %v4298_v25 }
0x1794   :  { %v9194_v61 = vpop.f32.mrf.mxu0 }
0x1796   :  { %v9196_v14 = vpop.f32.mrf.mxu1 }
0x1798   :  { %v9190_v32 = vpop.f32.mrf.mxu3 }
0x179e   :  { %v5045_v36 = vpop.f32.mrf.mxu1 }
0x179f   :  { %v5019_v34 = vpop.f32.mrf.mxu0 }
0x17a0   :  { %v9192_v29 = vpop.f32.mrf.mxu2  ;;  %v9198_v12 = vpop.f32.mrf.mxu3  ;;  %v5046_v37 = vadd.f32 %v5045_v36, %v5019_v34 }
0x17a6   :  { %v5139_v8 = vpop.f32.mrf.mxu1 }
0x17a7   :  { %v5117_v11 = vpop.f32.mrf.mxu0 }
0x17a8   :  { %v9200_v21 = vpop.f32.mrf.mxu2  ;;  %v5093_v41 = vpop.f32.mrf.mxu3 }
0x17b0   :  { %v5069_v39 = vpop.f32.mrf.mxu2 }
0x17b1   :  { %v5070_v62 = vadd.f32 %v5069_v39, %v5046_v37  ;;  %v5319_v39 = vpop.permute.xlu1 %5318 }
0x17b2   :  { %v5322_v10 = vsel %vm272_vm1, %v5319_v39, 0 }
0x17b3   :  { %v5094_v60 = vadd.f32 %v5093_v41, %v5070_v62  ;;  %v5343_v26 = vand.u32 4294901760, %v5322_v10 }
0x17b5   :  { %v5118_v19 = vadd.f32 %v5117_v11, %v5094_v60 }
0x17b7   :  { %v5140_v42 = vadd.f32 %v5139_v8, %v5118_v19  ;;  %v5344_v8 = vsub.f32 %v5322_v10, %v5343_v26 }
0x17b9   :  { %v5142_v9 = vsel %vm272_vm1, %v5140_v42, -inf }
0x17ba   :  { %5143 = vmax.xlane.f32.xlu2 %v5142_v9 }
0x182d   :  { %v5144_v23 = vpop.xlane.xlu2 %5143 }
0x182e   :  { %v5145_v24 = vsub.f32 %v5140_v42, %v5144_v23  ;;  %v5345_v23 = vand.u32 4294901760, %v5344_v8 }
0x1830   :  { %v5146_v48 = vmul.f32 1.442695, %v5145_v24 }
0x1832   :  { %8479 = vpow2.f32 %v5146_v48 }
0x1838   :  { %v8480_v49 = vpop.eup %8479 }
0x1839   :  { %v5148_v33 = vsel %vm272_vm1, %v8480_v49, 0.0 }
0x183a   :  { %5149 = vadd.xlane.f32.xlu0 %v5148_v33  ;;  %v5346_v33 = vsub.f32 %v5344_v8, %v5345_v23 }
0x183c   :  { %v5347_v51 = vand.u32 4294901760, %v5346_v33 }
0x184e   :  { %5664 = vrot.lane.b32.xlu0 %v9210_v30, %s8538_s28 }
0x18ad   :  { %v5150_v34 = vpop.xlane.xlu0 %5149 }
0x18ae   :  { %8481 = vrcp.f32 %v5150_v34  ;;  %v5162_v41 = vand.u32 2147483648, %v5150_v34  ;;  %v5160_v16 = vand.u32 2147483647, %v5150_v34  ;;  %vm5156_vm4 = vweird.f32 %v5150_v34 }
0x18b0   :  { %v5163_v17 = vor.u32 1.1754944e-38, %v5162_v41  ;;  %vm5161_vm9 = vcmp.eq.f32.partialorder %v5160_v16, 8.507059e+37 }
0x18b4   :  { %v8482_v36 = vpop.eup %8481 }
0x18b5   :  { %v5152_v37 = vmul.f32 %v8482_v36, %v5150_v34  ;;  %vm5157_vm3 = vweird.f32 %v8482_v36 }
0x18b6   :  { %vm5158_vm5 = vmor %vm5156_vm4, %vm5157_vm3 }
0x18b7   :  { %v5153_v62 = vsub.f32 1.0, %v5152_v37 }
0x18b9   :  { %v5154_v27 = vmul.f32 %v8482_v36, %v5153_v62 }
0x18bb   :  { %v5155_v18 = vadd.f32 %v8482_v36, %v5154_v27 }
0x18bd   :  { %v5159_v60 = vsel %vm5158_vm5, %v8482_v36, %v5155_v18 }
0x18be   :  { %v5164_v11 = vsel %vm5161_vm9, %v5163_v17, %v5159_v60 }
0x18bf   :  { %v9215_v19 = vmul.f32 %v8480_v49, %v5164_v11 }
0x18c0   :  { %v5665_v11 = vpop.permute.xlu0 %5664 }
0x18c1   :  { %9715 = vst [vmem:[#allocation15_spill] sm:$0xff] %v9215_v19  ;;  %v5170_v42 = vsel %vm272_vm1, %v9215_v19, 0 }
0x18c2   :  { %v5189_v9 = vand.u32 4294901760, %v5170_v42 }
0x18c4   :  { %5220 = vmatmul.f32.vlgmr.msra.gmra.mxu3 %v5189_v9  ;;  %v5190_v24 = vsub.f32 %v5170_v42, %v5189_v9 }
0x18c5   :  { %5418 = vmatpush.xpose.msra.mxu3 %v9180_v2 }
0x18c6   :  { %5244 = vmatmul.f32.vlgmr.msra.gmra.mxu0 %v5190_v24  ;;  %v5191_v48 = vand.u32 4294901760, %v5190_v24 }
0x18c7   :  { %5444 = vmatpush.xpose.msra.mxu0 %v5369_v3 }
0x18c8   :  { %5268 = vmatmul.f32.vlgmr.msra.gmra.mxu1 %v5191_v48  ;;  %v5192_v5 = vsub.f32 %v5190_v24, %v5191_v48 }
0x18c9   :  { %5466 = vmatpush.xpose.msra.mxu1 %v9180_v2 }
0x18ca   :  { %v5193_v49 = vand.u32 4294901760, %v5192_v5 }
0x18cc   :  { %5194 = vmatmul.f32.vlgmr.msra.gmra.mxu2 %v5193_v49  ;;  %5314 = vmatmul.f32.vlgmr.msrb.gmra.mxu3 %v5189_v9 }
0x18cd   :  { %5395 = vmatpush.xpose.msra.mxu2 %v9183_v52 }
0x18ce   :  { %5348 = vmatmul.f32.vlgmr.msrb.gmra.mxu0 %v5347_v51 }
0x18d0   :  { %5374 = vmatmul.f32.vlgmr.msrb.gmra.mxu1 %v5343_v26 }
0x18d4   :  { %5292 = vmatmul.f32.vlgmr.msrb.gmra.mxu2 %v5189_v9  ;;  %5422 = vmatmul.f32.vlgmr.msra.gmra.mxu3 %v5345_v23 }
0x18d6   :  { %5446 = vmatmul.f32.vlgmr.msra.gmra.mxu0 %v5343_v26 }
0x18d8   :  { %5468 = vmatmul.f32.vlgmr.msra.gmra.mxu1 %v5343_v26 }
0x18dc   :  { %5398 = vmatmul.f32.vlgmr.msra.gmra.mxu2 %v5344_v8  ;;  %v5668_v8 = vsel %vm272_vm1, %v5665_v11, 0 }
0x18dd   :  { %v9240_v42 = vand.u32 4294901760, %v5668_v8 }
0x18df   :  { %v9243_v9 = vsub.f32 %v5668_v8, %v9240_v42  ;;  %v5666_v8 = vsel %vm272_vm1, %v9210_v30, 0 }
0x18e1   :  { %v5713_v48 = vand.u32 4294901760, %v9243_v9 }
0x18e3   :  { %v5714_v5 = vsub.f32 %v9243_v9, %v5713_v48 }
0x1943   :  { %v9226_v3 = vpop.f32.mrf.mxu0 }
0x1945   :  { %v9230_v2 = vpop.f32.mrf.mxu1 }
0x1947   :  { %v9224_v53 = vpop.f32.mrf.mxu3 }
0x194b   :  { %v5349_v52 = vpop.f32.mrf.mxu0 }
0x194d   :  { %v5375_v37 = vpop.f32.mrf.mxu1 }
0x194e   :  { %v5376_v39 = vadd.f32 %v5375_v37, %v5349_v52  ;;  %v5715_v52 = vand.u32 4294901760, %v5714_v5 }
0x194f   :  { %v9228_v25 = vpop.f32.mrf.mxu2  ;;  %v9232_v34 = vpop.f32.mrf.mxu3 }
0x1953   :  { %v5447_v16 = vpop.f32.mrf.mxu0 }
0x1955   :  { %v5469_v26 = vpop.f32.mrf.mxu1 }
0x1957   :  { %v9234_v36 = vpop.f32.mrf.mxu2  ;;  %v5423_v10 = vpop.f32.mrf.mxu3 }
0x195f   :  { %v5399_v62 = vpop.f32.mrf.mxu2 }
0x1960   :  { %v5400_v41 = vadd.f32 %v5399_v62, %v5376_v39 }
0x1962   :  { %v5424_v27 = vadd.f32 %v5423_v10, %v5400_v41 }
0x1964   :  { %v5448_v18 = vadd.f32 %v5447_v16, %v5424_v27 }
0x1966   :  { %v5470_v17 = vadd.f32 %v5469_v26, %v5448_v18 }
0x1968   :  { %v5472_v60 = vsel %vm272_vm1, %v5470_v17, -inf }
0x1969   :  { %5473 = vmax.xlane.f32.xlu2 %v5472_v60 }
0x1981   :  { %5496 = vrot.lane.b32.xlu2 %v9103_v15, %s8547_s11 }
0x19dc   :  { %v5474_v23 = vpop.xlane.xlu2 %5473 }
0x19dd   :  { %v5475_v24 = vsub.f32 %v5470_v17, %v5474_v23 }
0x19df   :  { %v5476_v33 = vmul.f32 1.442695, %v5475_v24 }
0x19e1   :  { %8483 = vpow2.f32 %v5476_v33  ;;  %v5687_v33 = vand.u32 4294901760, %v5666_v8 }
0x19e4   :  { %v5497_v49 = vpop.permute.xlu2 %5496 }
0x19e5   :  { %v5517_v51 = vand.u32 4294901760, %v5497_v49 }
0x19e7   :  { %v8484_v15 = vpop.eup %8483  ;;  %v5544_v37 = vsub.f32 %v5497_v49, %v5517_v51  ;;  %5518 = vmatpush.msrb.mxu2 %v5517_v51  ;;  %5594 = vmatpush.msrb.mxu1 %v5517_v51 }
0x19e8   :  { %v5478_v39 = vsel %vm272_vm1, %v8484_v15, 0.0 }
0x19e9   :  { %5716 = vmatpush.xpose.msra.mxu1 %v5715_v52  ;;  %v5545_v62 = vand.u32 4294901760, %v5544_v37  ;;  %5479 = vadd.xlane.f32.xlu1 %v5478_v39  ;;  %v5688_v52 = vsub.f32 %v5666_v8, %v5687_v33 }
0x19ea   :  { %5571 = vmatpush.msrb.mxu0 %v5544_v37 }
0x19eb   :  { %v5546_v41 = vsub.f32 %v5544_v37, %v5545_v62  ;;  %5620 = vmatpush.msra.mxu2 %v5545_v62 }
0x19ec   :  { %5686 = vmatpush.xpose.msra.mxu0 %v9240_v42 }
0x19ed   :  { %v5547_v10 = vand.u32 4294901760, %v5546_v41  ;;  %v5689_v41 = vand.u32 4294901760, %v5688_v52 }
0x19ef   :  { %5548 = vmatpush.msrb.mxu3 %v5547_v10 }
0x19f1   :  { %5642 = vmatpush.msra.mxu3 %v5517_v51 }
0x1a02   :  { %5840 = vrot.lane.b32.xlu1 %v9210_v30, %s8542_s6  ;;  %s8554_s6 = smov 128  }
0x1a0a   :  { %5992 = vrot.lane.b32.xlu1 %v9210_v30, %s8539_s29 }
0x1a5c   :  { %v5480_v27 = vpop.xlane.xlu1 %5479 }
0x1a5d   :  { %8485 = vrcp.f32 %v5480_v27  ;;  %v5492_v17 = vand.u32 2147483648, %v5480_v27  ;;  %v5490_v11 = vand.u32 2147483647, %v5480_v27  ;;  %vm5486_vm11 = vweird.f32 %v5480_v27 }
0x1a5f   :  { %v5493_v24 = vor.u32 1.1754944e-38, %v5492_v17  ;;  %vm5491_vm13 = vcmp.eq.f32.partialorder %v5490_v11, 8.507059e+37 }
0x1a63   :  { %v8486_v16 = vpop.eup %8485 }
0x1a64   :  { %v5482_v18 = vmul.f32 %v8486_v16, %v5480_v27  ;;  %vm5487_vm10 = vweird.f32 %v8486_v16 }
0x1a65   :  { %vm5488_vm12 = vmor %vm5486_vm11, %vm5487_vm10 }
0x1a66   :  { %v5483_v26 = vsub.f32 1.0, %v5482_v18 }
0x1a68   :  { %v5484_v60 = vmul.f32 %v8486_v16, %v5483_v26 }
0x1a6a   :  { %v5485_v23 = vadd.f32 %v8486_v16, %v5484_v60 }
0x1a6c   :  { %v5489_v5 = vsel %vm5488_vm12, %v8486_v16, %v5485_v23 }
0x1a6d   :  { %v5494_v49 = vsel %vm5491_vm13, %v5493_v24, %v5489_v5 }
0x1a6e   :  { %v9255_v51 = vmul.f32 %v8484_v15, %v5494_v49  ;;  %v5690_v15 = vsub.f32 %v5688_v52, %v5689_v41 }
0x1a70   :  { %9716 = vst [vmem:[#allocation16_spill] sm:$0xff] %v9255_v51  ;;  %v5500_v37 = vsel %vm272_vm1, %v9255_v51, 0  ;;  %v5691_v8 = vand.u32 4294901760, %v5690_v15 }
0x1a71   :  { %v5519_v39 = vand.u32 4294901760, %v5500_v37 }
0x1a73   :  { %5550 = vmatmul.f32.vlgmr.msrb.gmra.mxu3 %v5519_v39  ;;  %v5520_v62 = vsub.f32 %v5500_v37, %v5519_v39 }
0x1a74   :  { %5762 = vmatpush.xpose.msrb.mxu3 %v9240_v42  ;;  %v5841_v10 = vpop.permute.xlu1 %5840 }
0x1a75   :  { %v5861_v27 = vand.u32 4294901760, %v5841_v10  ;;  %5574 = vmatmul.f32.vlgmr.msrb.gmra.mxu0 %v5520_v62  ;;  %v5521_v18 = vand.u32 4294901760, %v5520_v62 }
0x1a76   :  { %5788 = vmatpush.xpose.msrb.mxu0 %v5713_v48 }
0x1a77   :  { %v5888_v16 = vsub.f32 %v5841_v10, %v5861_v27  ;;  %5598 = vmatmul.f32.vlgmr.msrb.gmra.mxu1 %v5521_v18  ;;  %v5522_v26 = vsub.f32 %v5520_v62, %v5521_v18 }
0x1a78   :  { %5810 = vmatpush.xpose.msrb.mxu1 %v9240_v42 }
0x1a79   :  { %v5889_v17 = vand.u32 4294901760, %v5888_v16  ;;  %v5523_v60 = vand.u32 4294901760, %v5522_v26 }
0x1a7b   :  { %v5890_v11 = vsub.f32 %v5888_v16, %v5889_v17  ;;  %5524 = vmatmul.f32.vlgmr.msrb.gmra.mxu2 %v5523_v60  ;;  %5644 = vmatmul.f32.vlgmr.msra.gmra.mxu3 %v5519_v39 }
0x1a7c   :  { %5739 = vmatpush.xpose.msrb.mxu2 %v9243_v9 }
0x1a7d   :  { %v5891_v23 = vand.u32 4294901760, %v5890_v11  ;;  %5692 = vmatmul.f32.vlgmr.msra.gmra.mxu0 %v5691_v8 }
0x1a7e   :  { %5915 = vmatpush.msra.mxu0 %v5888_v16 }
0x1a7f   :  { %5718 = vmatmul.f32.vlgmr.msra.gmra.mxu1 %v5687_v33  ;;  %5892 = vmatpush.msra.mxu3 %v5891_v23 }
0x1a80   :  { %5938 = vmatpush.msra.mxu1 %v5861_v27 }
0x1a83   :  { %5622 = vmatmul.f32.vlgmr.msra.gmra.mxu2 %v5519_v39  ;;  %5766 = vmatmul.f32.vlgmr.msrb.gmra.mxu3 %v5689_v41 }
0x1a84   :  { %5862 = vmatpush.msra.mxu2 %v5861_v27  ;;  %5986 = vmatpush.msrb.mxu3 %v5861_v27 }
0x1a85   :  { %5790 = vmatmul.f32.vlgmr.msrb.gmra.mxu0 %v5687_v33 }
0x1a87   :  { %5812 = vmatmul.f32.vlgmr.msrb.gmra.mxu1 %v5687_v33 }
0x1a8b   :  { %5742 = vmatmul.f32.vlgmr.msrb.gmra.mxu2 %v5688_v52 }
0x1a8c   :  { %5964 = vmatpush.msrb.mxu2 %v5889_v17 }
0x1af2   :  { %v9264_v48 = vpop.f32.mrf.mxu0 }
0x1af4   :  { %v9268_v9 = vpop.f32.mrf.mxu1 }
0x1af6   :  { %v9262_v42 = vpop.f32.mrf.mxu3 }
0x1afa   :  { %v5693_v37 = vpop.f32.mrf.mxu0 }
0x1afc   :  { %v5719_v39 = vpop.f32.mrf.mxu1 }
0x1afd   :  { %v5720_v62 = vadd.f32 %v5719_v39, %v5693_v37 }
0x1afe   :  { %v9266_v24 = vpop.f32.mrf.mxu2  ;;  %v9270_v5 = vpop.f32.mrf.mxu3 }
0x1b02   :  { %v5791_v27 = vpop.f32.mrf.mxu0 }
0x1b04   :  { %v5813_v16 = vpop.f32.mrf.mxu1 }
0x1b06   :  { %v9272_v49 = vpop.f32.mrf.mxu2  ;;  %v5767_v33 = vpop.f32.mrf.mxu3 }
0x1b0e   :  { %v5743_v41 = vpop.f32.mrf.mxu2 }
0x1b0f   :  { %v5744_v10 = vadd.f32 %v5743_v41, %v5720_v62 }
0x1b11   :  { %v5768_v52 = vadd.f32 %v5767_v33, %v5744_v10 }
0x1b13   :  { %v5792_v18 = vadd.f32 %v5791_v27, %v5768_v52 }
0x1b15   :  { %v5814_v26 = vadd.f32 %v5813_v16, %v5792_v18 }
0x1b17   :  { %v5816_v15 = vsel %vm272_vm1, %v5814_v26, -inf }
0x1b18   :  { %5817 = vmax.xlane.f32.xlu2 %v5816_v15 }
0x1b30   :  { %5994 = vrot.lane.b32.xlu2 %v9210_v30, %s8537_s27 }
0x1b38   :  { %6324 = vrot.lane.b32.xlu2 %v9210_v30, %s8543_s7 }
0x1b40   :  { %6322 = vrot.lane.b32.xlu2 %v9210_v30, %s8541_s5  ;;  %s8396_s5 = sshll.u32 %s9688_s3, 4  ;;  %s8397_s5 = int_to_ptr.hbm [resolvable:$true] %s8396_s5 }
0x1b8b   :  { %v5818_v17 = vpop.xlane.xlu2 %5817 }
0x1b8c   :  { %v5819_v60 = vsub.f32 %v5814_v26, %v5818_v17  ;;  %v5993_v26 = vpop.permute.xlu1 %5992 }
0x1b8e   :  { %v5820_v11 = vmul.f32 1.442695, %v5819_v60  ;;  %v5996_v60 = vsel %vm272_vm1, %v5993_v26, 0 }
0x1b8f   :  { %v6017_v6 = vand.u32 4294901760, %v5996_v60 }
0x1b90   :  { %8487 = vpow2.f32 %v5820_v11 }
0x1b91   :  { %v6018_v28 = vsub.f32 %v5996_v60, %v6017_v6 }
0x1b93   :  { %v5995_v8 = vpop.permute.xlu2 %5994  ;;  %v6019_v51 = vand.u32 4294901760, %v6018_v28 }
0x1b94   :  { %v5998_v23 = vsel %vm272_vm1, %v5995_v8, 0 }
0x1b95   :  { %v6015_v37 = vand.u32 4294901760, %v5998_v23 }
0x1b96   :  { %v8488_v39 = vpop.eup %8487 }
0x1b97   :  { %v6042_v62 = vsub.f32 %v5998_v23, %v6015_v37  ;;  %6016 = vmatpush.xpose.msrb.mxu0 %v6015_v37  ;;  %v5822_v41 = vsel %vm272_vm1, %v8488_v39, 0.0 }
0x1b98   :  { %5823 = vadd.xlane.f32.xlu0 %v5822_v41 }
0x1b99   :  { %v6043_v10 = vand.u32 4294901760, %v6042_v62 }
0x1b9b   :  { %v6044_v33 = vsub.f32 %v6042_v62, %v6043_v10 }
0x1b9d   :  { %v6045_v52 = vand.u32 4294901760, %v6044_v33 }
0x1b9f   :  { %6046 = vmatpush.xpose.msrb.mxu1 %v6045_v52 }
0x1c0b   :  { %v5824_v27 = vpop.xlane.xlu0 %5823 }
0x1c0c   :  { %8489 = vrcp.f32 %v5824_v27  ;;  %v5836_v17 = vand.u32 2147483648, %v5824_v27  ;;  %v5834_v8 = vand.u32 2147483647, %v5824_v27  ;;  %vm5830_vm15 = vweird.f32 %v5824_v27 }
0x1c0e   :  { %v5837_v41 = vor.u32 1.1754944e-38, %v5836_v17  ;;  %vm5835_vm3 = vcmp.eq.f32.partialorder %v5834_v8, 8.507059e+37 }
0x1c12   :  { %v8490_v18 = vpop.eup %8489 }
0x1c13   :  { %v5826_v16 = vmul.f32 %v8490_v18, %v5824_v27  ;;  %vm5831_vm14 = vweird.f32 %v8490_v18  ;;  %v6020_v27 = vsub.f32 %v6018_v28, %v6019_v51 }
0x1c14   :  { %vm5832_vm2 = vmor %vm5830_vm15, %vm5831_vm14 }
0x1c15   :  { %v5827_v15 = vsub.f32 1.0, %v5826_v16 }
0x1c17   :  { %v5828_v11 = vmul.f32 %v8490_v18, %v5827_v15 }
0x1c19   :  { %v5829_v23 = vadd.f32 %v8490_v18, %v5828_v11 }
0x1c1b   :  { %v5833_v38 = vsel %vm5832_vm2, %v8490_v18, %v5829_v23 }
0x1c1c   :  { %v5838_v33 = vsel %vm5835_vm3, %v5837_v41, %v5833_v38  ;;  %v6021_v38 = vand.u32 4294901760, %v6020_v27 }
0x1c1d   :  { %v9284_v52 = vmul.f32 %v8488_v39, %v5838_v33 }
0x1c1f   :  { %9717 = vst [vmem:[#allocation17_spill] sm:$0xff] %v9284_v52  ;;  %v5844_v16 = vsel %vm272_vm1, %v9284_v52, 0 }
0x1c20   :  { %v5863_v1 = vand.u32 4294901760, %v5844_v16 }
0x1c22   :  { %5894 = vmatmul.f32.vlgmr.msra.gmra.mxu3 %v5863_v1  ;;  %v5864_v26 = vsub.f32 %v5844_v16, %v5863_v1 }
0x1c23   :  { %6092 = vmatpush.xpose.msra.mxu3 %v6015_v37 }
0x1c24   :  { %5918 = vmatmul.f32.vlgmr.msra.gmra.mxu0 %v5864_v26  ;;  %v5865_v15 = vand.u32 4294901760, %v5864_v26 }
0x1c25   :  { %6118 = vmatpush.xpose.msra.mxu0 %v6043_v10 }
0x1c26   :  { %5942 = vmatmul.f32.vlgmr.msra.gmra.mxu1 %v5865_v15  ;;  %v5866_v17 = vsub.f32 %v5864_v26, %v5865_v15 }
0x1c27   :  { %6140 = vmatpush.xpose.msra.mxu1 %v6015_v37 }
0x1c28   :  { %v5867_v18 = vand.u32 4294901760, %v5866_v17  ;;  %v6325_v17 = vpop.permute.xlu2 %6324 }
0x1c29   :  { %v6328_v52 = vsel %vm272_vm1, %v6325_v17, 0 }
0x1c2a   :  { %5868 = vmatmul.f32.vlgmr.msra.gmra.mxu2 %v5867_v18  ;;  %5988 = vmatmul.f32.vlgmr.msrb.gmra.mxu3 %v5863_v1 }
0x1c2b   :  { %6069 = vmatpush.xpose.msra.mxu2 %v6042_v62 }
0x1c2c   :  { %6022 = vmatmul.f32.vlgmr.msrb.gmra.mxu0 %v6021_v38 }
0x1c2e   :  { %6048 = vmatmul.f32.vlgmr.msrb.gmra.mxu1 %v6017_v6 }
0x1c32   :  { %5966 = vmatmul.f32.vlgmr.msrb.gmra.mxu2 %v5863_v1  ;;  %6096 = vmatmul.f32.vlgmr.msra.gmra.mxu3 %v6019_v51 }
0x1c34   :  { %6120 = vmatmul.f32.vlgmr.msra.gmra.mxu0 %v6017_v6 }
0x1c36   :  { %6142 = vmatmul.f32.vlgmr.msra.gmra.mxu1 %v6017_v6 }
0x1c3a   :  { %6072 = vmatmul.f32.vlgmr.msra.gmra.mxu2 %v6018_v28 }
0x1ca1   :  { %v9290_v60 = vpop.f32.mrf.mxu0 }
0x1ca3   :  { %v9294_v11 = vpop.f32.mrf.mxu1 }
0x1ca5   :  { %v9288_v39 = vpop.f32.mrf.mxu3 }
0x1ca9   :  { %v6023_v62 = vpop.f32.mrf.mxu0 }
0x1cab   :  { %v6049_v23 = vpop.f32.mrf.mxu1 }
0x1cac   :  { %v6050_v41 = vadd.f32 %v6049_v23, %v6023_v62  ;;  %v6345_v23 = vand.u32 4294901760, %v6328_v52 }
0x1cad   :  { %v9292_v10 = vpop.f32.mrf.mxu2  ;;  %v9296_v37 = vpop.f32.mrf.mxu3 }
0x1cb1   :  { %v6121_v28 = vpop.f32.mrf.mxu0 }
0x1cb3   :  { %v6143_v26 = vpop.f32.mrf.mxu1 }
0x1cb5   :  { %v9298_v8 = vpop.f32.mrf.mxu2  ;;  %v6097_v33 = vpop.f32.mrf.mxu3 }
0x1cbd   :  { %v6073_v1 = vpop.f32.mrf.mxu2 }
0x1cbe   :  { %v6074_v51 = vadd.f32 %v6073_v1, %v6050_v41  ;;  %v9304_v41 = vsub.f32 %v6328_v52, %v6345_v23 }
0x1cc0   :  { %v6098_v6 = vadd.f32 %v6097_v33, %v6074_v51  ;;  %v6373_v33 = vand.u32 4294901760, %v9304_v41 }
0x1cc2   :  { %v6122_v16 = vadd.f32 %v6121_v28, %v6098_v6  ;;  %v6374_v6 = vsub.f32 %v9304_v41, %v6373_v33 }
0x1cc4   :  { %v6144_v15 = vadd.f32 %v6143_v26, %v6122_v16  ;;  %v6375_v26 = vand.u32 4294901760, %v6374_v6 }
0x1cc6   :  { %v6146_v27 = vsel %vm272_vm1, %v6144_v15, -inf }
0x1cc7   :  { %6147 = vmax.xlane.f32.xlu0 %v6146_v27 }
0x1cdb   :  { %6170 = vrot.lane.b32.xlu0 %v9210_v30, %s8540_s30 }
0x1d3a   :  { %v6148_v18 = vpop.xlane.xlu0 %6147 }
0x1d3b   :  { %v6149_v38 = vsub.f32 %v6144_v15, %v6148_v18 }
0x1d3d   :  { %v6150_v62 = vmul.f32 1.442695, %v6149_v38 }
0x1d3f   :  { %8491 = vpow2.f32 %v6150_v62 }
0x1d45   :  { %v8492_v1 = vpop.eup %8491 }
0x1d46   :  { %v6152_v51 = vsel %vm272_vm1, %v8492_v1, 0.0 }
0x1d47   :  { %6153 = vadd.xlane.f32.xlu1 %v6152_v51  ;;  %v6323_v51 = vpop.permute.xlu2 %6322 }
0x1d4d   :  { %v6171_v28 = vpop.permute.xlu0 %6170 }
0x1d4e   :  { %v6191_v16 = vand.u32 4294901760, %v6171_v28 }
0x1d50   :  { %v6218_v27 = vsub.f32 %v6171_v28, %v6191_v16  ;;  %6192 = vmatpush.msrb.mxu2 %v6191_v16  ;;  %6268 = vmatpush.msrb.mxu1 %v6191_v16 }
0x1d52   :  { %6376 = vmatpush.xpose.msra.mxu1 %v6375_v26  ;;  %v6219_v15 = vand.u32 4294901760, %v6218_v27  ;;  %6245 = vmatpush.msrb.mxu0 %v6218_v27  ;;  %v6326_v26 = vsel %vm272_vm1, %v6323_v51, 0 }
0x1d54   :  { %6346 = vmatpush.xpose.msra.mxu0 %v6345_v23  ;;  %v6220_v52 = vsub.f32 %v6218_v27, %v6219_v15  ;;  %6294 = vmatpush.msra.mxu2 %v6219_v15 }
0x1d56   :  { %v6221_v17 = vand.u32 4294901760, %v6220_v52 }
0x1d58   :  { %6222 = vmatpush.msrb.mxu3 %v6221_v17 }
0x1d5a   :  { %6316 = vmatpush.msra.mxu3 %v6191_v16  ;;  %v6347_v16 = vand.u32 4294901760, %v6326_v26 }
0x1d5c   :  { %v6348_v19 = vsub.f32 %v6326_v26, %v6347_v16 }
0x1d5e   :  { %v6349_v0 = vand.u32 4294901760, %v6348_v19 }
0x1d60   :  { %6500 = vrot.lane.b32.xlu1 %v9210_v30, %s8544_s8 }
0x1d68   :  { %6654 = vrot.lane.b32.xlu1 %v9210_v30, %s8546_s10 }
0x1dba   :  { %v6154_v18 = vpop.xlane.xlu1 %6153 }
0x1dbb   :  { %8493 = vrcp.f32 %v6154_v18  ;;  %v6166_v28 = vand.u32 2147483648, %v6154_v18  ;;  %v6164_v15 = vand.u32 2147483647, %v6154_v18  ;;  %vm6160_vm5 = vweird.f32 %v6154_v18 }
0x1dbd   :  { %v6167_v17 = vor.u32 1.1754944e-38, %v6166_v28  ;;  %vm6165_vm10 = vcmp.eq.f32.partialorder %v6164_v15, 8.507059e+37  ;;  %v6350_v28 = vsub.f32 %v6348_v19, %v6349_v0 }
0x1dbf   :  { %v6351_v26 = vand.u32 4294901760, %v6350_v28 }
0x1dc1   :  { %v8494_v38 = vpop.eup %8493 }
0x1dc2   :  { %v6156_v62 = vmul.f32 %v8494_v38, %v6154_v18  ;;  %vm6161_vm4 = vweird.f32 %v8494_v38 }
0x1dc3   :  { %vm6162_vm9 = vmor %vm6160_vm5, %vm6161_vm4 }
0x1dc4   :  { %v6157_v6 = vsub.f32 1.0, %v6156_v62 }
0x1dc6   :  { %v6158_v27 = vmul.f32 %v8494_v38, %v6157_v6 }
0x1dc8   :  { %v6159_v52 = vadd.f32 %v8494_v38, %v6158_v27 }
0x1dca   :  { %v6163_v35 = vsel %vm6162_vm9, %v8494_v38, %v6159_v52 }
0x1dcb   :  { %v6168_v55 = vsel %vm6165_vm10, %v6167_v17, %v6163_v35 }
0x1dcc   :  { %v9314_v45 = vmul.f32 %v8492_v1, %v6168_v55 }
0x1dce   :  { %9718 = vst [vmem:[#allocation18_spill] sm:$0xff] %v9314_v45  ;;  %v6174_v62 = vsel %vm272_vm1, %v9314_v45, 0 }
0x1dcf   :  { %v6193_v59 = vand.u32 4294901760, %v6174_v62 }
0x1dd1   :  { %6224 = vmatmul.f32.vlgmr.msrb.gmra.mxu3 %v6193_v59  ;;  %v6194_v51 = vsub.f32 %v6174_v62, %v6193_v59 }
0x1dd2   :  { %6422 = vmatpush.xpose.msrb.mxu3 %v6345_v23  ;;  %v6501_v6 = vpop.permute.xlu1 %6500 }
0x1dd3   :  { %v6521_v27 = vand.u32 4294901760, %v6501_v6  ;;  %6248 = vmatmul.f32.vlgmr.msrb.gmra.mxu0 %v6194_v51  ;;  %v6195_v18 = vand.u32 4294901760, %v6194_v51 }
0x1dd4   :  { %6448 = vmatpush.xpose.msrb.mxu0 %v6373_v33 }
0x1dd5   :  { %v6548_v38 = vsub.f32 %v6501_v6, %v6521_v27  ;;  %6272 = vmatmul.f32.vlgmr.msrb.gmra.mxu1 %v6195_v18  ;;  %v6196_v35 = vsub.f32 %v6194_v51, %v6195_v18 }
0x1dd6   :  { %6470 = vmatpush.xpose.msrb.mxu1 %v6345_v23 }
0x1dd7   :  { %v6549_v55 = vand.u32 4294901760, %v6548_v38  ;;  %v6197_v1 = vand.u32 4294901760, %v6196_v35 }
0x1dd9   :  { %v6550_v15 = vsub.f32 %v6548_v38, %v6549_v55  ;;  %6198 = vmatmul.f32.vlgmr.msrb.gmra.mxu2 %v6197_v1  ;;  %6318 = vmatmul.f32.vlgmr.msra.gmra.mxu3 %v6193_v59 }
0x1dda   :  { %6399 = vmatpush.xpose.msrb.mxu2 %v9304_v41  ;;  %v6655_v52 = vpop.permute.xlu1 %6654 }
0x1ddb   :  { %v6551_v17 = vand.u32 4294901760, %v6550_v15  ;;  %v6658_v62 = vsel %vm272_vm1, %v6655_v52, 0  ;;  %6352 = vmatmul.f32.vlgmr.msra.gmra.mxu0 %v6351_v26 }
0x1ddc   :  { %v9320_v45 = vand.u32 4294901760, %v6658_v62  ;;  %6575 = vmatpush.msra.mxu0 %v6548_v38 }
0x1ddd   :  { %6378 = vmatmul.f32.vlgmr.msra.gmra.mxu1 %v6347_v16  ;;  %6552 = vmatpush.msra.mxu3 %v6551_v17 }
0x1dde   :  { %v9323_v23 = vsub.f32 %v6658_v62, %v9320_v45  ;;  %6598 = vmatpush.msra.mxu1 %v6521_v27 }
0x1de0   :  { %v9703_v33 = vand.u32 4294901760, %v9323_v23 }
0x1de1   :  { %6296 = vmatmul.f32.vlgmr.msra.gmra.mxu2 %v6193_v59  ;;  %6426 = vmatmul.f32.vlgmr.msrb.gmra.mxu3 %v6349_v0 }
0x1de2   :  { %v6704_v41 = vsub.f32 %v9323_v23, %v9703_v33  ;;  %6522 = vmatpush.msra.mxu2 %v6521_v27  ;;  %6646 = vmatpush.msrb.mxu3 %v6521_v27 }
0x1de3   :  { %6450 = vmatmul.f32.vlgmr.msrb.gmra.mxu0 %v6347_v16 }
0x1de4   :  { %v6705_v51 = vand.u32 4294901760, %v6704_v41  ;;  %6676 = vmatpush.xpose.msrb.mxu0 %v9320_v45 }
0x1de5   :  { %6472 = vmatmul.f32.vlgmr.msrb.gmra.mxu1 %v6347_v16 }
0x1de6   :  { %6706 = vmatpush.xpose.msrb.mxu1 %v6705_v51 }
0x1de9   :  { %6402 = vmatmul.f32.vlgmr.msrb.gmra.mxu2 %v6348_v19 }
0x1dea   :  { %6624 = vmatpush.msrb.mxu2 %v6549_v55  ;;  %v4892_v55 = vadd.f32 %v9190_v32, %v9192_v29 }
0x1dec   :  { %v4916_v51 = vadd.f32 %v9194_v61, %v4892_v55 }
0x1dee   :  { %v4940_v7 = vadd.f32 %v9196_v14, %v4916_v51 }
0x1e50   :  { %v6249_v18 = vpop.f32.mrf.mxu0 }
0x1e52   :  { %v6273_v38 = vpop.f32.mrf.mxu1 }
0x1e54   :  { %v6225_v6 = vpop.f32.mrf.mxu3 }
0x1e58   :  { %v6353_v35 = vpop.f32.mrf.mxu0 }
0x1e5a   :  { %v6379_v1 = vpop.f32.mrf.mxu1 }
0x1e5b   :  { %v6380_v26 = vadd.f32 %v6379_v1, %v6353_v35  ;;  %v5222_v35 = vadd.f32 %v9224_v53, %v9228_v25  ;;  %v4964_v1 = vadd.f32 %v9200_v21, %v4940_v7 }
0x1e5c   :  { %v6199_v28 = vpop.f32.mrf.mxu2  ;;  %v6319_v59 = vpop.f32.mrf.mxu3 }
0x1e60   :  { %v6451_v62 = vpop.f32.mrf.mxu0 }
0x1e62   :  { %v6473_v33 = vpop.f32.mrf.mxu1 }
0x1e64   :  { %v6297_v0 = vpop.f32.mrf.mxu2  ;;  %v6427_v27 = vpop.f32.mrf.mxu3 }
0x1e6c   :  { %v6403_v15 = vpop.f32.mrf.mxu2 }
0x1e6d   :  { %v6404_v52 = vadd.f32 %v6403_v15, %v6380_v26  ;;  %v4986_v26 = vadd.f32 %v9198_v12, %v4964_v1 }
0x1e6f   :  { %v6428_v17 = vadd.f32 %v6427_v27, %v6404_v52  ;;  %v6226_v52 = vadd.f32 %v6225_v6, %v6199_v28 }
0x1e71   :  { %v6452_v41 = vadd.f32 %v6451_v62, %v6428_v17  ;;  %v6250_v29 = vadd.f32 %v6249_v18, %v6226_v52  ;;  %v9719_v52 = vand.u32 4294901760, %v9323_v23 }
0x1e73   :  { %v6474_v16 = vadd.f32 %v6473_v33, %v6452_v41  ;;  %v5246_v33 = vadd.f32 %v9226_v3, %v5222_v35  ;;  %v6274_v14 = vadd.f32 %v6273_v38, %v6250_v29 }
0x1e75   :  { %v6476_v19 = vsel %vm272_vm1, %v6474_v16, -inf  ;;  %v5270_v15 = vadd.f32 %v9230_v2, %v5246_v33  ;;  %v6298_v53 = vadd.f32 %v6297_v0, %v6274_v14 }
0x1e76   :  { %6477 = vmax.xlane.f32.xlu0 %v6476_v19 }
0x1e77   :  { %v5294_v32 = vadd.f32 %v9234_v36, %v5270_v15  ;;  %v6320_v25 = vadd.f32 %v6319_v59, %v6298_v53 }
0x1e79   :  { %v5316_v61 = vadd.f32 %v9232_v34, %v5294_v32 }
0x1e8a   :  { %6652 = vrot.lane.b32.xlu0 %v9210_v30, %s8545_s9 }
0x1e92   :  { %5649 = vrot.lane.b32.xlu0 %v4986_v26, %s8548_s12 }
0x1e9a   :  { %5653 = vrot.lane.b32.xlu0 %v5316_v61, %s8549_s13 }
0x1ea2   :  { %6983 = vrot.lane.b32.xlu0 %v6320_v25, %s8548_s12 }
0x1ee9   :  { %v6478_v7 = vpop.xlane.xlu0 %6477 }
0x1eea   :  { %v6479_v21 = vsub.f32 %v6474_v16, %v6478_v7 }
0x1eec   :  { %v6480_v12 = vmul.f32 1.442695, %v6479_v21 }
0x1eee   :  { %8495 = vpow2.f32 %v6480_v12 }
0x1ef4   :  { %v8496_v3 = vpop.eup %8495 }
0x1ef5   :  { %v6482_v2 = vsel %vm272_vm1, %v8496_v3, 0.0 }
0x1ef6   :  { %6483 = vadd.xlane.f32.xlu2 %v6482_v2 }
0x1efc   :  { %v6653_v34 = vpop.permute.xlu0 %6652 }
0x1efd   :  { %v6656_v0 = vsel %vm272_vm1, %v6653_v34, 0 }
0x1efe   :  { %v6677_v62 = vand.u32 4294901760, %v6656_v0 }
0x1f00   :  { %v6678_v51 = vsub.f32 %v6656_v0, %v6677_v62 }
0x1f02   :  { %v6679_v33 = vand.u32 4294901760, %v6678_v51 }
0x1f04   :  { %v6680_v32 = vsub.f32 %v6678_v51, %v6679_v33 }
0x1f06   :  { %v6681_v14 = vand.u32 4294901760, %v6680_v32 }
0x1f69   :  { %v6484_v6 = vpop.xlane.xlu2 %6483 }
0x1f6a   :  { %8497 = vrcp.f32 %v6484_v6  ;;  %v6496_v38 = vand.u32 2147483648, %v6484_v6  ;;  %v6494_v27 = vand.u32 2147483647, %v6484_v6  ;;  %vm6490_vm12 = vweird.f32 %v6484_v6 }
0x1f6c   :  { %v6497_v41 = vor.u32 1.1754944e-38, %v6496_v38  ;;  %vm6495_vm14 = vcmp.eq.f32.partialorder %v6494_v27, 8.507059e+37 }
0x1f70   :  { %v8498_v36 = vpop.eup %8497 }
0x1f71   :  { %v6486_v18 = vmul.f32 %v8498_v36, %v6484_v6  ;;  %vm6491_vm11 = vweird.f32 %v8498_v36 }
0x1f72   :  { %vm6492_vm13 = vmor %vm6490_vm12, %vm6491_vm11 }
0x1f73   :  { %v6487_v28 = vsub.f32 1.0, %v6486_v18 }
0x1f75   :  { %v6488_v59 = vmul.f32 %v8498_v36, %v6487_v28 }
0x1f77   :  { %v6489_v17 = vadd.f32 %v8498_v36, %v6488_v59 }
0x1f79   :  { %v6493_v16 = vsel %vm6492_vm13, %v8498_v36, %v6489_v17  ;;  %v5552_v17 = vadd.f32 %v9262_v42, %v9266_v24 }
0x1f7a   :  { %v6498_v19 = vsel %vm6495_vm14, %v6497_v41, %v6493_v16 }
0x1f7b   :  { %v9350_v55 = vmul.f32 %v8496_v3, %v6498_v19 }
0x1f7d   :  { %v6504_v35 = vsel %vm272_vm1, %v9350_v55, 0 }
0x1f7e   :  { %v6523_v1 = vand.u32 4294901760, %v6504_v35 }
0x1f80   :  { %6554 = vmatmul.f32.vlgmr.msra.gmra.mxu3 %v6523_v1  ;;  %v6524_v26 = vsub.f32 %v6504_v35, %v6523_v1 }
0x1f81   :  { %6752 = vmatpush.xpose.msra.mxu3 %v9320_v45 }
0x1f82   :  { %6578 = vmatmul.f32.vlgmr.msra.gmra.mxu0 %v6524_v26  ;;  %v6525_v15 = vand.u32 4294901760, %v6524_v26 }
0x1f83   :  { %6778 = vmatpush.xpose.msra.mxu0 %v9719_v52 }
0x1f84   :  { %6602 = vmatmul.f32.vlgmr.msra.gmra.mxu1 %v6525_v15  ;;  %v6526_v29 = vsub.f32 %v6524_v26, %v6525_v15 }
0x1f85   :  { %6800 = vmatpush.xpose.msra.mxu1 %v9320_v45 }
0x1f86   :  { %v6527_v61 = vand.u32 4294901760, %v6526_v29 }
0x1f88   :  { %6528 = vmatmul.f32.vlgmr.msra.gmra.mxu2 %v6527_v61  ;;  %6648 = vmatmul.f32.vlgmr.msrb.gmra.mxu3 %v6523_v1  ;;  %v4092_v61 = vld [vmem:[%s9687_s2 + $0xda] sm:$0xff] }
0x1f89   :  { %6729 = vmatpush.xpose.msra.mxu2 %v9323_v23 }
0x1f8a   :  { %6682 = vmatmul.f32.vlgmr.msrb.gmra.mxu0 %v6681_v14  ;;  %v9377_v14 = vand.u32 4294901760, %v4092_v61 }
0x1f8c   :  { %6708 = vmatmul.f32.vlgmr.msrb.gmra.mxu1 %v6677_v62 }
0x1f90   :  { %6626 = vmatmul.f32.vlgmr.msrb.gmra.mxu2 %v6523_v1  ;;  %6756 = vmatmul.f32.vlgmr.msra.gmra.mxu3 %v6679_v33 }
0x1f92   :  { %6780 = vmatmul.f32.vlgmr.msra.gmra.mxu0 %v6677_v62 }
0x1f94   :  { %6802 = vmatmul.f32.vlgmr.msra.gmra.mxu1 %v6677_v62  ;;  %v5576_v62 = vadd.f32 %v9264_v48, %v5552_v17 }
0x1f96   :  { %v5600_v41 = vadd.f32 %v9268_v9, %v5576_v62 }
0x1f98   :  { %6732 = vmatmul.f32.vlgmr.msra.gmra.mxu2 %v6678_v51  ;;  %v5624_v19 = vadd.f32 %v9272_v49, %v5600_v41 }
0x1f9a   :  { %v5646_v35 = vadd.f32 %v9270_v5, %v5624_v19 }
0x1fff   :  { %v6579_v25 = vpop.f32.mrf.mxu0 }
0x2001   :  { %v6603_v21 = vpop.f32.mrf.mxu1 }
0x2003   :  { %v6555_v53 = vpop.f32.mrf.mxu3 }
0x2007   :  { %v6683_v45 = vpop.f32.mrf.mxu0 }
0x2009   :  { %v6709_v2 = vpop.f32.mrf.mxu1 }
0x200a   :  { %v6710_v6 = vadd.f32 %v6709_v2, %v6683_v45 }
0x200b   :  { %v6529_v7 = vpop.f32.mrf.mxu2  ;;  %v6649_v12 = vpop.f32.mrf.mxu3 }
0x200c   :  { %v6556_v16 = vadd.f32 %v6555_v53, %v6529_v7  ;;  %v4091_v53 = vld [vmem:[%s9687_s2 + $0xd2] sm:$0xff] }
0x200d   :  { %v9386_v7 = vand.u32 4294901760, %v4091_v53 }
0x200e   :  { %v6580_v51 = vadd.f32 %v6579_v25, %v6556_v16  ;;  %v9384_v25 = vsub.f32 %v4092_v61, %v9377_v14 }
0x200f   :  { %v6781_v28 = vpop.f32.mrf.mxu0  ;;  %v9398_v2 = vsub.f32 %v4091_v53, %v9386_v7 }
0x2010   :  { %v6604_v1 = vadd.f32 %v6603_v21, %v6580_v51  ;;  %v4562_v21 = vadd.f32 %v9149_v40, %v9153_v31 }
0x2011   :  { %v6803_v0 = vpop.f32.mrf.mxu1  ;;  %v7090_v40 = vand.u32 4294901760, %v9398_v2 }
0x2013   :  { %v6627_v3 = vpop.f32.mrf.mxu2  ;;  %v6757_v34 = vpop.f32.mrf.mxu3 }
0x2014   :  { %v6628_v33 = vadd.f32 %v6627_v3, %v6604_v1  ;;  %v7084_v3 = vand.u32 4294901760, %v9384_v25 }
0x2016   :  { %v6650_v26 = vadd.f32 %v6649_v12, %v6628_v33  ;;  %v4090_v12 = vld [vmem:[%s9687_s2 + $0xca] sm:$0xff] }
0x2017   :  { %v9395_v45 = vand.u32 4294901760, %v4090_v12 }
0x201b   :  { %v6733_v36 = vpop.f32.mrf.mxu2 }
0x201c   :  { %v6734_v18 = vadd.f32 %v6733_v36, %v6710_v6  ;;  %v4089_v6 = vld [vmem:[%s9687_s2 + $0xc2] sm:$0xff]  ;;  %v7085_v36 = vsub.f32 %v9384_v25, %v7084_v3 }
0x201d   :  { %v9406_v31 = vand.u32 4294901760, %v4089_v6 }
0x201e   :  { %v6758_v23 = vadd.f32 %v6757_v34, %v6734_v18  ;;  %v9409_v18 = vsub.f32 %v4090_v12, %v9395_v45  ;;  %v4586_v34 = vadd.f32 %v9151_v43, %v4562_v21 }
0x2020   :  { %v6782_v38 = vadd.f32 %v6781_v28, %v6758_v23  ;;  %v5650_v23 = vpop.permute.xlu0 %5649  ;;  %v7086_v28 = vand.u32 4294901760, %v7085_v36  ;;  %v4610_v62 = vadd.f32 %v9155_v47, %v4586_v34 }
0x2022   :  { %v6804_v59 = vadd.f32 %v6803_v0, %v6782_v38  ;;  %v7091_v38 = vsub.f32 %v9398_v2, %v7090_v40  ;;  %v7096_v0 = vand.u32 4294901760, %v9409_v18  ;;  %v4634_v51 = vadd.f32 %v9159_v63, %v4610_v62 }
0x2024   :  { %v6806_v27 = vsel %vm272_vm1, %v6804_v59, -inf  ;;  %v7097_v17 = vsub.f32 %v9409_v18, %v7096_v0  ;;  %v4656_v1 = vadd.f32 %v9157_v56, %v4634_v51 }
0x2025   :  { %6807 = vmax.xlane.f32.xlu2 %v6806_v27  ;;  %v7092_v27 = vand.u32 4294901760, %v7091_v38 }
0x2026   :  { %v7098_v16 = vand.u32 4294901760, %v7097_v17  ;;  %v5660_v47 = vsel %vm272_vm1, %v4656_v1, %v5650_v23 }
0x2028   :  { %v5654_v33 = vpop.permute.xlu0 %5653 }
0x203d   :  { %6830 = vrot.lane.b32.xlu2 %v9210_v30, %s8547_s11 }
0x2045   :  { %5657 = vrot.lane.b32.xlu2 %v5646_v35, %s8550_s14 }
0x204d   :  { %6987 = vrot.lane.b32.xlu2 %v6650_v26, %s8549_s13 }
0x2098   :  { %v6808_v42 = vpop.xlane.xlu2 %6807 }
0x2099   :  { %v6809_v48 = vsub.f32 %v6804_v59, %v6808_v42  ;;  %v9418_v59 = vsub.f32 %v4089_v6, %v9406_v31 }
0x209b   :  { %v6810_v24 = vmul.f32 1.442695, %v6809_v48  ;;  %v7102_v43 = vand.u32 4294901760, %v9418_v59  ;;  %v5661_v48 = vsel %vm1602_vm6, %v5660_v47, %v5654_v33 }
0x209d   :  { %8499 = vpow2.f32 %v6810_v24  ;;  %v7103_v19 = vsub.f32 %v9418_v59, %v7102_v43 }
0x209f   :  { %v7104_v35 = vand.u32 4294901760, %v7103_v19 }
0x20a0   :  { %v6831_v9 = vpop.permute.xlu2 %6830 }
0x20a1   :  { %v6851_v15 = vand.u32 4294901760, %v6831_v9 }
0x20a3   :  { %v9370_v52 = vpop.eup %8499  ;;  %v6878_v30 = vsub.f32 %v6831_v9, %v6851_v15  ;;  %6852 = vmatpush.msrb.mxu2 %v6851_v15  ;;  %6928 = vmatpush.msrb.mxu1 %v6851_v15 }
0x20a4   :  { %v6812_v5 = vsel %vm272_vm1, %v9370_v52, 0.0 }
0x20a5   :  { %v6879_v49 = vand.u32 4294901760, %v6878_v30  ;;  %6813 = vadd.xlane.f32.xlu1 %v6812_v5  ;;  %6905 = vmatpush.msrb.mxu0 %v6878_v30 }
0x20a6   :  { %7087 = vmatpush.msra.mxu1 %v7086_v28 }
0x20a7   :  { %v6880_v32 = vsub.f32 %v6878_v30, %v6879_v49  ;;  %6954 = vmatpush.msra.mxu2 %v6879_v49  ;;  %7046 = vmatpush.msra.mxu0 %v9377_v14 }
0x20a8   :  { %7093 = vmatpush.msra.mxu1 %v7092_v27  ;;  %v5658_v26 = vpop.permute.xlu2 %5657 }
0x20a9   :  { %v6881_v29 = vand.u32 4294901760, %v6880_v32  ;;  %7048 = vmatpush.msra.mxu0 %v9386_v7  ;;  %v5662_v9 = vsel %vm1604_vm7, %v5661_v48, %v5658_v26 }
0x20aa   :  { %7099 = vmatpush.msra.mxu1 %v7098_v16  ;;  %v7028_v63 = vsel %vm46_vm0, %v5662_v9, 0  ;;  %v6984_v16 = vpop.permute.xlu0 %6983 }
0x20ab   :  { %6882 = vmatpush.msrb.mxu3 %v6881_v29  ;;  %7050 = vmatpush.msra.mxu0 %v9395_v45  ;;  %v9434_v56 = vand.u32 4294901760, %v7028_v63 }
0x20ac   :  { %7105 = vmatpush.msra.mxu1 %v7104_v35 }
0x20ad   :  { %6976 = vmatpush.msra.mxu3 %v6851_v15  ;;  %7052 = vmatpush.msra.mxu0 %v9406_v31  ;;  %v7054_v12 = vsub.f32 %v7028_v63, %v9434_v56 }
0x20af   :  { %v7055_v34 = vand.u32 4294901760, %v7054_v12 }
0x20b0   :  { %v6988_v35 = vpop.permute.xlu2 %6987 }
0x20b1   :  { %v7056_v38 = vsub.f32 %v7054_v12, %v7055_v34 }
0x20b3   :  { %v7057_v17 = vand.u32 4294901760, %v7056_v38 }
0x2118   :  { %v6814_v41 = vpop.xlane.xlu1 %6813 }
0x2119   :  { %8501 = vrcp.f32 %v6814_v41  ;;  %v6826_v30 = vand.u32 2147483648, %v6814_v41  ;;  %v6824_v49 = vand.u32 2147483647, %v6814_v41  ;;  %vm6820_vm2 = vweird.f32 %v6814_v41 }
0x211b   :  { %v6827_v29 = vor.u32 1.1754944e-38, %v6826_v30  ;;  %vm6825_vm4 = vcmp.eq.f32.partialorder %v6824_v49, 8.507059e+37 }
0x211f   :  { %v8502_v42 = vpop.eup %8501 }
0x2120   :  { %v6816_v24 = vmul.f32 %v8502_v42, %v6814_v41  ;;  %vm6821_vm15 = vweird.f32 %v8502_v42 }
0x2121   :  { %vm6822_vm3 = vmor %vm6820_vm2, %vm6821_vm15  ;;  %vm2965_vm15 = vcmask 326656   ;;  %vm2969_vm2 = vcmask 457728  }
0x2122   :  { %v6817_v15 = vsub.f32 1.0, %v6816_v24 }
0x2124   :  { %v6818_v5 = vmul.f32 %v8502_v42, %v6817_v15 }
0x2126   :  { %v6819_v32 = vadd.f32 %v8502_v42, %v6818_v5 }
0x2128   :  { %v6823_v61 = vsel %vm6822_vm3, %v8502_v42, %v6819_v32  ;;  %vm2967_vm3 = vcmask 392192  }
0x2129   :  { %v6828_v53 = vsel %vm6825_vm4, %v6827_v29, %v6823_v61 }
0x212a   :  { %v9437_v21 = vmul.f32 %v9370_v52, %v6828_v53 }
0x212c   :  { %v6834_v6 = vsel %vm272_vm1, %v9437_v21, 0 }
0x212d   :  { %v6853_v36 = vand.u32 4294901760, %v6834_v6 }
0x212f   :  { %6884 = vmatmul.f32.vlgmr.msrb.gmra.mxu3 %v6853_v36  ;;  %v6854_v23 = vsub.f32 %v6834_v6, %v6853_v36 }
0x2130   :  { %7163 = vmatpush.msrb.mxu3 %v9377_v14 }
0x2131   :  { %6908 = vmatmul.f32.vlgmr.msrb.gmra.mxu0 %v6854_v23  ;;  %v6855_v28 = vand.u32 4294901760, %v6854_v23 }
0x2132   :  { %7165 = vmatpush.msrb.mxu3 %v9386_v7  ;;  %7198 = vmatpush.msrb.mxu0 %v7084_v3 }
0x2133   :  { %6932 = vmatmul.f32.vlgmr.msrb.gmra.mxu1 %v6855_v28  ;;  %v6856_v52 = vsub.f32 %v6854_v23, %v6855_v28 }
0x2134   :  { %7167 = vmatpush.msrb.mxu3 %v9395_v45  ;;  %7233 = vmatpush.msrb.mxu1 %v9377_v14 }
0x2135   :  { %v6857_v27 = vand.u32 4294901760, %v6856_v52  ;;  %7202 = vmatpush.msrb.mxu0 %v7090_v40 }
0x2136   :  { %7169 = vmatpush.msrb.mxu3 %v9406_v31  ;;  %7235 = vmatpush.msrb.mxu1 %v9386_v7 }
0x2137   :  { %6858 = vmatmul.f32.vlgmr.msrb.gmra.mxu2 %v6857_v27  ;;  %6978 = vmatmul.f32.vlgmr.msra.gmra.mxu3 %v6853_v36 }
0x2138   :  { %7129 = vmatpush.msrb.mxu2 %v9384_v25  ;;  %7237 = vmatpush.msrb.mxu1 %v9395_v45 }
0x2139   :  { %7058 = vmatmul.f32.vlgmr.msra.gmra.mxu0 %v7057_v17 }
0x213a   :  { %7132 = vmatpush.msrb.mxu2 %v9398_v2  ;;  %7239 = vmatpush.msrb.mxu1 %v9406_v31 }
0x213b   :  { %7107 = vmatmul.f32.vlgmr.msra.gmra.mxu1 %v9434_v56  ;;  %7206 = vmatpush.msrb.mxu0 %v7096_v0 }
0x213c   :  { %7135 = vmatpush.msrb.mxu2 %v9409_v18  ;;  %v5896_v18 = vadd.f32 %v9288_v39, %v9292_v10 }
0x213d   :  { %7210 = vmatpush.msrb.mxu0 %v7102_v43 }
0x213e   :  { %7138 = vmatpush.msrb.mxu2 %v9418_v59  ;;  %v5920_v59 = vadd.f32 %v9290_v60, %v5896_v18 }
0x213f   :  { %6956 = vmatmul.f32.vlgmr.msra.gmra.mxu2 %v6853_v36  ;;  %7173 = vmatmul.f32.vlgmr.msrb.gmra.mxu3 %v7055_v34 }
0x2140   :  { %v5944_v43 = vadd.f32 %v9294_v11, %v5920_v59 }
0x2142   :  { %v5968_v19 = vadd.f32 %v9298_v8, %v5944_v43  ;;  %v4094_v43 = vld [vmem:[%s9687_s2 + $0xea] sm:$0xff] }
0x2144   :  { %v5990_v51 = vadd.f32 %v9296_v37, %v5968_v19 }
0x2146   :  { %v6994_v1 = vsel %vm272_vm1, %v5990_v51, %v6984_v16  ;;  %v7464_v51 = vand.u32 4294901760, %v4094_v43 }
0x2147   :  { %7141 = vmatmul.f32.vlgmr.msrb.gmra.mxu2 %v7054_v12  ;;  %v6995_v33 = vsel %vm1602_vm6, %v6994_v1, %v6988_v35  ;;  %v4093_v35 = vld [vmem:[%s9687_s2 + $0xe2] sm:$0xff] }
0x21ae   :  { %v6909_v3 = vpop.f32.mrf.mxu0 }
0x21b0   :  { %v6933_v2 = vpop.f32.mrf.mxu1 }
0x21b2   :  { %v6885_v14 = vpop.f32.mrf.mxu3 }
0x21b6   :  { %v7059_v48 = vpop.f32.mrf.mxu0 }
0x21b8   :  { %v7108_v37 = vpop.f32.mrf.mxu1 }
0x21b9   :  { %v7109_v30 = vadd.f32 %v7108_v37, %v7059_v48 }
0x21ba   :  { %v6859_v25 = vpop.f32.mrf.mxu2  ;;  %v6979_v0 = vpop.f32.mrf.mxu3 }
0x21bb   :  { %v6886_v7 = vadd.f32 %v6885_v14, %v6859_v25 }
0x21bd   :  { %v6910_v45 = vadd.f32 %v6909_v3, %v6886_v7 }
0x21bf   :  { %v6934_v40 = vadd.f32 %v6933_v2, %v6910_v45 }
0x21c2   :  { %v6957_v31 = vpop.f32.mrf.mxu2  ;;  %v7174_v5 = vpop.f32.mrf.mxu3 }
0x21c3   :  { %v6958_v62 = vadd.f32 %v6957_v31, %v6934_v40 }
0x21c5   :  { %v6980_v41 = vadd.f32 %v6979_v0, %v6958_v62  ;;  %v4096_v62 = vld [vmem:[%s9687_s2 + $0xfa] sm:$0xff] }
0x21c6   :  { %v7460_v0 = vand.u32 4294901760, %v4096_v62 }
0x21c7   :  { %6991 = vrot.lane.b32.xlu0 %v6980_v41, %s8550_s14  ;;  %v4095_v41 = vld [vmem:[%s9687_s2 + $0xf2] sm:$0xff] }
0x21c8   :  { %v7498_v18 = vsub.f32 %v4096_v62, %v7460_v0  ;;  %v7462_v59 = vand.u32 4294901760, %v4095_v41 }
0x21ca   :  { %v7142_v9 = vpop.f32.mrf.mxu2  ;;  %v7499_v16 = vand.u32 4294901760, %v7498_v18  ;;  %v7504_v19 = vsub.f32 %v4095_v41, %v7462_v59 }
0x21cb   :  { %v7143_v63 = vadd.f32 %v7142_v9, %v7109_v30 }
0x21cc   :  { %v7500_v1 = vsub.f32 %v7498_v18, %v7499_v16 }
0x21cd   :  { %v7175_v32 = vadd.f32 %v7174_v5, %v7143_v63 }
0x2239   :  { %v6992_v26 = vpop.permute.xlu0 %6991 }
0x223a   :  { %v6996_v42 = vsel %vm1604_vm7, %v6995_v33, %v6992_v26  ;;  %v7505_v33 = vand.u32 4294901760, %v7504_v19  ;;  %v7510_v26 = vsub.f32 %v4094_v43, %v7464_v51 }
0x223b   :  { %v7031_v47 = vsel %vm46_vm0, %v6996_v42, 0  ;;  %v7466_v42 = vand.u32 4294901760, %v4093_v35 }
0x223c   :  { %v7061_v39 = vand.u32 4294901760, %v7031_v47 }
0x223e   :  { %v7062_v10 = vsub.f32 %v7031_v47, %v7061_v39  ;;  %7111 = vmatmul.f32.gmra.mxu1 %v7061_v39  ;;  %v7501_v47 = vand.u32 4294901760, %v7500_v1 }
0x2240   :  { %7146 = vmatmul.f32.gmra.mxu2 %v7062_v10  ;;  %v7063_v60 = vand.u32 4294901760, %v7062_v10 }
0x2242   :  { %7179 = vmatmul.f32.gmra.mxu3 %v7063_v60  ;;  %v7064_v11 = vsub.f32 %v7062_v10, %v7063_v60  ;;  %v7511_v10 = vand.u32 4294901760, %v7510_v26  ;;  %v7516_v60 = vsub.f32 %v4093_v35, %v7466_v42  ;;  %v4103_v35 = vld [vmem:[%s9687_s2 + $0x12b] sm:$0xff] }
0x2244   :  { %v7065_v8 = vand.u32 4294901760, %v7064_v11  ;;  %v7517_v37 = vand.u32 4294901760, %v7516_v60 }
0x2246   :  { %7066 = vmatmul.f32.gmra.mxu0 %v7065_v8  ;;  %7241 = vmatmul.f32.vlgmr.msrb.gmra.mxu1 %v9434_v56  ;;  %v7512_v8 = vsub.f32 %v7510_v26, %v7511_v10 }
0x2248   :  { %v7513_v48 = vand.u32 4294901760, %v7512_v8 }
0x224e   :  { %7212 = vmatmul.f32.vlgmr.msrb.gmra.mxu0 %v9434_v56  ;;  %7245 = vmatmul.f32.gmra.mxu1 %v7061_v39 }
0x2256   :  { %7216 = vmatmul.f32.gmra.mxu0 %v7061_v39  ;;  %v7506_v39 = vsub.f32 %v7504_v19, %v7505_v33 }
0x2258   :  { %v7507_v11 = vand.u32 4294901760, %v7506_v39 }
0x22bb   :  { %v7112_v24 = vpop.f32.mrf.mxu1 }
0x22c3   :  { %v7067_v15 = vpop.f32.mrf.mxu0  ;;  %v7242_v29 = vpop.f32.mrf.mxu1 }
0x22c4   :  { %v7113_v49 = vadd.f32 %v7112_v24, %v7067_v15  ;;  %v7147_v12 = vpop.f32.mrf.mxu2  ;;  %v7518_v24 = vsub.f32 %v7516_v60, %v7517_v37 }
0x22c5   :  { %v7180_v34 = vpop.f32.mrf.mxu3 }
0x22c6   :  { %v7148_v6 = vadd.f32 %v7147_v12, %v7113_v49  ;;  %v7519_v9 = vand.u32 4294901760, %v7518_v24 }
0x22c8   :  { %v7181_v23 = vadd.f32 %v7180_v34, %v7148_v6 }
0x22cb   :  { %v7213_v61 = vpop.f32.mrf.mxu0  ;;  %v7246_v27 = vpop.f32.mrf.mxu1 }
0x22cc   :  { %v7214_v53 = vadd.f32 %v7213_v61, %v7175_v32 }
0x22ce   :  { %v7243_v36 = vadd.f32 %v7242_v29, %v7214_v53 }
0x22d0   :  { %v7249_v56 = vadd.f32 %v7243_v36, %v9091_v22 }
0x22d2   :  { %v7267_v38 = vand.u32 4294901760, %v7249_v56 }
0x22d3   :  { %v7217_v28 = vpop.f32.mrf.mxu0 }
0x22d4   :  { %v7218_v52 = vadd.f32 %v7217_v28, %v7181_v23  ;;  %v7307_v25 = vsub.f32 %v7249_v56, %v7267_v38 }
0x22d6   :  { %v7247_v17 = vadd.f32 %v7246_v27, %v7218_v52  ;;  %v7308_v45 = vand.u32 4294901760, %v7307_v25 }
0x22d8   :  { %v7250_v14 = vadd.f32 %v7247_v17, %v9095_v4  ;;  %v7309_v40 = vsub.f32 %v7307_v25, %v7308_v45 }
0x22da   :  { %v7265_v7 = vand.u32 4294901760, %v7250_v14  ;;  %v7310_v31 = vand.u32 4294901760, %v7309_v40 }
0x22dc   :  { %v7301_v3 = vsub.f32 %v7250_v14, %v7265_v7  ;;  %7266 = vmatpush.msra.mxu2 %v7265_v7  ;;  %7367 = vmatpush.msra.mxu1 %v7265_v7 }
0x22de   :  { %7268 = vmatpush.msra.mxu2 %v7267_v38  ;;  %7337 = vmatpush.msra.mxu0 %v7301_v3  ;;  %v7302_v2 = vand.u32 4294901760, %v7301_v3 }
0x22df   :  { %7369 = vmatpush.msra.mxu1 %v7267_v38  ;;  %7274 = vmatmul.f32.vlgmr.msra.gmra.mxu2 %v8943_v46 }
0x22e0   :  { %7340 = vmatpush.msra.mxu0 %v7307_v25  ;;  %7400 = vmatpush.msrb.mxu2 %v7302_v2  ;;  %v7303_v22 = vsub.f32 %v7301_v3, %v7302_v2 }
0x22e1   :  { %7343 = vmatmul.f32.vlgmr.msra.gmra.mxu0 %v8924_v20  ;;  %7373 = vmatmul.f32.vlgmr.msra.gmra.mxu1 %v8931_v54 }
0x22e2   :  { %7404 = vmatpush.msrb.mxu2 %v7308_v45  ;;  %v7304_v4 = vand.u32 4294901760, %v7303_v22  ;;  %7461 = vmatpush.msrb.mxu0 %v7460_v0 }
0x22e3   :  { %7502 = vmatpush.msrb.mxu1 %v7501_v47 }
0x22e4   :  { %7305 = vmatpush.msra.mxu3 %v7304_v4  ;;  %7544 = vmatpush.msra.mxu2 %v7498_v18 }
0x22e5   :  { %7463 = vmatpush.msrb.mxu0 %v7462_v59  ;;  %7508 = vmatpush.msrb.mxu1 %v7507_v11  ;;  %v4101_v11 = vld [vmem:[%s9687_s2 + $0x11b] sm:$0xff] }
0x22e6   :  { %7311 = vmatpush.msra.mxu3 %v7310_v31  ;;  %7547 = vmatpush.msra.mxu2 %v7504_v19 }
0x22e7   :  { %7282 = vmatmul.f32.gmra.mxu2 %v8953_v13  ;;  %7313 = vmatmul.f32.vlgmr.msra.gmra.mxu3 %v8918_v57 }
0x22e8   :  { %7429 = vmatpush.msrb.mxu3 %v7265_v7  ;;  %7465 = vmatpush.msrb.mxu0 %v7464_v51 }
0x22e9   :  { %7348 = vmatmul.f32.gmra.mxu0 %v8938_v50  ;;  %7379 = vmatmul.f32.gmra.mxu1 %v8946_v44 }
0x22ea   :  { %7431 = vmatpush.msrb.mxu3 %v7267_v38  ;;  %7550 = vmatpush.msra.mxu2 %v7510_v26  ;;  %v9531_v26 = vand.u32 4294901760, %v4103_v35 }
0x22eb   :  { %7467 = vmatpush.msrb.mxu0 %v7466_v42  ;;  %7514 = vmatpush.msrb.mxu1 %v7513_v48 }
0x22ec   :  { %7578 = vmatpush.msra.mxu3 %v7460_v0  ;;  %7553 = vmatpush.msra.mxu2 %v7516_v60 }
0x22ed   :  { %7613 = vmatpush.msra.mxu0 %v7499_v16  ;;  %7520 = vmatpush.msrb.mxu1 %v7519_v9  ;;  %v4104_v16 = vld [vmem:[%s9687_s2 + $0x133] sm:$0xff]  ;;  %v9558_v9 = vand.u32 4294901760, %v4101_v11 }
0x22ee   :  { %7580 = vmatpush.msra.mxu3 %v7462_v59 }
0x22ef   :  { %7317 = vmatmul.f32.gmra.mxu3 %v8933_v58  ;;  %7406 = vmatmul.f32.vlgmr.msrb.gmra.mxu2 %v8918_v57 }
0x22f0   :  { %7582 = vmatpush.msra.mxu3 %v7464_v51  ;;  %7617 = vmatpush.msra.mxu0 %v7505_v33 }
0x22f1   :  { %7648 = vmatpush.msra.mxu1 %v7460_v0 }
0x22f2   :  { %7584 = vmatpush.msra.mxu3 %v7466_v42  ;;  %7621 = vmatpush.msra.mxu0 %v7511_v10  ;;  %v9543_v10 = vsub.f32 %v4103_v35, %v9531_v26 }
0x22f3   :  { %7650 = vmatpush.msra.mxu1 %v7462_v59  ;;  %v4105_v59 = vld [vmem:[%s9687_s2 + $0x13b] sm:$0xff] }
0x22f4   :  { %7625 = vmatpush.msra.mxu0 %v7517_v37  ;;  %v9511_v43 = vand.u32 4294901760, %v4105_v59  ;;  %v7736_v48 = vand.u32 4294901760, %v9543_v10 }
0x22f5   :  { %7652 = vmatpush.msra.mxu1 %v7464_v51  ;;  %v9519_v51 = vand.u32 4294901760, %v4104_v16 }
0x22f6   :  { %v9517_v19 = vsub.f32 %v4105_v59, %v9511_v43  ;;  %7682 = vmatpush.msrb.mxu2 %v9511_v43 }
0x22f7   :  { %7410 = vmatmul.f32.gmra.mxu2 %v8933_v58  ;;  %7433 = vmatmul.f32.vlgmr.msrb.gmra.mxu3 %v8918_v57  ;;  %v9528_v33 = vsub.f32 %v4104_v16, %v9519_v51 }
0x22f8   :  { %7654 = vmatpush.msra.mxu1 %v7466_v42  ;;  %v7724_v1 = vand.u32 4294901760, %v9517_v19  ;;  %v4102_v42 = vld [vmem:[%s9687_s2 + $0x123] sm:$0xff]  ;;  %7684 = vmatpush.msrb.mxu2 %v9519_v51 }
0x22f9   :  { %v7730_v39 = vand.u32 4294901760, %v9528_v33  ;;  %v9546_v60 = vand.u32 4294901760, %v4102_v42 }
0x22fa   :  { %v7725_v47 = vsub.f32 %v9517_v19, %v7724_v1  ;;  %7686 = vmatpush.msrb.mxu2 %v9531_v26 }
0x22fb   :  { %v7731_v37 = vsub.f32 %v9528_v33, %v7730_v39  ;;  %v7741_v24 = vsub.f32 %v4102_v42, %v9546_v60 }
0x22fc   :  { %v7726_v8 = vand.u32 4294901760, %v7725_v47  ;;  %7688 = vmatpush.msrb.mxu2 %v9546_v60 }
0x22fe   :  { %7727 = vmatpush.msrb.mxu3 %v7726_v8  ;;  %7690 = vmatpush.msrb.mxu2 %v9558_v9 }
0x22ff   :  { %7437 = vmatmul.f32.gmra.mxu3 %v8933_v58 }
0x235e   :  { %v7344_v5 = vpop.f32.mrf.mxu0  ;;  %v7374_v32 = vpop.f32.mrf.mxu1 }
0x2362   :  { %v7275_v15 = vpop.f32.mrf.mxu2 }
0x2366   :  { %v7349_v36 = vpop.f32.mrf.mxu0  ;;  %v7380_v38 = vpop.f32.mrf.mxu1 }
0x236a   :  { %v7283_v30 = vpop.f32.mrf.mxu2  ;;  %v7314_v63 = vpop.f32.mrf.mxu3 }
0x236b   :  { %v7315_v49 = vadd.f32 %v7314_v63, %v7275_v15  ;;  %v4100_v15 = vld [vmem:[%s9687_s2 + $0x113] sm:$0xff]  ;;  %v7737_v63 = vsub.f32 %v9543_v10, %v7736_v48 }
0x236d   :  { %v7345_v61 = vadd.f32 %v7344_v5, %v7315_v49  ;;  %v7742_v5 = vand.u32 4294901760, %v7741_v24  ;;  %v7691_v49 = vand.u32 4294901760, %v4100_v15 }
0x236f   :  { %v7375_v12 = vadd.f32 %v7374_v32, %v7345_v61  ;;  %v7747_v32 = vsub.f32 %v4101_v11, %v9558_v9  ;;  %v7738_v61 = vand.u32 4294901760, %v7737_v63  ;;  %7692 = vmatpush.msrb.mxu2 %v7691_v49 }
0x2372   :  { %v7318_v29 = vpop.f32.mrf.mxu3  ;;  %v7407_v53 = vpop.f32.mrf.mxu2 }
0x2373   :  { %v7319_v6 = vadd.f32 %v7318_v29, %v7283_v30  ;;  %v7408_v56 = vadd.f32 %v7407_v53, %v7375_v12  ;;  %v7732_v30 = vand.u32 4294901760, %v7731_v37  ;;  %v4099_v29 = vld [vmem:[%s9687_s2 + $0x10b] sm:$0xff]  ;;  %v7743_v53 = vsub.f32 %v7741_v24, %v7742_v5 }
0x2374   :  { %v7753_v12 = vsub.f32 %v4100_v15, %v7691_v49 }
0x2375   :  { %v7350_v23 = vadd.f32 %v7349_v36, %v7319_v6  ;;  %7733 = vmatpush.msrb.mxu3 %v7732_v30  ;;  %v7693_v6 = vand.u32 4294901760, %v4099_v29  ;;  %v7748_v36 = vand.u32 4294901760, %v7747_v32 }
0x2377   :  { %v7381_v14 = vadd.f32 %v7380_v38, %v7350_v23  ;;  %7739 = vmatpush.msrb.mxu3 %v7738_v61  ;;  %v7754_v23 = vand.u32 4294901760, %v7753_v12  ;;  %v7759_v38 = vsub.f32 %v4099_v29, %v7693_v6  ;;  %7694 = vmatpush.msrb.mxu2 %v7693_v6 }
0x237a   :  { %v7434_v34 = vpop.f32.mrf.mxu3  ;;  %v7411_v27 = vpop.f32.mrf.mxu2 }
0x237b   :  { %v9500_v28 = vadd.f32 %v7434_v34, %v7408_v56  ;;  %v7412_v7 = vadd.f32 %v7411_v27, %v7381_v14  ;;  %v4098_v56 = vld [vmem:[%s9687_s2 + $0x103] sm:$0xff]  ;;  %v7744_v34 = vand.u32 4294901760, %v7743_v53  ;;  %v7749_v27 = vsub.f32 %v7747_v32, %v7748_v36 }
0x237c   :  { %v7760_v14 = vand.u32 4294901760, %v7759_v38 }
0x237d   :  { %v7443_v52 = vsel %vm46_vm0, %v9500_v28, 0  ;;  %7745 = vmatpush.msrb.mxu3 %v7744_v34 }
0x237e   :  { %v7468_v17 = vand.u32 4294901760, %v7443_v52 }
0x2380   :  { %v7469_v25 = vsub.f32 %v7443_v52, %v7468_v17  ;;  %7522 = vmatmul.f32.vlgmr.msrb.gmra.mxu1 %v7468_v17  ;;  %v7695_v52 = vand.u32 4294901760, %v4098_v56 }
0x2381   :  { %7831 = vmatpush.msrb.mxu1 %v9511_v43 }
0x2382   :  { %v7470_v3 = vand.u32 4294901760, %v7469_v25  ;;  %v7438_v45 = vpop.f32.mrf.mxu3  ;;  %7556 = vmatmul.f32.vlgmr.msra.gmra.mxu2 %v7469_v25 }
0x2383   :  { %v9504_v2 = vadd.f32 %v7438_v45, %v7412_v7  ;;  %7833 = vmatpush.msrb.mxu1 %v9519_v51  ;;  %v7750_v7 = vand.u32 4294901760, %v7749_v27  ;;  %v7761_v45 = vsub.f32 %v7759_v38, %v7760_v14  ;;  %7696 = vmatpush.msrb.mxu2 %v7695_v52 }
0x2384   :  { %v7471_v22 = vsub.f32 %v7469_v25, %v7470_v3  ;;  %7588 = vmatmul.f32.vlgmr.msra.gmra.mxu3 %v7470_v3  ;;  %v7765_v25 = vsub.f32 %v4098_v56, %v7695_v52 }
0x2385   :  { %v7446_v40 = vsel %vm46_vm0, %v9504_v2, 0  ;;  %7835 = vmatpush.msrb.mxu1 %v9531_v26  ;;  %7751 = vmatpush.msrb.mxu3 %v7750_v7 }
0x2386   :  { %v7472_v4 = vand.u32 4294901760, %v7471_v22  ;;  %v7476_v31 = vand.u32 4294901760, %v7446_v40  ;;  %v7766_v22 = vand.u32 4294901760, %v7765_v25  ;;  %7870 = vmatpush.msra.mxu2 %v7724_v1 }
0x2387   :  { %7837 = vmatpush.msrb.mxu1 %v9546_v60 }
0x2388   :  { %v7477_v62 = vsub.f32 %v7446_v40, %v7476_v31  ;;  %7473 = vmatmul.f32.vlgmr.msrb.gmra.mxu0 %v7472_v4  ;;  %7526 = vmatmul.f32.gmra.mxu1 %v7476_v31  ;;  %v7762_v40 = vand.u32 4294901760, %v7761_v45  ;;  %v7767_v4 = vsub.f32 %v7765_v25, %v7766_v22 }
0x2389   :  { %7789 = vmatpush.msrb.mxu0 %v9517_v19  ;;  %7839 = vmatpush.msrb.mxu1 %v9558_v9 }
0x238a   :  { %7561 = vmatmul.f32.gmra.mxu2 %v7477_v62  ;;  %v7478_v0 = vand.u32 4294901760, %v7477_v62 }
0x238b   :  { %7792 = vmatpush.msrb.mxu0 %v9528_v33  ;;  %7841 = vmatpush.msrb.mxu1 %v7691_v49 }
0x238c   :  { %7594 = vmatmul.f32.gmra.mxu3 %v7478_v0  ;;  %v7479_v41 = vsub.f32 %v7477_v62, %v7478_v0  ;;  %7874 = vmatpush.msra.mxu2 %v7730_v39  ;;  %v8435_v0 = vld [vmem:[%s9687_s2 + $0x102] ss:$0 sm:$0xff] }
0x238d   :  { %7795 = vmatpush.msrb.mxu0 %v9543_v10  ;;  %7843 = vmatpush.msrb.mxu1 %v7693_v6 }
0x238e   :  { %v7480_v18 = vand.u32 4294901760, %v7479_v41  ;;  %7878 = vmatpush.msra.mxu2 %v7736_v48 }
0x238f   :  { %7798 = vmatpush.msrb.mxu0 %v7741_v24  ;;  %7845 = vmatpush.msrb.mxu1 %v7695_v52 }
0x2390   :  { %7481 = vmatmul.f32.gmra.mxu0 %v7480_v18  ;;  %7656 = vmatmul.f32.vlgmr.msra.gmra.mxu1 %v7468_v17 }
0x2391   :  { %7801 = vmatpush.msrb.mxu0 %v7747_v32  ;;  %7882 = vmatpush.msra.mxu2 %v7742_v5 }
0x2393   :  { %7804 = vmatpush.msrb.mxu0 %v7753_v12  ;;  %7886 = vmatpush.msra.mxu2 %v7748_v36 }
0x2395   :  { %7807 = vmatpush.msrb.mxu0 %v7759_v38  ;;  %7890 = vmatpush.msra.mxu2 %v7754_v23 }
0x2397   :  { %7810 = vmatpush.msrb.mxu0 %v7765_v25  ;;  %7894 = vmatpush.msra.mxu2 %v7760_v14 }
0x2398   :  { %7627 = vmatmul.f32.vlgmr.msra.gmra.mxu0 %v7468_v17  ;;  %7660 = vmatmul.f32.gmra.mxu1 %v7476_v31  ;;  %v7755_v17 = vsub.f32 %v7753_v12, %v7754_v23 }
0x2399   :  { %7898 = vmatpush.msra.mxu2 %v7766_v22 }
0x239a   :  { %v7756_v3 = vand.u32 4294901760, %v7755_v17 }
0x239c   :  { %7757 = vmatpush.msrb.mxu3 %v7756_v3 }
0x239e   :  { %7763 = vmatpush.msrb.mxu3 %v7762_v40 }
0x23a0   :  { %7631 = vmatmul.f32.gmra.mxu0 %v7476_v31  ;;  %v7768_v31 = vand.u32 4294901760, %v7767_v4 }
0x23a2   :  { %7769 = vmatpush.msrb.mxu3 %v7768_v31 }
0x23a4   :  { %7917 = vmatpush.msra.mxu3 %v9511_v43 }
0x23a6   :  { %7919 = vmatpush.msra.mxu3 %v9519_v51 }
0x23a8   :  { %7921 = vmatpush.msra.mxu3 %v9531_v26 }
0x23aa   :  { %7923 = vmatpush.msra.mxu3 %v9546_v60 }
0x23ac   :  { %7925 = vmatpush.msra.mxu3 %v9558_v9 }
0x23ae   :  { %7927 = vmatpush.msra.mxu3 %v7691_v49 }
0x23b0   :  { %7929 = vmatpush.msra.mxu3 %v7693_v6 }
0x23b2   :  { %7931 = vmatpush.msra.mxu3 %v7695_v52  ;;  %v8436_v52 = vld [vmem:[%s9687_s2 + $0x143] ss:$0 sm:$0xff] }
0x23fd   :  { %v7523_v62 = vpop.f32.mrf.mxu1 }
0x2405   :  { %v7474_v41 = vpop.f32.mrf.mxu0  ;;  %v7527_v59 = vpop.f32.mrf.mxu1 }
0x2406   :  { %v7475_v18 = vadd.f32 %v8435_v0, %v7474_v41  ;;  %v7557_v16 = vpop.f32.mrf.mxu2 }
0x2407   :  { %v7589_v1 = vpop.f32.mrf.mxu3 }
0x2408   :  { %v7524_v43 = vadd.f32 %v7523_v62, %v7475_v18 }
0x240a   :  { %v7558_v35 = vadd.f32 %v7557_v16, %v7524_v43 }
0x240c   :  { %v7590_v33 = vadd.f32 %v7589_v1, %v7558_v35 }
0x240d   :  { %v7482_v19 = vpop.f32.mrf.mxu0  ;;  %v7657_v42 = vpop.f32.mrf.mxu1 }
0x240e   :  { %v7483_v51 = vadd.f32 %v8435_v0, %v7482_v19  ;;  %v7562_v10 = vpop.f32.mrf.mxu2 }
0x240f   :  { %v7595_v37 = vpop.f32.mrf.mxu3 }
0x2410   :  { %v7528_v26 = vadd.f32 %v7527_v59, %v7483_v51 }
0x2412   :  { %v7563_v60 = vadd.f32 %v7562_v10, %v7528_v26 }
0x2414   :  { %v7596_v48 = vadd.f32 %v7595_v37, %v7563_v60 }
0x2415   :  { %v7628_v47 = vpop.f32.mrf.mxu0  ;;  %v7661_v5 = vpop.f32.mrf.mxu1 }
0x2416   :  { %v7629_v39 = vadd.f32 %v7628_v47, %v7590_v33 }
0x2418   :  { %v7658_v11 = vadd.f32 %v7657_v42, %v7629_v39 }
0x241a   :  { %v7664_v8 = vmax.f32 %v7658_v11, 0.0 }
0x241c   :  { %v7668_v24 = vsel %vm2971_vm8, %v7664_v8, 0 }
0x241d   :  { %v7697_v9 = vand.u32 4294901760, %v7668_v24  ;;  %v7632_v15 = vpop.f32.mrf.mxu0 }
0x241e   :  { %v7633_v30 = vadd.f32 %v7632_v15, %v7596_v48 }
0x241f   :  { %v7698_v63 = vsub.f32 %v7668_v24, %v7697_v9  ;;  %7771 = vmatmul.f32.vlgmr.msrb.gmra.mxu3 %v7697_v9 }
0x2420   :  { %v7662_v49 = vadd.f32 %v7661_v5, %v7633_v30 }
0x2421   :  { %v7699_v32 = vand.u32 4294901760, %v7698_v63  ;;  %7813 = vmatmul.f32.vlgmr.msrb.gmra.mxu0 %v7698_v63 }
0x2422   :  { %v7665_v29 = vmax.f32 %v7662_v49, 0.0 }
0x2423   :  { %v7700_v61 = vsub.f32 %v7698_v63, %v7699_v32  ;;  %7849 = vmatmul.f32.vlgmr.msrb.gmra.mxu1 %v7699_v32 }
0x2424   :  { %v7671_v53 = vsel %vm2971_vm8, %v7665_v29, 0 }
0x2425   :  { %v7701_v12 = vand.u32 4294901760, %v7700_v61  ;;  %v7705_v6 = vand.u32 4294901760, %v7671_v53 }
0x2427   :  { %7702 = vmatmul.f32.vlgmr.msrb.gmra.mxu2 %v7701_v12  ;;  %7775 = vmatmul.f32.gmra.mxu3 %v7705_v6  ;;  %v7706_v36 = vsub.f32 %v7671_v53, %v7705_v6 }
0x2429   :  { %7818 = vmatmul.f32.gmra.mxu0 %v7706_v36  ;;  %v7707_v56 = vand.u32 4294901760, %v7706_v36 }
0x242b   :  { %7855 = vmatmul.f32.gmra.mxu1 %v7707_v56  ;;  %v7708_v34 = vsub.f32 %v7706_v36, %v7707_v56 }
0x242d   :  { %v7709_v23 = vand.u32 4294901760, %v7708_v34 }
0x242f   :  { %7710 = vmatmul.f32.gmra.mxu2 %v7709_v23  ;;  %7933 = vmatmul.f32.vlgmr.msra.gmra.mxu3 %v7697_v9  ;;  %v9720_v23 = vld [vmem:[#allocation7_spill] sm:$0xff] }
0x2437   :  { %7900 = vmatmul.f32.vlgmr.msra.gmra.mxu2 %v7697_v9  ;;  %7937 = vmatmul.f32.gmra.mxu3 %v7705_v6 }
0x243f   :  { %7904 = vmatmul.f32.gmra.mxu2 %v7705_v6 }
0x249e   :  { %v7814_v7 = vpop.f32.mrf.mxu0 }
0x24a0   :  { %v7850_v40 = vpop.f32.mrf.mxu1 }
0x24a2   :  { %v7772_v38 = vpop.f32.mrf.mxu3 }
0x24a6   :  { %v7819_v18 = vpop.f32.mrf.mxu0 }
0x24a8   :  { %v7856_v19 = vpop.f32.mrf.mxu1 }
0x24aa   :  { %v7703_v27 = vpop.f32.mrf.mxu2  ;;  %v7776_v14 = vpop.f32.mrf.mxu3 }
0x24ab   :  { %v7704_v17 = vadd.f32 %v8436_v52, %v7703_v27 }
0x24ad   :  { %v7773_v25 = vadd.f32 %v7772_v38, %v7704_v17  ;;  %v9721_v38 = vld [vmem:[#allocation10_spill] sm:$0xff] }
0x24af   :  { %v7815_v22 = vadd.f32 %v7814_v7, %v7773_v25 }
0x24b1   :  { %v7851_v31 = vadd.f32 %v7850_v40, %v7815_v22 }
0x24b2   :  { %v7711_v3 = vpop.f32.mrf.mxu2  ;;  %v7934_v62 = vpop.f32.mrf.mxu3 }
0x24b3   :  { %v7712_v45 = vadd.f32 %v8436_v52, %v7711_v3  ;;  %v8551_v52 = vmov 32.0  }
0x24b4   :  { %8503 = vrcp.f32 %v8551_v52 }
0x24b5   :  { %v7777_v4 = vadd.f32 %v7776_v14, %v7712_v45 }
0x24b7   :  { %v7820_v43 = vadd.f32 %v7819_v18, %v7777_v4 }
0x24b9   :  { %v7857_v35 = vadd.f32 %v7856_v19, %v7820_v43  ;;  %v9723_v43 = vld [vmem:[#allocation15_spill] sm:$0xff]  ;;  %v9725_v19 = vld [vmem:[#allocation9_spill] sm:$0xff] }
0x24ba   :  { %v7901_v0 = vpop.f32.mrf.mxu2  ;;  %v7938_v26 = vpop.f32.mrf.mxu3 }
0x24bb   :  { %v7902_v41 = vadd.f32 %v7901_v0, %v7851_v31  ;;  %v8504_v27 = vpop.eup %8503 }
0x24bc   :  { %v8142_v17 = vmul.f32 32.0, %v8504_v27  ;;  %vm8146_vm5 = vweird.f32 %v8504_v27 }
0x24bd   :  { %v7935_v59 = vadd.f32 %v7934_v62, %v7902_v41 }
0x24be   :  { %v8143_v14 = vsub.f32 1.0, %v8142_v17 }
0x24bf   :  { %v7941_v16 = vadd.f32 %v7935_v59, %v9500_v28  ;;  %v9722_v59 = vld [vmem:[#allocation6_spill] sm:$0xff] }
0x24c0   :  { %v8144_v25 = vmul.f32 %v8504_v27, %v8143_v14 }
0x24c1   :  { %v7959_v1 = vand.u32 4294901760, %v7941_v16 }
0x24c2   :  { %v7905_v51 = vpop.f32.mrf.mxu2  ;;  %v8145_v7 = vadd.f32 %v8504_v27, %v8144_v25 }
0x24c3   :  { %v7906_v33 = vadd.f32 %v7905_v51, %v7857_v35  ;;  %v7999_v39 = vsub.f32 %v7941_v16, %v7959_v1  ;;  %v9724_v16 = vld [vmem:[#allocation14_spill] sm:$0xff]  ;;  %v9726_v35 = vld [vmem:[#allocation8_spill] sm:$0xff] }
0x24c4   :  { %v8147_v3 = vsel %vm8146_vm5, %v8504_v27, %v8145_v7  ;;  %v9727_v51 = vld [vmem:[#allocation18_spill] sm:$0xff] }
0x24c5   :  { %v7939_v42 = vadd.f32 %v7938_v26, %v7906_v33  ;;  %v8000_v11 = vand.u32 4294901760, %v7999_v39  ;;  %v9729_v33 = vld [vmem:[#allocation12_spill] sm:$0xff]  ;;  %v9730_v26 = vld [vmem:[#allocation17_spill] sm:$0xff] }
0x24c7   :  { %v7942_v47 = vadd.f32 %v7939_v42, %v9504_v2  ;;  %v8001_v37 = vsub.f32 %v7999_v39, %v8000_v11  ;;  %v9731_v42 = vld [vmem:[#allocation11_spill] sm:$0xff] }
0x24c9   :  { %v7957_v10 = vand.u32 4294901760, %v7942_v47  ;;  %v8002_v48 = vand.u32 4294901760, %v8001_v37 }
0x24cb   :  { %v7993_v60 = vsub.f32 %v7942_v47, %v7957_v10  ;;  %7958 = vmatpush.msra.mxu0 %v7957_v10  ;;  %8059 = vmatpush.msrb.mxu3 %v7957_v10 }
0x24cd   :  { %7960 = vmatpush.msra.mxu0 %v7959_v1  ;;  %8029 = vmatpush.msrb.mxu2 %v7993_v60  ;;  %v7994_v8 = vand.u32 4294901760, %v7993_v60 }
0x24ce   :  { %8061 = vmatpush.msrb.mxu3 %v7959_v1  ;;  %7966 = vmatmul.f32.vlgmr.msra.gmra.mxu0 %v8943_v46 }
0x24cf   :  { %8032 = vmatpush.msrb.mxu2 %v7999_v39  ;;  %8092 = vmatpush.msrb.mxu0 %v7994_v8  ;;  %v7995_v28 = vsub.f32 %v7993_v60, %v7994_v8 }
0x24d0   :  { %8035 = vmatmul.f32.vlgmr.msrb.gmra.mxu2 %v8924_v20  ;;  %8065 = vmatmul.f32.vlgmr.msrb.gmra.mxu3 %v8931_v54 }
0x24d1   :  { %8096 = vmatpush.msrb.mxu0 %v8000_v11  ;;  %v7996_v2 = vand.u32 4294901760, %v7995_v28 }
0x24d3   :  { %7997 = vmatpush.msra.mxu1 %v7996_v2 }
0x24d5   :  { %8003 = vmatpush.msra.mxu1 %v8002_v48 }
0x24d6   :  { %7974 = vmatmul.f32.gmra.mxu0 %v8953_v13  ;;  %8005 = vmatmul.f32.vlgmr.msra.gmra.mxu1 %v8918_v57 }
0x24d7   :  { %8121 = vmatpush.msrb.mxu1 %v7957_v10 }
0x24d8   :  { %8040 = vmatmul.f32.gmra.mxu2 %v8938_v50  ;;  %8071 = vmatmul.f32.gmra.mxu3 %v8946_v44 }
0x24d9   :  { %8123 = vmatpush.msrb.mxu1 %v7959_v1  ;;  %v9728_v1 = vld [vmem:[#allocation16_spill] sm:$0xff] }
0x24de   :  { %8009 = vmatmul.f32.gmra.mxu1 %v8933_v58  ;;  %8098 = vmatmul.f32.vlgmr.msrb.gmra.mxu0 %v8918_v57 }
0x24e6   :  { %8102 = vmatmul.f32.gmra.mxu0 %v8933_v58  ;;  %8125 = vmatmul.f32.vlgmr.msrb.gmra.mxu1 %v8918_v57 }
0x24ee   :  { %8129 = vmatmul.f32.gmra.mxu1 %v8933_v58 }
0x254b   :  { %v7967_v20 = vpop.f32.mrf.mxu0 }
0x2553   :  { %v7975_v54 = vpop.f32.mrf.mxu0  ;;  %v8006_v46 = vpop.f32.mrf.mxu1 }
0x2554   :  { %v8036_v13 = vpop.f32.mrf.mxu2  ;;  %v8007_v24 = vadd.f32 %v8006_v46, %v7967_v20  ;;  %v8066_v9 = vpop.f32.mrf.mxu3  ;;  %v8412_v20 = vld [vmem:[%s9686_s1 + $0x10] sm:$0xff] }
0x2556   :  { %v8037_v15 = vadd.f32 %v8036_v13, %v8007_v24 }
0x2558   :  { %v8067_v30 = vadd.f32 %v8066_v9, %v8037_v15  ;;  %v8437_v9 = vld [vmem:[%s9687_s2 + $0x144] ss:$0 sm:$0xff] }
0x255b   :  { %v8010_v50 = vpop.f32.mrf.mxu1  ;;  %v8099_v44 = vpop.f32.mrf.mxu0 }
0x255c   :  { %v8011_v63 = vadd.f32 %v8010_v50, %v7975_v54  ;;  %v8041_v5 = vpop.f32.mrf.mxu2  ;;  %v8100_v49 = vadd.f32 %v8099_v44, %v8067_v30  ;;  %v8072_v53 = vpop.f32.mrf.mxu3 }
0x255e   :  { %v8042_v29 = vadd.f32 %v8041_v5, %v8011_v63  ;;  %v8438_v63 = vld [vmem:[%s9687_s2 + $0x145] ss:$0 sm:$0xff] }
0x2560   :  { %v8073_v12 = vadd.f32 %v8072_v53, %v8042_v29 }
0x2563   :  { %v8126_v32 = vpop.f32.mrf.mxu1  ;;  %v8103_v58 = vpop.f32.mrf.mxu0 }
0x2564   :  { %v8127_v61 = vadd.f32 %v8126_v32, %v8100_v49  ;;  %v8104_v6 = vadd.f32 %v8103_v58, %v8073_v12  ;;  %v8413_v32 = vld [vmem:[%s9686_s1 + $0x18] sm:$0xff] }
0x2565   :  { %v8196_v58 = vsel %vm1602_vm6, %v8413_v32, 0 }
0x2566   :  { %v8135_v57 = vsel %vm46_vm0, %v8127_v61, 0.0 }
0x2567   :  { %8136 = vadd.xlane.f32.xlu2 %v8135_v57 }
0x256b   :  { %v8130_v36 = vpop.f32.mrf.mxu1 }
0x256c   :  { %v8131_v56 = vadd.f32 %v8130_v36, %v8104_v6 }
0x256e   :  { %v8138_v34 = vsel %vm46_vm0, %v8131_v56, 0.0 }
0x256f   :  { %8139 = vadd.xlane.f32.xlu1 %v8138_v34 }
0x257f   :  { %2943 = vrot.lane.b32.xlu2 %v9720_v23, %s8549_s13 }
0x2587   :  { %2952 = vrot.lane.b32.xlu2 %v9721_v38, %s8547_s11 }
0x258f   :  { %7012 = vrot.lane.b32.xlu2 %v9350_v55, %s8544_s8 }
0x25da   :  { %v8137_v45 = vpop.xlane.xlu2 %8136 }
0x25db   :  { %v8148_v22 = vmul.f32 %v8147_v3, %v8137_v45 }
0x25dd   :  { %v8150_v40 = vsub.f32 %v8127_v61, %v8148_v22 }
0x25df   :  { %v8152_v4 = vmul.f32 %v8150_v40, %v8150_v40 }
0x25e1   :  { %v8154_v31 = vsel %vm46_vm0, %v8152_v4, 0.0 }
0x25e2   :  { %8155 = vadd.xlane.f32.xlu1 %v8154_v31  ;;  %v8140_v62 = vpop.xlane.xlu1 %8139 }
0x25e3   :  { %v8149_v0 = vmul.f32 %v8147_v3, %v8140_v62 }
0x25e5   :  { %v8151_v41 = vsub.f32 %v8131_v56, %v8149_v0  ;;  %v9650_v56 = vand.u32 4294901760, %v8196_v58 }
0x25e7   :  { %v8153_v55 = vmul.f32 %v8151_v41, %v8151_v41  ;;  %v8225_v17 = vsub.f32 %v8196_v58, %v9650_v56 }
0x25e9   :  { %v8157_v18 = vsel %vm46_vm0, %v8153_v55, 0.0  ;;  %v8226_v22 = vand.u32 4294901760, %v8225_v17 }
0x25ea   :  { %8158 = vadd.xlane.f32.xlu0 %v8157_v18 }
0x25eb   :  { %v8227_v0 = vsub.f32 %v8225_v17, %v8226_v22 }
0x25fb   :  { %2940 = vrot.lane.b32.xlu1 %v9722_v59, %s8548_s12 }
0x25fe   :  { %7000 = vrot.lane.b32.xlu0 %v9723_v43, %s8549_s13  ;;  %v8228_v43 = vand.u32 4294901760, %v8227_v0 }
0x2603   :  { %6997 = vrot.lane.b32.xlu1 %v9724_v16, %s8548_s12 }
0x2606   :  { %2949 = vrot.lane.b32.xlu0 %v9725_v19, %s8552_s22 }
0x260b   :  { %2946 = vrot.lane.b32.xlu1 %v9726_v35, %s8550_s14  ;;  %v2944_v35 = vpop.permute.xlu2 %2943 }
0x260e   :  { %7009 = vrot.lane.b32.xlu0 %v9727_v51, %s8547_s11  ;;  %v9732_v51 = vld [vmem:[#allocation5_spill] sm:$0xff] }
0x2613   :  { %7003 = vrot.lane.b32.xlu1 %v9728_v1, %s8550_s14 }
0x2616   :  { %2958 = vrot.lane.b32.xlu0 %v9729_v33, %s8540_s30 }
0x261b   :  { %7006 = vrot.lane.b32.xlu1 %v9730_v26, %s8552_s22 }
0x2623   :  { %2955 = vrot.lane.b32.xlu1 %v9731_v42, %s8544_s8 }
0x262b   :  { %7015 = vrot.lane.b32.xlu1 %v9437_v21, %s8540_s30  ;;  %v8193_v21 = vsel %vm1602_vm6, %v8412_v20, 0 }
0x262c   :  { %v9640_v44 = vand.u32 4294901760, %v8193_v21 }
0x262e   :  { %v8217_v53 = vsub.f32 %v8193_v21, %v9640_v44 }
0x2630   :  { %v8218_v36 = vand.u32 4294901760, %v8217_v53 }
0x2632   :  { %v8219_v27 = vsub.f32 %v8217_v53, %v8218_v36 }
0x2634   :  { %v8220_v45 = vand.u32 4294901760, %v8219_v27 }
0x2655   :  { %v8156_v47 = vpop.xlane.xlu1 %8155 }
0x2656   :  { %v8160_v39 = vmul.f32 %v8156_v47, %v8147_v3 }
0x2658   :  { %v8162_v10 = vadd.f32 1e-05, %v8160_v39  ;;  %v2953_v39 = vpop.permute.xlu2 %2952 }
0x265a   :  { %8505 = vrsqrt.f32 %v8162_v10  ;;  %vm8170_vm10 = vweird.f32 %v8162_v10 }
0x265d   :  { %v8159_v60 = vpop.xlane.xlu0 %8158 }
0x265e   :  { %v8161_v11 = vmul.f32 %v8159_v60, %v8147_v3 }
0x2660   :  { %v8506_v8 = vpop.eup %8505  ;;  %v8163_v28 = vadd.f32 1e-05, %v8161_v11 }
0x2661   :  { %v8165_v37 = vmul.f32 %v8506_v8, %v8162_v10  ;;  %vm8171_vm9 = vweird.f32 %v8506_v8  ;;  %v9733_v10 = vld [vmem:[#allocation13_spill] sm:$0xff] }
0x2662   :  { %8507 = vrsqrt.f32 %v8163_v28  ;;  %vm8172_vm11 = vmor %vm8170_vm10, %vm8171_vm9  ;;  %vm8180_vm13 = vweird.f32 %v8163_v28 }
0x2663   :  { %v8166_v2 = vmul.f32 %v8506_v8, %v8165_v37 }
0x2665   :  { %v8167_v48 = vmul.f32 0.5, %v8166_v2 }
0x2667   :  { %v8168_v54 = vsub.f32 1.5, %v8167_v48 }
0x2668   :  { %v8508_v46 = vpop.eup %8507 }
0x2669   :  { %v8169_v13 = vmul.f32 %v8506_v8, %v8168_v54  ;;  %v8175_v24 = vmul.f32 %v8508_v46, %v8163_v28  ;;  %vm8181_vm12 = vweird.f32 %v8508_v46 }
0x266a   :  { %vm8182_vm14 = vmor %vm8180_vm13, %vm8181_vm12 }
0x266b   :  { %v8173_v50 = vsel %vm8172_vm11, %v8506_v8, %v8169_v13  ;;  %v8176_v15 = vmul.f32 %v8508_v46, %v8175_v24  ;;  %v7013_v13 = vpop.permute.xlu2 %7012 }
0x266c   :  { %v8184_v30 = vmul.f32 %v8173_v50, %v8150_v40 }
0x266d   :  { %v8177_v5 = vmul.f32 0.5, %v8176_v15  ;;  %v2941_v49 = vpop.permute.xlu1 %2940 }
0x266e   :  { %v8187_v29 = vmul.f32 %v8437_v9, %v8184_v30  ;;  %v2961_v1 = vsel %vm272_vm1, %v9732_v51, %v2941_v49 }
0x266f   :  { %v8178_v61 = vsub.f32 1.5, %v8177_v5  ;;  %v2962_v42 = vsel %vm1602_vm6, %v2961_v1, %v2944_v35 }
0x2670   :  { %v8190_v57 = vadd.f32 %v8438_v63, %v8187_v29  ;;  %v7001_v14 = vpop.permute.xlu0 %7000 }
0x2671   :  { %v8179_v12 = vmul.f32 %v8508_v46, %v8178_v61 }
0x2672   :  { %v8214_v23 = vand.u32 4294901760, %v8190_v57 }
0x2673   :  { %v8183_v6 = vsel %vm8182_vm14, %v8508_v46, %v8179_v12 }
0x2674   :  { %v8185_v34 = vmul.f32 %v8183_v6, %v8151_v41  ;;  %v8254_v7 = vsub.f32 %v8190_v57, %v8214_v23 }
0x2675   :  { %v6998_v38 = vpop.permute.xlu1 %6997 }
0x2676   :  { %v8188_v52 = vmul.f32 %v8437_v9, %v8185_v34  ;;  %v8255_v4 = vand.u32 4294901760, %v8254_v7  ;;  %v7018_v60 = vsel %vm272_vm1, %v9733_v10, %v6998_v38 }
0x2677   :  { %v7019_v8 = vsel %vm1602_vm6, %v7018_v60, %v7001_v14 }
0x2678   :  { %v8191_v25 = vadd.f32 %v8438_v63, %v8188_v52  ;;  %v8256_v55 = vsub.f32 %v8254_v7, %v8255_v4  ;;  %v2950_v18 = vpop.permute.xlu0 %2949 }
0x267a   :  { %v8212_v3 = vand.u32 4294901760, %v8191_v25  ;;  %v8257_v16 = vand.u32 4294901760, %v8256_v55 }
0x267c   :  { %8213 = vmatpush.msra.mxu2 %v8212_v3  ;;  %8314 = vmatpush.msra.mxu1 %v8212_v3  ;;  %v8248_v40 = vsub.f32 %v8191_v25, %v8212_v3 }
0x267d   :  { %v2947_v31 = vpop.permute.xlu1 %2946 }
0x267e   :  { %8215 = vmatpush.msra.mxu2 %v8214_v23  ;;  %8284 = vmatpush.msra.mxu0 %v8248_v40  ;;  %v8249_v62 = vand.u32 4294901760, %v8248_v40  ;;  %v2963_v47 = vsel %vm1604_vm7, %v2962_v42, %v2947_v31 }
0x267f   :  { %8316 = vmatpush.msra.mxu1 %v8214_v23  ;;  %8221 = vmatmul.f32.vlgmr.msra.gmra.mxu2 %v8220_v45  ;;  %v2964_v11 = vsel %vm46_vm0, %v2963_v47, %v2950_v18 }
0x2680   :  { %8287 = vmatpush.msra.mxu0 %v8254_v7  ;;  %8347 = vmatpush.msrb.mxu2 %v8249_v62  ;;  %v8250_v41 = vsub.f32 %v8248_v40, %v8249_v62  ;;  %v7010_v33 = vpop.permute.xlu0 %7009  ;;  %v2966_v28 = vsel %vm2965_vm15, %v2964_v11, %v2953_v39 }
0x2681   :  { %8290 = vmatmul.f32.vlgmr.msra.gmra.mxu0 %v8217_v53  ;;  %8320 = vmatmul.f32.vlgmr.msra.gmra.mxu1 %v8218_v36 }
0x2682   :  { %8351 = vmatpush.msrb.mxu2 %v8255_v4  ;;  %v8251_v59 = vand.u32 4294901760, %v8250_v41 }
0x2684   :  { %8252 = vmatpush.msra.mxu3 %v8251_v59 }
0x2685   :  { %v7004_v19 = vpop.permute.xlu1 %7003 }
0x2686   :  { %8258 = vmatpush.msra.mxu3 %v8257_v16  ;;  %v7020_v2 = vsel %vm1604_vm7, %v7019_v8, %v7004_v19 }
0x2687   :  { %8229 = vmatmul.f32.gmra.mxu2 %v8228_v43  ;;  %8260 = vmatmul.f32.vlgmr.msra.gmra.mxu3 %v9640_v44 }
0x2688   :  { %8376 = vmatpush.msrb.mxu3 %v8212_v3  ;;  %v2959_v48 = vpop.permute.xlu0 %2958 }
0x2689   :  { %8295 = vmatmul.f32.gmra.mxu0 %v8225_v17  ;;  %8326 = vmatmul.f32.gmra.mxu1 %v8226_v22 }
0x268a   :  { %8378 = vmatpush.msrb.mxu3 %v8214_v23 }
0x268d   :  { %v7007_v26 = vpop.permute.xlu1 %7006 }
0x268e   :  { %v7021_v54 = vsel %vm46_vm0, %v7020_v2, %v7007_v26 }
0x268f   :  { %8353 = vmatmul.f32.vlgmr.msrb.gmra.mxu2 %v9640_v44  ;;  %8264 = vmatmul.f32.gmra.mxu3 %v9650_v56  ;;  %v7022_v21 = vsel %vm2965_vm15, %v7021_v54, %v7010_v33 }
0x2690   :  { %v7023_v24 = vsel %vm2967_vm3, %v7022_v21, %v7013_v13 }
0x2695   :  { %v2956_v37 = vpop.permute.xlu1 %2955 }
0x2696   :  { %v2968_v20 = vsel %vm2967_vm3, %v2966_v28, %v2956_v37 }
0x2697   :  { %v2970_v46 = vsel %vm2969_vm2, %v2968_v20, %v2959_v48  ;;  %8357 = vmatmul.f32.gmra.mxu2 %v9650_v56  ;;  %8380 = vmatmul.f32.vlgmr.msrb.gmra.mxu3 %v9640_v44 }
0x2698   :  { %2972 = vst.msk [vmem:[%s9689_s4] sm:$0xff] %vm2971_vm8, %v2970_v46 }
0x269d   :  { %v7016_v9 = vpop.permute.xlu1 %7015 }
0x269e   :  { %v7024_v50 = vsel %vm2969_vm2, %v7023_v24, %v7016_v9 }
0x269f   :  { %8414 = vst.msk [vmem:[%s9689_s4 + $0x8] sm:$0xff] %vm2971_vm8, %v7024_v50  ;;  %8384 = vmatmul.f32.gmra.mxu3 %v9650_v56  ;;  %s8553_s4 = smov [#allocation2]  }
0x26a0   :  { %s8394_s27 = sshll.u32 %s8553_s4, 4  ;;  %s8395_s27 = int_to_ptr.vmem [resolvable:$true] %s8394_s27 }
0x26fe   :  { %v8291_v5 = vpop.f32.mrf.mxu0  ;;  %v8321_v44 = vpop.f32.mrf.mxu1 }
0x2702   :  { %v8222_v15 = vpop.f32.mrf.mxu2 }
0x2706   :  { %v8296_v58 = vpop.f32.mrf.mxu0  ;;  %v8327_v23 = vpop.f32.mrf.mxu1 }
0x270a   :  { %v8261_v30 = vpop.f32.mrf.mxu3  ;;  %v8230_v63 = vpop.f32.mrf.mxu2 }
0x270b   :  { %v8262_v49 = vadd.f32 %v8261_v30, %v8222_v15 }
0x270d   :  { %v8292_v29 = vadd.f32 %v8291_v5, %v8262_v49 }
0x270f   :  { %v8322_v57 = vadd.f32 %v8321_v44, %v8292_v29 }
0x2712   :  { %v8265_v32 = vpop.f32.mrf.mxu3  ;;  %v8354_v61 = vpop.f32.mrf.mxu2 }
0x2713   :  { %v8266_v53 = vadd.f32 %v8265_v32, %v8230_v63  ;;  %v8355_v12 = vadd.f32 %v8354_v61, %v8322_v57 }
0x2715   :  { %v8297_v34 = vadd.f32 %v8296_v58, %v8266_v53 }
0x2717   :  { %v8328_v38 = vadd.f32 %v8327_v23, %v8297_v34 }
0x271a   :  { %v8381_v6 = vpop.f32.mrf.mxu3  ;;  %v8358_v56 = vpop.f32.mrf.mxu2 }
0x271b   :  { %v8382_v36 = vadd.f32 %v8381_v6, %v8355_v12  ;;  %v8359_v52 = vadd.f32 %v8358_v56, %v8328_v38 }
0x271d   :  { %8388 = vst.msk [vmem:[#allocation2] sm:$0xff] %vm46_vm0, %v8382_v36 }
0x2722   :  { %v8385_v27 = vpop.f32.mrf.mxu3 }
0x2723   :  { %v8386_v17 = vadd.f32 %v8385_v27, %v8359_v52 }
0x2725   :  { %8389 = vst.msk [vmem:[#allocation2 + $0x8] sm:$0xff] %vm46_vm0, %v8386_v17 }
0x2726   :  { %8402 = dma.vmem_to_hbm [thread:$0]  %s8395_s27, 256, %s8397_s5, [#allocation3], %s8554_s6, %s8554_s6, %s8548_s12  }
0x2727   :  { %8535 = dma.done.wait [#allocation3], 256  }
0x2728   :  { %8536 = vsyncadd [#allocation3], 4294967040 }
0x2729   :  { %8411 = vsyncpa [#allocation3], 1 }

</bundles_post_ra>
